<compile_context>
chip_gen: v6e
topology: v6e:2x2x1
jax: 0.10.0
libtpu: 0.0.40
codegen_flags: <defaults>
</compile_context>

<pallas_src>
from functools import partial

import jax
import jax.numpy as jnp
from jax.experimental import pallas as pl
from jax.experimental.pallas import tpu as pltpu

_BN_EPS = 1e-5
_ACT_DT = jnp.bfloat16          # MXU operand / activation-scratch dtype


def _round_up(x, m):
    return ((x + m - 1) // m) * m


def _vmem_limit_bytes():
    """Generation-aware scoped-VMEM limit (review #9): ~3/4 of physical VMEM
    (~96 MiB on v5e/v6e, ~48 MiB on v7x), capped at 100 MiB."""
    try:
        cap = pltpu.get_tpu_info().vmem_capacity_bytes
        return int(min(100 * 1024 * 1024, (cap * 3) // 4))
    except Exception:                                   # query unavailable
        return 48 * 1024 * 1024


# ----------------------------------------------------------------------------
# Fused kernel: one grid step == one image; everything stays in VMEM.
# ----------------------------------------------------------------------------
def _patch_embed_kernel(x0_ref, w1_ref, w2_ref, w3_ref,
                        sc1_ref, sh1_ref, sc2_ref, sh2_ref, sh3_ref,
                        o_ref, s1, s2, *, dims):
    """dims = (Ho1, Wo1, Ho2, Wo2, Cin, C1, C2);  H and W divisible by 4."""
    Ho1, Wo1, Ho2, Wo2, Cin, C1, C2 = dims
    Hh1, Wh1 = Ho2 + 1, Wo2 + 1          # parity-plane extents of scratch s1

    def conv_s2(src, w_ref, ho, wo, cin):
        """3x3 stride-2 conv from a parity-split, 1-px-padded source.

        src[rp, rh, cp, ch, c] == padded[2*rh + rp, 2*ch + cp, c], so tap
        (dy, dx) of output pixel (i, j) is a DENSE slice (review #8).  The 9
        taps are packed along K (review #2): one dot, K = 9*cin real channels,
        f32 accumulation on the MXU.
        """
        taps = [src[dy & 1, pl.ds(dy >> 1, ho), dx & 1, pl.ds(dx >> 1, wo), :]
                for dy in range(3) for dx in range(3)]
        lhs = jnp.concatenate(taps, axis=-1).reshape(ho * wo, 9 * cin)
        return jnp.dot(lhs, w_ref[...], preferred_element_type=jnp.float32)

    # ---- Halo zeroing (review #1): only the cells conv2/conv3 read that the
    # data stores below never overwrite.  Done every step: scratch is per-core
    # and the batch grid axis is 'parallel' (no program_id==0 guard).
    s1[0, pl.ds(0, 1)] = jnp.zeros((1, 2, Wh1, C1), _ACT_DT)            # padded row 0
    s1[:, :, 0, pl.ds(0, 1), :] = jnp.zeros((2, Hh1, 1, C1), _ACT_DT)   # padded col 0
    s2[pl.ds(0, 1)] = jnp.zeros((1, Wo2 + 2, C2), _ACT_DT)              # top row
    s2[pl.ds(Ho2 + 1, 1)] = jnp.zeros((1, Wo2 + 2, C2), _ACT_DT)        # bottom row
    s2[:, pl.ds(0, 1), :] = jnp.zeros((Ho2 + 2, 1, C2), _ACT_DT)        # left col
    s2[:, pl.ds(Wo2 + 1, 1), :] = jnp.zeros((Ho2 + 2, 1, C2), _ACT_DT)  # right col

    # ---- conv1 (stride 2) + BN1 (post-matmul f32 scale/shift) + ReLU.
    a1 = conv_s2(x0_ref, w1_ref, Ho1, Wo1, Cin)                 # (Ho1*Wo1, C1) f32
    y1 = jnp.maximum(a1 * sc1_ref[...] + sh1_ref[...], 0.0)
    # Store deinterleaved (row/col parity planes, 1-px halo) so conv2's
    # stride-2 taps are dense reads.  y1[i, j] lands at padded (i+1, j+1).
    y1 = y1.astype(_ACT_DT).reshape(Ho2, 2, Wo2, 2, C1)
    s1[1, pl.ds(0, Ho2), 1, pl.ds(0, Wo2), :] = y1[:, 0, :, 0, :]
    s1[1, pl.ds(0, Ho2), 0, pl.ds(1, Wo2), :] = y1[:, 0, :, 1, :]
    s1[0, pl.ds(1, Ho2), 1, pl.ds(0, Wo2), :] = y1[:, 1, :, 0, :]
    s1[0, pl.ds(1, Ho2), 0, pl.ds(1, Wo2), :] = y1[:, 1, :, 1, :]

    # ---- conv2 (stride 2) + BN2 + ReLU  ->  plain padded scratch (conv3 is s1).
    a2 = conv_s2(s1, w2_ref, Ho2, Wo2, C1)                      # (Ho2*Wo2, C2) f32
    y2 = jnp.maximum(a2 * sc2_ref[...] + sh2_ref[...], 0.0)
    s2[pl.ds(1, Ho2), pl.ds(1, Wo2), :] = y2.astype(_ACT_DT).reshape(Ho2, Wo2, C2)

    # ---- conv3 (stride 1) + bias, taps packed along K as well (K = 9*C2).
    taps3 = [s2[pl.ds(dy, Ho2), pl.ds(dx, Wo2), :]
             for dy in range(3) for dx in range(3)]
    lhs3 = jnp.concatenate(taps3, axis=-1).reshape(Ho2 * Wo2, 9 * C2)
    y3 = jnp.dot(lhs3, w3_ref[...], preferred_element_type=jnp.float32)
    y3 = y3 + sh3_ref[...]
    o_ref[...] = y3.reshape(Ho2, Wo2, C2).astype(o_ref.dtype)


@jax.jit
def patch_embedding_forward(x_nchw, params):
    """(B, 3, H, W) -> (B, (H//4)*(W//4), Cout), fused Pallas path."""
    B, Cin, H, W = x_nchw.shape
    if H % 4 != 0 or W % 4 != 0:
        # TODO(synk): generalize the halo / parity bookkeeping to odd sizes.
        return _patch_embedding_forward_unfused(x_nchw, params)

    Ho1, Wo1 = H // 2, W // 2
    Ho2, Wo2 = H // 4, W // 4
    C1 = params["w1"].shape[3]
    C2 = params["w3"].shape[3]
    Cin_p = 4                      # pad 3->4 input channels: even lane chunks, K1=36

    # Kernel-ready input (reviews #5/#8): NHWC bf16 with a 1-px zero halo,
    # rows and columns split into even/odd parity planes so every stride-2 tap
    # read inside the kernel is a dense slice.  One fused XLA pad+transpose at
    # half the bytes of the old f32 NHWC copy; the kernel uses it directly.
    x = jnp.transpose(x_nchw, (0, 2, 3, 1)).astype(_ACT_DT)
    xp = jnp.pad(x, ((0, 0), (1, 1), (1, 1), (0, Cin_p - Cin)))
    Hh0, Wh0 = Ho1 + 1, Wo1 + 1
    # x0[b, rp, rh, cp, ch, c] = padded[b, 2*rh + rp, 2*ch + cp, c]
    x0 = xp.reshape(B, Hh0, 2, Wh0, 2, Cin_p).transpose(0, 2, 1, 4, 3, 5)

    # Eval-mode BatchNorm folded to per-channel scale/shift, applied in f32
    # after the matmul (keeps bf16 weights well-scaled).
    sc1v = params["bn1_gamma"] * jax.lax.rsqrt(params["bn1_var"] + _BN_EPS)
    sc2v = params["bn2_gamma"] * jax.lax.rsqrt(params["bn2_var"] + _BN_EPS)
    sc1 = sc1v.reshape(1, C1).astype(jnp.float32)
    sh1 = (params["bn1_beta"] - params["bn1_mean"] * sc1v).reshape(1, C1).astype(jnp.float32)
    sc2 = sc2v.reshape(1, C2).astype(jnp.float32)
    sh2 = (params["bn2_beta"] - params["bn2_mean"] * sc2v).reshape(1, C2).astype(jnp.float32)
    sh3 = params["b3"].reshape(1, C2).astype(jnp.float32)

    # Packed im2col weights (review #2): (3,3,Ci,Co) -> (9*Ci, Co) bf16, with
    # NO zero-lane padding of K or N.
    w1p = jnp.pad(params["w1"], ((0, 0), (0, 0), (0, Cin_p - Cin), (0, 0))
                  ).reshape(9 * Cin_p, C1).astype(_ACT_DT)
    w2p = params["w2"].reshape(9 * C1, C2).astype(_ACT_DT)
    w3p = params["w3"].reshape(9 * C2, C2).astype(_ACT_DT)

    dims = (Ho1, Wo1, Ho2, Wo2, Cin_p, C1, C2)

    out = pl.pallas_call(
        partial(_patch_embed_kernel, dims=dims),
        out_shape=jax.ShapeDtypeStruct((B, Ho2, Wo2, C2), jnp.float32),
        grid_spec=pltpu.PrefetchScalarGridSpec(
            num_scalar_prefetch=0,
            grid=(B,),      # >= 2 'parallel' steps at B >= 2 -> both v7x cores busy
            in_specs=[
                pl.BlockSpec((None, 2, Hh0, 2, Wh0, Cin_p),
                             lambda b: (b, 0, 0, 0, 0, 0)),
                pl.BlockSpec((9 * Cin_p, C1), lambda b: (0, 0)),
                pl.BlockSpec((9 * C1, C2), lambda b: (0, 0)),
                pl.BlockSpec((9 * C2, C2), lambda b: (0, 0)),
                pl.BlockSpec((1, C1), lambda b: (0, 0)),
                pl.BlockSpec((1, C1), lambda b: (0, 0)),
                pl.BlockSpec((1, C2), lambda b: (0, 0)),
                pl.BlockSpec((1, C2), lambda b: (0, 0)),
                pl.BlockSpec((1, C2), lambda b: (0, 0)),
            ],
            out_specs=pl.BlockSpec((None, Ho2, Wo2, C2),
                                   lambda b: (b, 0, 0, 0)),
            scratch_shapes=[
                # conv1 output: 1-px halo, row/col parity-split, bf16 (review #4)
                pltpu.VMEM((2, Ho2 + 1, 2, Wo2 + 1, C1), _ACT_DT),
                # conv2 output: 1-px halo, plain layout (conv3 is stride 1)
                pltpu.VMEM((Ho2 + 2, Wo2 + 2, C2), _ACT_DT),
            ]),
        compiler_params=pltpu.CompilerParams(
            dimension_semantics=("parallel",),
            vmem_limit_bytes=_vmem_limit_bytes()),
    )(x0, w1p, w2p, w3p, sc1, sh1, sc2, sh2, sh3)

    # (B, Ho2, Wo2, C2) -> (B, Ho2*Wo2, C2): contiguous merge, no copy
    # (== permute(0, 2, 3, 1).reshape(b, h*w, c) in the PyTorch module).
    return out.reshape(B, Ho2 * Wo2, C2)


# ----------------------------------------------------------------------------
# Fallback (unfused: XLA im2col + a simple Pallas matmul+affine kernel).
# Used only if the fused path cannot be lowered on this jax/TPU version, or
# for spatial sizes not divisible by 4.  Numerics of whichever path ran are
# strictly checked against the f32 reference in __main__ (not papered over).
# ----------------------------------------------------------------------------
def _mm_affine_kernel(p_ref, w_ref, b_ref, o_ref, *, relu):
    y = jnp.dot(p_ref[...], w_ref[...], preferred_element_type=jnp.float32)
    y = y + b_ref[...]
    if relu:
        y = jnp.maximum(y, 0.0)
    o_ref[...] = y.astype(o_ref.dtype)


def _conv_via_matmul(x_nhwc, w_hwio, scale, shift, stride, relu):
    B, H, W, _ = x_nhwc.shape
    kh, kw, ci, co = w_hwio.shape
    xp = jnp.pad(x_nhwc, ((0, 0), (1, 1), (1, 1), (0, 0)))
    Ho = (H - 1) // stride + 1
    Wo = (W - 1) // stride + 1
    taps = [xp[:, dy:dy + stride * Ho:stride, dx:dx + stride * Wo:stride, :]
            for dy in range(kh) for dx in range(kw)]
    p = jnp.concatenate(taps, axis=-1).reshape(B * Ho * Wo, kh * kw * ci)
    w = (w_hwio.astype(jnp.float32) * scale[None, None, None, :]
         ).reshape(kh * kw * ci, co)
    co_p = _round_up(co, 128)
    w = jnp.pad(w, ((0, 0), (0, co_p - co)))
    b = jnp.pad(shift.astype(jnp.float32), (0, co_p - co)).reshape(1, co_p)
    M, K = p.shape
    TM = min(_round_up(M, 8), 512)
    Mp = _round_up(M, TM)
    p = jnp.pad(p, ((0, Mp - M), (0, 0)))
    out = pl.pallas_call(
        partial(_mm_affine_kernel, relu=relu),
        out_shape=jax.ShapeDtypeStruct((Mp, co_p), jnp.float32),
        grid_spec=pltpu.PrefetchScalarGridSpec(
            num_scalar_prefetch=0, grid=(Mp // TM,),
            in_specs=[pl.BlockSpec((TM, K), lambda i: (i, 0)),
                      pl.BlockSpec((K, co_p), lambda i: (0, 0)),
                      pl.BlockSpec((1, co_p), lambda i: (0, 0))],
            out_specs=pl.BlockSpec((TM, co_p), lambda i: (i, 0))),
        compiler_params=pltpu.CompilerParams(
            dimension_semantics=("parallel",)),
    )(p, w, b)
    return out[:M, :co].reshape(B, Ho, Wo, co)


@jax.jit
def _patch_embedding_forward_unfused(x_nchw, params):
    x = jnp.transpose(x_nchw, (0, 2, 3, 1)).astype(jnp.float32)
    sc1 = params["bn1_gamma"] * jax.lax.rsqrt(params["bn1_var"] + _BN_EPS)
    sh1 = params["bn1_beta"] - params["bn1_mean"] * sc1
    x = _conv_via_matmul(x, params["w1"], sc1, sh1, 2, True)
    sc2 = params["bn2_gamma"] * jax.lax.rsqrt(params["bn2_var"] + _BN_EPS)
    sh2 = params["bn2_beta"] - params["bn2_mean"] * sc2
    x = _conv_via_matmul(x, params["w2"], sc2, sh2, 2, True)
    co = params["w3"].shape[3]
    x = _conv_via_matmul(x, params["w3"], jnp.ones((co,), jnp.float32),
                         params["b3"], 1, False)
    B, Ho, Wo, C = x.shape
    return x.reshape(B, Ho * Wo, C)


# ----------------------------------------------------------------------------
# Pure-JAX reference (correctness oracle only).
# ----------------------------------------------------------------------------
def _reference_forward(x_nchw, params):
    x = jnp.transpose(x_nchw, (0, 2, 3, 1)).astype(jnp.float32)

    def conv(a, w, stride):
        return jax.lax.conv_general_dilated(
            a, w, window_strides=(stride, stride), padding=((1, 1), (1, 1)),
            dimension_numbers=("NHWC", "HWIO", "NHWC"),
            precision=jax.lax.Precision.HIGHEST)

    sc1 = params["bn1_gamma"] * jax.lax.rsqrt(params["bn1_var"] + _BN_EPS)
    b1 = params["bn1_beta"] - params["bn1_mean"] * sc1
    y = jnp.maximum(conv(x, params["w1"], 2) * sc1 + b1, 0.0)
    sc2 = params["bn2_gamma"] * jax.lax.rsqrt(params["bn2_var"] + _BN_EPS)
    b2 = params["bn2_beta"] - params["bn2_mean"] * sc2
    y = jnp.maximum(conv(y, params["w2"], 2) * sc2 + b2, 0.0)
    y = conv(y, params["w3"], 1) + params["b3"]
    B, Ho, Wo, C = y.shape
    return y.reshape(B, Ho * Wo, C)


def init_params(key, inter_channel=32, out_channels=48):
    """Conv weights in HWIO (kh, kw, Cin, Cout) layout.

    NOTE: real PyTorch Conv2d weights are (Cout, Cin, kh, kw); permute with
    w.permute(2, 3, 1, 0) before use, or results are silently wrong.
    BatchNorm parameters are eval-mode running statistics.
    """
    keys = jax.random.split(key, 6)
    scale = 0.1
    return {
        "w1": scale * jax.random.normal(keys[0], (3, 3, 3, inter_channel),
                                        jnp.float32),
        "w2": scale * jax.random.normal(keys[1], (3, 3, inter_channel,
                                                  out_channels), jnp.float32),
        "w3": scale * jax.random.normal(keys[2], (3, 3, out_channels,
                                                  out_channels), jnp.float32),
        "b3": scale * jax.random.normal(keys[3], (out_channels,), jnp.float32),
        "bn1_gamma": 1.0 + 0.1 * jax.random.normal(keys[4], (inter_channel,),
                                                   jnp.float32),
        "bn1_beta": jnp.linspace(-0.1, 0.1, inter_channel, dtype=jnp.float32),
        "bn1_mean": jnp.zeros((inter_channel,), jnp.float32),
        "bn1_var": jnp.ones((inter_channel,), jnp.float32),
        "bn2_gamma": 1.0 + 0.1 * jax.random.normal(keys[5], (out_channels,),
                                                   jnp.float32),
        "bn2_beta": jnp.linspace(-0.1, 0.1, out_channels, dtype=jnp.float32),
        "bn2_mean": jnp.zeros((out_channels,), jnp.float32),
        "bn2_var": jnp.ones((out_channels,), jnp.float32),
    }


if __name__ == "__main__":
    key = jax.random.PRNGKey(0)
    k_x, k_p = jax.random.split(key)

    # PyTorch NCHW convention: (B=2, C=3, H=16, W=16).
    x = jax.random.normal(k_x, (2, 3, 16, 16), jnp.float32)
    params = init_params(k_p, inter_channel=32, out_channels=48)

    ref = _reference_forward(x, params)

    try:
        out = jax.block_until_ready(patch_embedding_forward(x, params))
    except Exception:
        # Safety net only for jax/Mosaic versions that reject an op used by
        # the fused path (e.g. unaligned lane concatenation); the numerics of
        # whichever path ran are still strictly checked below.
        out = jax.block_until_ready(_patch_embedding_forward_unfused(x, params))

    assert out.shape == ref.shape, (out.shape, ref.shape)
    max_ref = float(jnp.max(jnp.abs(ref)))
    err = float(jnp.max(jnp.abs(out.astype(jnp.float32) - ref)))
    # bf16 operands with f32 accumulation: expect <~1% of max|ref|; 5% bound.
    assert err <= 5e-2 * max_ref + 1e-4, f"max|err|={err}, max|ref|={max_ref}"
    assert out.shape == (2, (16 // 4) * (16 // 4), 48), out.shape
    print("KERNEL_OK")
</pallas_src>

<mosaic_0001>
module attributes {stable_mosaic.version = 11 : i64} {
  func.func @_patch_embed_kernel(%arg0: i32, %arg1: memref<1x2x9x2x9x4xbf16, #tpu.memory_space<vmem>>, %arg2: memref<36x32xbf16, #tpu.memory_space<vmem>>, %arg3: memref<288x48xbf16, #tpu.memory_space<vmem>>, %arg4: memref<432x48xbf16, #tpu.memory_space<vmem>>, %arg5: memref<1x32xf32, #tpu.memory_space<vmem>>, %arg6: memref<1x32xf32, #tpu.memory_space<vmem>>, %arg7: memref<1x48xf32, #tpu.memory_space<vmem>>, %arg8: memref<1x48xf32, #tpu.memory_space<vmem>>, %arg9: memref<1x48xf32, #tpu.memory_space<vmem>>, %arg10: memref<1x4x4x48xf32, #tpu.memory_space<vmem>>, %arg11: memref<2x5x2x5x32xbf16, #tpu.memory_space<vmem>>, %arg12: memref<6x6x48xbf16, #tpu.memory_space<vmem>>) attributes {dimension_semantics = [#tpu.dimension_semantics<parallel>], iteration_bounds = array<i64: 2>, scalar_prefetch = 0 : i64, scratch_operands = 2 : i64, tpu.core_type = #tpu.core_type<tc>, window_params = [{transform_indices = @transform_0, window_bounds = array<i64: 1, 2, 9, 2, 9, 4>}, {pipeline_mode = #tpu.pipeline_mode<synchronous>, transform_indices = @transform_1, window_bounds = array<i64: 36, 32>}, {pipeline_mode = #tpu.pipeline_mode<synchronous>, transform_indices = @transform_2, window_bounds = array<i64: 288, 48>}, {pipeline_mode = #tpu.pipeline_mode<synchronous>, transform_indices = @transform_3, window_bounds = array<i64: 432, 48>}, {pipeline_mode = #tpu.pipeline_mode<synchronous>, transform_indices = @transform_4, window_bounds = array<i64: 1, 32>}, {pipeline_mode = #tpu.pipeline_mode<synchronous>, transform_indices = @transform_5, window_bounds = array<i64: 1, 32>}, {pipeline_mode = #tpu.pipeline_mode<synchronous>, transform_indices = @transform_6, window_bounds = array<i64: 1, 48>}, {pipeline_mode = #tpu.pipeline_mode<synchronous>, transform_indices = @transform_7, window_bounds = array<i64: 1, 48>}, {pipeline_mode = #tpu.pipeline_mode<synchronous>, transform_indices = @transform_8, window_bounds = array<i64: 1, 48>}, {transform_indices = @transform_9, window_bounds = array<i64: 1, 4, 4, 48>}]} {
    %cst = arith.constant 0.000000e+00 : bf16
    %0 = vector.broadcast %cst : bf16 to vector<1x2x5x32xbf16>
    %c0 = arith.constant 0 : index
    %c0_0 = arith.constant 0 : index
    %c0_1 = arith.constant 0 : index
    %c0_2 = arith.constant 0 : index
    %c0_3 = arith.constant 0 : index
    %1 = vector.load %arg11[%c0, %c0_0, %c0_1, %c0_2, %c0_3] : memref<2x5x2x5x32xbf16, #tpu.memory_space<vmem>>, vector<1x1x2x5x32xbf16>
    %2 = vector.shape_cast %1 : vector<1x1x2x5x32xbf16> to vector<1x2x5x32xbf16>
    %3 = vector.shape_cast %0 : vector<1x2x5x32xbf16> to vector<1x1x2x5x32xbf16>
    tpu.vector_store %arg11[%c0, %c0_0, %c0_1, %c0_2, %c0_3], %3 {strides = array<i32>} : memref<2x5x2x5x32xbf16, #tpu.memory_space<vmem>>, vector<1x1x2x5x32xbf16>,
    %cst_4 = arith.constant 0.000000e+00 : bf16
    %4 = vector.broadcast %cst_4 : bf16 to vector<2x5x1x32xbf16>
    %c0_5 = arith.constant 0 : index
    %c0_6 = arith.constant 0 : index
    %c0_7 = arith.constant 0 : index
    %c0_8 = arith.constant 0 : index
    %c0_9 = arith.constant 0 : index
    %5 = vector.load %arg11[%c0_5, %c0_6, %c0_7, %c0_8, %c0_9] : memref<2x5x2x5x32xbf16, #tpu.memory_space<vmem>>, vector<2x5x1x1x32xbf16>
    %6 = vector.shape_cast %5 : vector<2x5x1x1x32xbf16> to vector<2x5x1x32xbf16>
    %7 = vector.shape_cast %4 : vector<2x5x1x32xbf16> to vector<2x5x1x1x32xbf16>
    tpu.vector_store %arg11[%c0_5, %c0_6, %c0_7, %c0_8, %c0_9], %7 {strides = array<i32>} : memref<2x5x2x5x32xbf16, #tpu.memory_space<vmem>>, vector<2x5x1x1x32xbf16>,
    %cst_10 = arith.constant 0.000000e+00 : bf16
    %8 = vector.broadcast %cst_10 : bf16 to vector<1x6x48xbf16>
    %c0_11 = arith.constant 0 : index
    %c0_12 = arith.constant 0 : index
    %c0_13 = arith.constant 0 : index
    %9 = vector.load %arg12[%c0_11, %c0_12, %c0_13] : memref<6x6x48xbf16, #tpu.memory_space<vmem>>, vector<1x6x48xbf16>
    tpu.vector_store %arg12[%c0_11, %c0_12, %c0_13], %8 {strides = array<i32>} : memref<6x6x48xbf16, #tpu.memory_space<vmem>>, vector<1x6x48xbf16>,
    %cst_14 = arith.constant 0.000000e+00 : bf16
    %10 = vector.broadcast %cst_14 : bf16 to vector<1x6x48xbf16>
    %c5 = arith.constant 5 : index
    %c0_15 = arith.constant 0 : index
    %c0_16 = arith.constant 0 : index
    %11 = vector.load %arg12[%c5, %c0_15, %c0_16] : memref<6x6x48xbf16, #tpu.memory_space<vmem>>, vector<1x6x48xbf16>
    tpu.vector_store %arg12[%c5, %c0_15, %c0_16], %10 {strides = array<i32>} : memref<6x6x48xbf16, #tpu.memory_space<vmem>>, vector<1x6x48xbf16>,
    %cst_17 = arith.constant 0.000000e+00 : bf16
    %12 = vector.broadcast %cst_17 : bf16 to vector<6x1x48xbf16>
    %c0_18 = arith.constant 0 : index
    %c0_19 = arith.constant 0 : index
    %c0_20 = arith.constant 0 : index
    %13 = vector.load %arg12[%c0_18, %c0_19, %c0_20] : memref<6x6x48xbf16, #tpu.memory_space<vmem>>, vector<6x1x48xbf16>
    tpu.vector_store %arg12[%c0_18, %c0_19, %c0_20], %12 {strides = array<i32>} : memref<6x6x48xbf16, #tpu.memory_space<vmem>>, vector<6x1x48xbf16>,
    %cst_21 = arith.constant 0.000000e+00 : bf16
    %14 = vector.broadcast %cst_21 : bf16 to vector<6x1x48xbf16>
    %c0_22 = arith.constant 0 : index
    %c5_23 = arith.constant 5 : index
    %c0_24 = arith.constant 0 : index
    %15 = vector.load %arg12[%c0_22, %c5_23, %c0_24] : memref<6x6x48xbf16, #tpu.memory_space<vmem>>, vector<6x1x48xbf16>
    tpu.vector_store %arg12[%c0_22, %c5_23, %c0_24], %14 {strides = array<i32>} : memref<6x6x48xbf16, #tpu.memory_space<vmem>>, vector<6x1x48xbf16>,
    %c0_25 = arith.constant 0 : index
    %c0_26 = arith.constant 0 : index
    %c0_27 = arith.constant 0 : index
    %c0_28 = arith.constant 0 : index
    %c0_29 = arith.constant 0 : index
    %c0_30 = arith.constant 0 : index
    %16 = vector.load %arg1[%c0_25, %c0_26, %c0_27, %c0_28, %c0_29, %c0_30] : memref<1x2x9x2x9x4xbf16, #tpu.memory_space<vmem>>, vector<1x1x8x1x8x4xbf16>
    %17 = vector.shape_cast %16 : vector<1x1x8x1x8x4xbf16> to vector<8x8x4xbf16>
    %c0_31 = arith.constant 0 : index
    %c0_32 = arith.constant 0 : index
    %c0_33 = arith.constant 0 : index
    %c1 = arith.constant 1 : index
    %c0_34 = arith.constant 0 : index
    %c0_35 = arith.constant 0 : index
    %18 = vector.load %arg1[%c0_31, %c0_32, %c0_33, %c1, %c0_34, %c0_35] : memref<1x2x9x2x9x4xbf16, #tpu.memory_space<vmem>>, vector<1x1x8x1x8x4xbf16>
    %19 = vector.shape_cast %18 : vector<1x1x8x1x8x4xbf16> to vector<8x8x4xbf16>
    %c0_36 = arith.constant 0 : index
    %c0_37 = arith.constant 0 : index
    %c0_38 = arith.constant 0 : index
    %c0_39 = arith.constant 0 : index
    %c1_40 = arith.constant 1 : index
    %c0_41 = arith.constant 0 : index
    %20 = vector.load %arg1[%c0_36, %c0_37, %c0_38, %c0_39, %c1_40, %c0_41] : memref<1x2x9x2x9x4xbf16, #tpu.memory_space<vmem>>, vector<1x1x8x1x8x4xbf16>
    %21 = vector.shape_cast %20 : vector<1x1x8x1x8x4xbf16> to vector<8x8x4xbf16>
    %c0_42 = arith.constant 0 : index
    %c1_43 = arith.constant 1 : index
    %c0_44 = arith.constant 0 : index
    %c0_45 = arith.constant 0 : index
    %c0_46 = arith.constant 0 : index
    %c0_47 = arith.constant 0 : index
    %22 = vector.load %arg1[%c0_42, %c1_43, %c0_44, %c0_45, %c0_46, %c0_47] : memref<1x2x9x2x9x4xbf16, #tpu.memory_space<vmem>>, vector<1x1x8x1x8x4xbf16>
    %23 = vector.shape_cast %22 : vector<1x1x8x1x8x4xbf16> to vector<8x8x4xbf16>
    %c0_48 = arith.constant 0 : index
    %c1_49 = arith.constant 1 : index
    %c0_50 = arith.constant 0 : index
    %c1_51 = arith.constant 1 : index
    %c0_52 = arith.constant 0 : index
    %c0_53 = arith.constant 0 : index
    %24 = vector.load %arg1[%c0_48, %c1_49, %c0_50, %c1_51, %c0_52, %c0_53] : memref<1x2x9x2x9x4xbf16, #tpu.memory_space<vmem>>, vector<1x1x8x1x8x4xbf16>
    %25 = vector.shape_cast %24 : vector<1x1x8x1x8x4xbf16> to vector<8x8x4xbf16>
    %c0_54 = arith.constant 0 : index
    %c1_55 = arith.constant 1 : index
    %c0_56 = arith.constant 0 : index
    %c0_57 = arith.constant 0 : index
    %c1_58 = arith.constant 1 : index
    %c0_59 = arith.constant 0 : index
    %26 = vector.load %arg1[%c0_54, %c1_55, %c0_56, %c0_57, %c1_58, %c0_59] : memref<1x2x9x2x9x4xbf16, #tpu.memory_space<vmem>>, vector<1x1x8x1x8x4xbf16>
    %27 = vector.shape_cast %26 : vector<1x1x8x1x8x4xbf16> to vector<8x8x4xbf16>
    %c0_60 = arith.constant 0 : index
    %c0_61 = arith.constant 0 : index
    %c1_62 = arith.constant 1 : index
    %c0_63 = arith.constant 0 : index
    %c0_64 = arith.constant 0 : index
    %c0_65 = arith.constant 0 : index
    %28 = vector.load %arg1[%c0_60, %c0_61, %c1_62, %c0_63, %c0_64, %c0_65] : memref<1x2x9x2x9x4xbf16, #tpu.memory_space<vmem>>, vector<1x1x8x1x8x4xbf16>
    %29 = vector.shape_cast %28 : vector<1x1x8x1x8x4xbf16> to vector<8x8x4xbf16>
    %c0_66 = arith.constant 0 : index
    %c0_67 = arith.constant 0 : index
    %c1_68 = arith.constant 1 : index
    %c1_69 = arith.constant 1 : index
    %c0_70 = arith.constant 0 : index
    %c0_71 = arith.constant 0 : index
    %30 = vector.load %arg1[%c0_66, %c0_67, %c1_68, %c1_69, %c0_70, %c0_71] : memref<1x2x9x2x9x4xbf16, #tpu.memory_space<vmem>>, vector<1x1x8x1x8x4xbf16>
    %31 = vector.shape_cast %30 : vector<1x1x8x1x8x4xbf16> to vector<8x8x4xbf16>
    %c0_72 = arith.constant 0 : index
    %c0_73 = arith.constant 0 : index
    %c1_74 = arith.constant 1 : index
    %c0_75 = arith.constant 0 : index
    %c1_76 = arith.constant 1 : index
    %c0_77 = arith.constant 0 : index
    %32 = vector.load %arg1[%c0_72, %c0_73, %c1_74, %c0_75, %c1_76, %c0_77] : memref<1x2x9x2x9x4xbf16, #tpu.memory_space<vmem>>, vector<1x1x8x1x8x4xbf16>
    %33 = vector.shape_cast %32 : vector<1x1x8x1x8x4xbf16> to vector<8x8x4xbf16>
    %34 = tpu.concatenate %17, %19, %21, %23, %25, %27, %29, %31, %33 in 2 : vector<8x8x4xbf16>, vector<8x8x4xbf16>, vector<8x8x4xbf16>, vector<8x8x4xbf16>, vector<8x8x4xbf16>, vector<8x8x4xbf16>, vector<8x8x4xbf16>, vector<8x8x4xbf16>, vector<8x8x4xbf16> -> vector<8x8x36xbf16>
    %35 = vector.shape_cast %34 : vector<8x8x36xbf16> to vector<64x36xbf16>
    %c0_78 = arith.constant 0 : index
    %c0_79 = arith.constant 0 : index
    %36 = vector.load %arg2[%c0_78, %c0_79] : memref<36x32xbf16, #tpu.memory_space<vmem>>, vector<36x32xbf16>
    %cst_80 = arith.constant dense<0.000000e+00> : vector<64x32xf32>
    %37 = tpu.matmul %35, %36, %cst_80 {dimension_numbers = #tpu.dot_dimension_numbers<[1], [0], [0], [1], [0, 0, 1, 1], [], []>} : vector<64x36xbf16>, vector<36x32xbf16>, vector<64x32xf32> -> vector<64x32xf32>
    %c0_81 = arith.constant 0 : index
    %c0_82 = arith.constant 0 : index
    %38 = vector.load %arg5[%c0_81, %c0_82] : memref<1x32xf32, #tpu.memory_space<vmem>>, vector<1x32xf32>
    %39 = vector.broadcast %38 : vector<1x32xf32> to vector<64x32xf32>
    %40 = arith.mulf %37, %39 : vector<64x32xf32>
    %c0_83 = arith.constant 0 : index
    %c0_84 = arith.constant 0 : index
    %41 = vector.load %arg6[%c0_83, %c0_84] : memref<1x32xf32, #tpu.memory_space<vmem>>, vector<1x32xf32>
    %42 = vector.broadcast %41 : vector<1x32xf32> to vector<64x32xf32>
    %43 = arith.addf %40, %42 : vector<64x32xf32>
    %cst_85 = arith.constant 0.000000e+00 : f32
    %44 = vector.broadcast %cst_85 : f32 to vector<64x32xf32>
    %45 = arith.maximumf %43, %44 : vector<64x32xf32>
    %46 = arith.truncf %45 : vector<64x32xf32> to vector<64x32xbf16>
    %47 = vector.shape_cast %46 : vector<64x32xbf16> to vector<4x2x4x2x32xbf16>
    %48 = vector.extract_strided_slice %47 {offsets = [0, 0, 0, 0, 0], sizes = [4, 1, 4, 1, 32], strides = [1, 1, 1, 1, 1]} : vector<4x2x4x2x32xbf16> to vector<4x1x4x1x32xbf16>
    %49 = vector.shape_cast %48 : vector<4x1x4x1x32xbf16> to vector<4x4x32xbf16>
    %c1_86 = arith.constant 1 : index
    %c0_87 = arith.constant 0 : index
    %c1_88 = arith.constant 1 : index
    %c0_89 = arith.constant 0 : index
    %c0_90 = arith.constant 0 : index
    %50 = vector.load %arg11[%c1_86, %c0_87, %c1_88, %c0_89, %c0_90] : memref<2x5x2x5x32xbf16, #tpu.memory_space<vmem>>, vector<1x4x1x4x32xbf16>
    %51 = vector.shape_cast %50 : vector<1x4x1x4x32xbf16> to vector<4x4x32xbf16>
    %52 = vector.shape_cast %49 : vector<4x4x32xbf16> to vector<1x4x1x4x32xbf16>
    tpu.vector_store %arg11[%c1_86, %c0_87, %c1_88, %c0_89, %c0_90], %52 {strides = array<i32>} : memref<2x5x2x5x32xbf16, #tpu.memory_space<vmem>>, vector<1x4x1x4x32xbf16>,
    %53 = vector.extract_strided_slice %47 {offsets = [0, 0, 0, 1, 0], sizes = [4, 1, 4, 1, 32], strides = [1, 1, 1, 1, 1]} : vector<4x2x4x2x32xbf16> to vector<4x1x4x1x32xbf16>
    %54 = vector.shape_cast %53 : vector<4x1x4x1x32xbf16> to vector<4x4x32xbf16>
    %c1_91 = arith.constant 1 : index
    %c0_92 = arith.constant 0 : index
    %c0_93 = arith.constant 0 : index
    %c1_94 = arith.constant 1 : index
    %c0_95 = arith.constant 0 : index
    %55 = vector.load %arg11[%c1_91, %c0_92, %c0_93, %c1_94, %c0_95] : memref<2x5x2x5x32xbf16, #tpu.memory_space<vmem>>, vector<1x4x1x4x32xbf16>
    %56 = vector.shape_cast %55 : vector<1x4x1x4x32xbf16> to vector<4x4x32xbf16>
    %57 = vector.shape_cast %54 : vector<4x4x32xbf16> to vector<1x4x1x4x32xbf16>
    tpu.vector_store %arg11[%c1_91, %c0_92, %c0_93, %c1_94, %c0_95], %57 {strides = array<i32>} : memref<2x5x2x5x32xbf16, #tpu.memory_space<vmem>>, vector<1x4x1x4x32xbf16>,
    %58 = vector.extract_strided_slice %47 {offsets = [0, 1, 0, 0, 0], sizes = [4, 1, 4, 1, 32], strides = [1, 1, 1, 1, 1]} : vector<4x2x4x2x32xbf16> to vector<4x1x4x1x32xbf16>
    %59 = vector.shape_cast %58 : vector<4x1x4x1x32xbf16> to vector<4x4x32xbf16>
    %c0_96 = arith.constant 0 : index
    %c1_97 = arith.constant 1 : index
    %c1_98 = arith.constant 1 : index
    %c0_99 = arith.constant 0 : index
    %c0_100 = arith.constant 0 : index
    %60 = vector.load %arg11[%c0_96, %c1_97, %c1_98, %c0_99, %c0_100] : memref<2x5x2x5x32xbf16, #tpu.memory_space<vmem>>, vector<1x4x1x4x32xbf16>
    %61 = vector.shape_cast %60 : vector<1x4x1x4x32xbf16> to vector<4x4x32xbf16>
    %62 = vector.shape_cast %59 : vector<4x4x32xbf16> to vector<1x4x1x4x32xbf16>
    tpu.vector_store %arg11[%c0_96, %c1_97, %c1_98, %c0_99, %c0_100], %62 {strides = array<i32>} : memref<2x5x2x5x32xbf16, #tpu.memory_space<vmem>>, vector<1x4x1x4x32xbf16>,
    %63 = vector.extract_strided_slice %47 {offsets = [0, 1, 0, 1, 0], sizes = [4, 1, 4, 1, 32], strides = [1, 1, 1, 1, 1]} : vector<4x2x4x2x32xbf16> to vector<4x1x4x1x32xbf16>
    %64 = vector.shape_cast %63 : vector<4x1x4x1x32xbf16> to vector<4x4x32xbf16>
    %c0_101 = arith.constant 0 : index
    %c1_102 = arith.constant 1 : index
    %c0_103 = arith.constant 0 : index
    %c1_104 = arith.constant 1 : index
    %c0_105 = arith.constant 0 : index
    %65 = vector.load %arg11[%c0_101, %c1_102, %c0_103, %c1_104, %c0_105] : memref<2x5x2x5x32xbf16, #tpu.memory_space<vmem>>, vector<1x4x1x4x32xbf16>
    %66 = vector.shape_cast %65 : vector<1x4x1x4x32xbf16> to vector<4x4x32xbf16>
    %67 = vector.shape_cast %64 : vector<4x4x32xbf16> to vector<1x4x1x4x32xbf16>
    tpu.vector_store %arg11[%c0_101, %c1_102, %c0_103, %c1_104, %c0_105], %67 {strides = array<i32>} : memref<2x5x2x5x32xbf16, #tpu.memory_space<vmem>>, vector<1x4x1x4x32xbf16>,
    %c0_106 = arith.constant 0 : index
    %c0_107 = arith.constant 0 : index
    %c0_108 = arith.constant 0 : index
    %c0_109 = arith.constant 0 : index
    %c0_110 = arith.constant 0 : index
    %68 = vector.load %arg11[%c0_106, %c0_107, %c0_108, %c0_109, %c0_110] : memref<2x5x2x5x32xbf16, #tpu.memory_space<vmem>>, vector<1x4x1x4x32xbf16>
    %69 = vector.shape_cast %68 : vector<1x4x1x4x32xbf16> to vector<4x4x32xbf16>
    %c0_111 = arith.constant 0 : index
    %c0_112 = arith.constant 0 : index
    %c1_113 = arith.constant 1 : index
    %c0_114 = arith.constant 0 : index
    %c0_115 = arith.constant 0 : index
    %70 = vector.load %arg11[%c0_111, %c0_112, %c1_113, %c0_114, %c0_115] : memref<2x5x2x5x32xbf16, #tpu.memory_space<vmem>>, vector<1x4x1x4x32xbf16>
    %71 = vector.shape_cast %70 : vector<1x4x1x4x32xbf16> to vector<4x4x32xbf16>
    %c0_116 = arith.constant 0 : index
    %c0_117 = arith.constant 0 : index
    %c0_118 = arith.constant 0 : index
    %c1_119 = arith.constant 1 : index
    %c0_120 = arith.constant 0 : index
    %72 = vector.load %arg11[%c0_116, %c0_117, %c0_118, %c1_119, %c0_120] : memref<2x5x2x5x32xbf16, #tpu.memory_space<vmem>>, vector<1x4x1x4x32xbf16>
    %73 = vector.shape_cast %72 : vector<1x4x1x4x32xbf16> to vector<4x4x32xbf16>
    %c1_121 = arith.constant 1 : index
    %c0_122 = arith.constant 0 : index
    %c0_123 = arith.constant 0 : index
    %c0_124 = arith.constant 0 : index
    %c0_125 = arith.constant 0 : index
    %74 = vector.load %arg11[%c1_121, %c0_122, %c0_123, %c0_124, %c0_125] : memref<2x5x2x5x32xbf16, #tpu.memory_space<vmem>>, vector<1x4x1x4x32xbf16>
    %75 = vector.shape_cast %74 : vector<1x4x1x4x32xbf16> to vector<4x4x32xbf16>
    %c1_126 = arith.constant 1 : index
    %c0_127 = arith.constant 0 : index
    %c1_128 = arith.constant 1 : index
    %c0_129 = arith.constant 0 : index
    %c0_130 = arith.constant 0 : index
    %76 = vector.load %arg11[%c1_126, %c0_127, %c1_128, %c0_129, %c0_130] : memref<2x5x2x5x32xbf16, #tpu.memory_space<vmem>>, vector<1x4x1x4x32xbf16>
    %77 = vector.shape_cast %76 : vector<1x4x1x4x32xbf16> to vector<4x4x32xbf16>
    %c1_131 = arith.constant 1 : index
    %c0_132 = arith.constant 0 : index
    %c0_133 = arith.constant 0 : index
    %c1_134 = arith.constant 1 : index
    %c0_135 = arith.constant 0 : index
    %78 = vector.load %arg11[%c1_131, %c0_132, %c0_133, %c1_134, %c0_135] : memref<2x5x2x5x32xbf16, #tpu.memory_space<vmem>>, vector<1x4x1x4x32xbf16>
    %79 = vector.shape_cast %78 : vector<1x4x1x4x32xbf16> to vector<4x4x32xbf16>
    %c0_136 = arith.constant 0 : index
    %c1_137 = arith.constant 1 : index
    %c0_138 = arith.constant 0 : index
    %c0_139 = arith.constant 0 : index
    %c0_140 = arith.constant 0 : index
    %80 = vector.load %arg11[%c0_136, %c1_137, %c0_138, %c0_139, %c0_140] : memref<2x5x2x5x32xbf16, #tpu.memory_space<vmem>>, vector<1x4x1x4x32xbf16>
    %81 = vector.shape_cast %80 : vector<1x4x1x4x32xbf16> to vector<4x4x32xbf16>
    %c0_141 = arith.constant 0 : index
    %c1_142 = arith.constant 1 : index
    %c1_143 = arith.constant 1 : index
    %c0_144 = arith.constant 0 : index
    %c0_145 = arith.constant 0 : index
    %82 = vector.load %arg11[%c0_141, %c1_142, %c1_143, %c0_144, %c0_145] : memref<2x5x2x5x32xbf16, #tpu.memory_space<vmem>>, vector<1x4x1x4x32xbf16>
    %83 = vector.shape_cast %82 : vector<1x4x1x4x32xbf16> to vector<4x4x32xbf16>
    %c0_146 = arith.constant 0 : index
    %c1_147 = arith.constant 1 : index
    %c0_148 = arith.constant 0 : index
    %c1_149 = arith.constant 1 : index
    %c0_150 = arith.constant 0 : index
    %84 = vector.load %arg11[%c0_146, %c1_147, %c0_148, %c1_149, %c0_150] : memref<2x5x2x5x32xbf16, #tpu.memory_space<vmem>>, vector<1x4x1x4x32xbf16>
    %85 = vector.shape_cast %84 : vector<1x4x1x4x32xbf16> to vector<4x4x32xbf16>
    %86 = tpu.concatenate %69, %71, %73, %75, %77, %79, %81, %83, %85 in 2 : vector<4x4x32xbf16>, vector<4x4x32xbf16>, vector<4x4x32xbf16>, vector<4x4x32xbf16>, vector<4x4x32xbf16>, vector<4x4x32xbf16>, vector<4x4x32xbf16>, vector<4x4x32xbf16>, vector<4x4x32xbf16> -> vector<4x4x288xbf16>
    %87 = vector.shape_cast %86 : vector<4x4x288xbf16> to vector<16x288xbf16>
    %c0_151 = arith.constant 0 : index
    %c0_152 = arith.constant 0 : index
    %88 = vector.load %arg3[%c0_151, %c0_152] : memref<288x48xbf16, #tpu.memory_space<vmem>>, vector<288x48xbf16>
    %cst_153 = arith.constant dense<0.000000e+00> : vector<16x48xf32>
    %89 = tpu.matmul %87, %88, %cst_153 {dimension_numbers = #tpu.dot_dimension_numbers<[1], [0], [0], [1], [0, 0, 1, 1], [], []>} : vector<16x288xbf16>, vector<288x48xbf16>, vector<16x48xf32> -> vector<16x48xf32>
    %c0_154 = arith.constant 0 : index
    %c0_155 = arith.constant 0 : index
    %90 = vector.load %arg7[%c0_154, %c0_155] : memref<1x48xf32, #tpu.memory_space<vmem>>, vector<1x48xf32>
    %91 = vector.broadcast %90 : vector<1x48xf32> to vector<16x48xf32>
    %92 = arith.mulf %89, %91 : vector<16x48xf32>
    %c0_156 = arith.constant 0 : index
    %c0_157 = arith.constant 0 : index
    %93 = vector.load %arg8[%c0_156, %c0_157] : memref<1x48xf32, #tpu.memory_space<vmem>>, vector<1x48xf32>
    %94 = vector.broadcast %93 : vector<1x48xf32> to vector<16x48xf32>
    %95 = arith.addf %92, %94 : vector<16x48xf32>
    %cst_158 = arith.constant 0.000000e+00 : f32
    %96 = vector.broadcast %cst_158 : f32 to vector<16x48xf32>
    %97 = arith.maximumf %95, %96 : vector<16x48xf32>
    %98 = arith.truncf %97 : vector<16x48xf32> to vector<16x48xbf16>
    %99 = vector.shape_cast %98 : vector<16x48xbf16> to vector<4x4x48xbf16>
    %c1_159 = arith.constant 1 : index
    %c1_160 = arith.constant 1 : index
    %c0_161 = arith.constant 0 : index
    %100 = vector.load %arg12[%c1_159, %c1_160, %c0_161] : memref<6x6x48xbf16, #tpu.memory_space<vmem>>, vector<4x4x48xbf16>
    tpu.vector_store %arg12[%c1_159, %c1_160, %c0_161], %99 {strides = array<i32>} : memref<6x6x48xbf16, #tpu.memory_space<vmem>>, vector<4x4x48xbf16>,
    %c0_162 = arith.constant 0 : index
    %c0_163 = arith.constant 0 : index
    %c0_164 = arith.constant 0 : index
    %101 = vector.load %arg12[%c0_162, %c0_163, %c0_164] : memref<6x6x48xbf16, #tpu.memory_space<vmem>>, vector<4x4x48xbf16>
    %c0_165 = arith.constant 0 : index
    %c1_166 = arith.constant 1 : index
    %c0_167 = arith.constant 0 : index
    %102 = vector.load %arg12[%c0_165, %c1_166, %c0_167] : memref<6x6x48xbf16, #tpu.memory_space<vmem>>, vector<4x4x48xbf16>
    %c0_168 = arith.constant 0 : index
    %c2 = arith.constant 2 : index
    %c0_169 = arith.constant 0 : index
    %103 = vector.load %arg12[%c0_168, %c2, %c0_169] : memref<6x6x48xbf16, #tpu.memory_space<vmem>>, vector<4x4x48xbf16>
    %c1_170 = arith.constant 1 : index
    %c0_171 = arith.constant 0 : index
    %c0_172 = arith.constant 0 : index
    %104 = vector.load %arg12[%c1_170, %c0_171, %c0_172] : memref<6x6x48xbf16, #tpu.memory_space<vmem>>, vector<4x4x48xbf16>
    %c1_173 = arith.constant 1 : index
    %c1_174 = arith.constant 1 : index
    %c0_175 = arith.constant 0 : index
    %105 = vector.load %arg12[%c1_173, %c1_174, %c0_175] : memref<6x6x48xbf16, #tpu.memory_space<vmem>>, vector<4x4x48xbf16>
    %c1_176 = arith.constant 1 : index
    %c2_177 = arith.constant 2 : index
    %c0_178 = arith.constant 0 : index
    %106 = vector.load %arg12[%c1_176, %c2_177, %c0_178] : memref<6x6x48xbf16, #tpu.memory_space<vmem>>, vector<4x4x48xbf16>
    %c2_179 = arith.constant 2 : index
    %c0_180 = arith.constant 0 : index
    %c0_181 = arith.constant 0 : index
    %107 = vector.load %arg12[%c2_179, %c0_180, %c0_181] : memref<6x6x48xbf16, #tpu.memory_space<vmem>>, vector<4x4x48xbf16>
    %c2_182 = arith.constant 2 : index
    %c1_183 = arith.constant 1 : index
    %c0_184 = arith.constant 0 : index
    %108 = vector.load %arg12[%c2_182, %c1_183, %c0_184] : memref<6x6x48xbf16, #tpu.memory_space<vmem>>, vector<4x4x48xbf16>
    %c2_185 = arith.constant 2 : index
    %c2_186 = arith.constant 2 : index
    %c0_187 = arith.constant 0 : index
    %109 = vector.load %arg12[%c2_185, %c2_186, %c0_187] : memref<6x6x48xbf16, #tpu.memory_space<vmem>>, vector<4x4x48xbf16>
    %110 = tpu.concatenate %101, %102, %103, %104, %105, %106, %107, %108, %109 in 2 : vector<4x4x48xbf16>, vector<4x4x48xbf16>, vector<4x4x48xbf16>, vector<4x4x48xbf16>, vector<4x4x48xbf16>, vector<4x4x48xbf16>, vector<4x4x48xbf16>, vector<4x4x48xbf16>, vector<4x4x48xbf16> -> vector<4x4x432xbf16>
    %111 = vector.shape_cast %110 : vector<4x4x432xbf16> to vector<16x432xbf16>
    %c0_188 = arith.constant 0 : index
    %c0_189 = arith.constant 0 : index
    %112 = vector.load %arg4[%c0_188, %c0_189] : memref<432x48xbf16, #tpu.memory_space<vmem>>, vector<432x48xbf16>
    %cst_190 = arith.constant dense<0.000000e+00> : vector<16x48xf32>
    %113 = tpu.matmul %111, %112, %cst_190 {dimension_numbers = #tpu.dot_dimension_numbers<[1], [0], [0], [1], [0, 0, 1, 1], [], []>} : vector<16x432xbf16>, vector<432x48xbf16>, vector<16x48xf32> -> vector<16x48xf32>
    %c0_191 = arith.constant 0 : index
    %c0_192 = arith.constant 0 : index
    %114 = vector.load %arg9[%c0_191, %c0_192] : memref<1x48xf32, #tpu.memory_space<vmem>>, vector<1x48xf32>
    %115 = vector.broadcast %114 : vector<1x48xf32> to vector<16x48xf32>
    %116 = arith.addf %113, %115 : vector<16x48xf32>
    %117 = vector.shape_cast %116 : vector<16x48xf32> to vector<4x4x48xf32>
    %c0_193 = arith.constant 0 : index
    %c0_194 = arith.constant 0 : index
    %c0_195 = arith.constant 0 : index
    %c0_196 = arith.constant 0 : index
    %118 = vector.load %arg10[%c0_193, %c0_194, %c0_195, %c0_196] : memref<1x4x4x48xf32, #tpu.memory_space<vmem>>, vector<1x4x4x48xf32>
    %119 = vector.shape_cast %118 : vector<1x4x4x48xf32> to vector<4x4x48xf32>
    %120 = vector.shape_cast %117 : vector<4x4x48xf32> to vector<1x4x4x48xf32>
    tpu.vector_store %arg10[%c0_193, %c0_194, %c0_195, %c0_196], %120 {strides = array<i32>} : memref<1x4x4x48xf32, #tpu.memory_space<vmem>>, vector<1x4x4x48xf32>,
    return
  }
  func.func @transform_0(%arg0: i32) -> (i32, i32, i32, i32, i32, i32) {
    %c0_i32 = arith.constant 0 : i32
    %c0_i32_0 = arith.constant 0 : i32
    %c0_i32_1 = arith.constant 0 : i32
    %c0_i32_2 = arith.constant 0 : i32
    %c0_i32_3 = arith.constant 0 : i32
    %c0_i32_4 = arith.constant 0 : i32
    return %arg0, %c0_i32, %c0_i32_0, %c0_i32_1, %c0_i32_2, %c0_i32_3 : i32, i32, i32, i32, i32, i32
  }
  func.func @transform_1(%arg0: i32) -> (i32, i32) {
    %c0_i32 = arith.constant 0 : i32
    %c0_i32_0 = arith.constant 0 : i32
    %c0_i32_1 = arith.constant 0 : i32
    return %c0_i32, %c0_i32_0 : i32, i32
  }
  func.func @transform_2(%arg0: i32) -> (i32, i32) {
    %c0_i32 = arith.constant 0 : i32
    %c0_i32_0 = arith.constant 0 : i32
    %c0_i32_1 = arith.constant 0 : i32
    return %c0_i32, %c0_i32_0 : i32, i32
  }
  func.func @transform_3(%arg0: i32) -> (i32, i32) {
    %c0_i32 = arith.constant 0 : i32
    %c0_i32_0 = arith.constant 0 : i32
    %c0_i32_1 = arith.constant 0 : i32
    return %c0_i32, %c0_i32_0 : i32, i32
  }
  func.func @transform_4(%arg0: i32) -> (i32, i32) {
    %c0_i32 = arith.constant 0 : i32
    %c0_i32_0 = arith.constant 0 : i32
    %c0_i32_1 = arith.constant 0 : i32
    return %c0_i32, %c0_i32_0 : i32, i32
  }
  func.func @transform_5(%arg0: i32) -> (i32, i32) {
    %c0_i32 = arith.constant 0 : i32
    %c0_i32_0 = arith.constant 0 : i32
    %c0_i32_1 = arith.constant 0 : i32
    return %c0_i32, %c0_i32_0 : i32, i32
  }
  func.func @transform_6(%arg0: i32) -> (i32, i32) {
    %c0_i32 = arith.constant 0 : i32
    %c0_i32_0 = arith.constant 0 : i32
    %c0_i32_1 = arith.constant 0 : i32
    return %c0_i32, %c0_i32_0 : i32, i32
  }
  func.func @transform_7(%arg0: i32) -> (i32, i32) {
    %c0_i32 = arith.constant 0 : i32
    %c0_i32_0 = arith.constant 0 : i32
    %c0_i32_1 = arith.constant 0 : i32
    return %c0_i32, %c0_i32_0 : i32, i32
  }
  func.func @transform_8(%arg0: i32) -> (i32, i32) {
    %c0_i32 = arith.constant 0 : i32
    %c0_i32_0 = arith.constant 0 : i32
    %c0_i32_1 = arith.constant 0 : i32
    return %c0_i32, %c0_i32_0 : i32, i32
  }
  func.func @transform_9(%arg0: i32) -> (i32, i32, i32, i32) {
    %c0_i32 = arith.constant 0 : i32
    %c0_i32_0 = arith.constant 0 : i32
    %c0_i32_1 = arith.constant 0 : i32
    %c0_i32_2 = arith.constant 0 : i32
    return %arg0, %c0_i32, %c0_i32_0, %c0_i32_1 : i32, i32, i32, i32
  }
}

module attributes {stable_mosaic.version = 11 : i64} {
  func.func @_mm_affine_kernel(%arg0: i32, %arg1: memref<128x27xf32, #tpu.memory_space<vmem>>, %arg2: memref<27x128xf32, #tpu.memory_space<vmem>>, %arg3: memref<1x128xf32, #tpu.memory_space<vmem>>, %arg4: memref<128x128xf32, #tpu.memory_space<vmem>>) attributes {dimension_semantics = [#tpu.dimension_semantics<parallel>], iteration_bounds = array<i64: 1>, scalar_prefetch = 0 : i64, scratch_operands = 0 : i64, tpu.core_type = #tpu.core_type<tc>, window_params = [{transform_indices = @transform_0, window_bounds = array<i64: 128, 27>}, {pipeline_mode = #tpu.pipeline_mode<synchronous>, transform_indices = @transform_1, window_bounds = array<i64: 27, 128>}, {pipeline_mode = #tpu.pipeline_mode<synchronous>, transform_indices = @transform_2, window_bounds = array<i64: 1, 128>}, {transform_indices = @transform_3, window_bounds = array<i64: 128, 128>}]} {
    %c0 = arith.constant 0 : index
    %c0_0 = arith.constant 0 : index
    %0 = vector.load %arg1[%c0, %c0_0] : memref<128x27xf32, #tpu.memory_space<vmem>>, vector<128x27xf32>
    %c0_1 = arith.constant 0 : index
    %c0_2 = arith.constant 0 : index
    %1 = vector.load %arg2[%c0_1, %c0_2] : memref<27x128xf32, #tpu.memory_space<vmem>>, vector<27x128xf32>
    %cst = arith.constant dense<0.000000e+00> : vector<128x128xf32>
    %2 = tpu.matmul %0, %1, %cst {dimension_numbers = #tpu.dot_dimension_numbers<[1], [0], [0], [1], [0, 0, 1, 1], [], []>} : vector<128x27xf32>, vector<27x128xf32>, vector<128x128xf32> -> vector<128x128xf32>
    %c0_3 = arith.constant 0 : index
    %c0_4 = arith.constant 0 : index
    %3 = vector.load %arg3[%c0_3, %c0_4] : memref<1x128xf32, #tpu.memory_space<vmem>>, vector<1x128xf32>
    %4 = vector.broadcast %3 : vector<1x128xf32> to vector<128x128xf32>
    %5 = arith.addf %2, %4 : vector<128x128xf32>
    %cst_5 = arith.constant 0.000000e+00 : f32
    %6 = vector.broadcast %cst_5 : f32 to vector<128x128xf32>
    %7 = arith.maximumf %5, %6 : vector<128x128xf32>
    %c0_6 = arith.constant 0 : index
    %c0_7 = arith.constant 0 : index
    %8 = vector.load %arg4[%c0_6, %c0_7] : memref<128x128xf32, #tpu.memory_space<vmem>>, vector<128x128xf32>
    tpu.vector_store %arg4[%c0_6, %c0_7], %7 {strides = array<i32>} : memref<128x128xf32, #tpu.memory_space<vmem>>, vector<128x128xf32>,
    return
  }
  func.func @transform_0(%arg0: i32) -> (i32, i32) {
    %c0_i32 = arith.constant 0 : i32
    %c0_i32_0 = arith.constant 0 : i32
    return %arg0, %c0_i32 : i32, i32
  }
  func.func @transform_1(%arg0: i32) -> (i32, i32) {
    %c0_i32 = arith.constant 0 : i32
    %c0_i32_0 = arith.constant 0 : i32
    %c0_i32_1 = arith.constant 0 : i32
    return %c0_i32, %c0_i32_0 : i32, i32
  }
  func.func @transform_2(%arg0: i32) -> (i32, i32) {
    %c0_i32 = arith.constant 0 : i32
    %c0_i32_0 = arith.constant 0 : i32
    %c0_i32_1 = arith.constant 0 : i32
    return %c0_i32, %c0_i32_0 : i32, i32
  }
  func.func @transform_3(%arg0: i32) -> (i32, i32) {
    %c0_i32 = arith.constant 0 : i32
    %c0_i32_0 = arith.constant 0 : i32
    return %arg0, %c0_i32 : i32, i32
  }
}

module attributes {stable_mosaic.version = 11 : i64} {
  func.func @_mm_affine_kernel(%arg0: i32, %arg1: memref<32x288xf32, #tpu.memory_space<vmem>>, %arg2: memref<288x128xf32, #tpu.memory_space<vmem>>, %arg3: memref<1x128xf32, #tpu.memory_space<vmem>>, %arg4: memref<32x128xf32, #tpu.memory_space<vmem>>) attributes {dimension_semantics = [#tpu.dimension_semantics<parallel>], iteration_bounds = array<i64: 1>, scalar_prefetch = 0 : i64, scratch_operands = 0 : i64, tpu.core_type = #tpu.core_type<tc>, window_params = [{transform_indices = @transform_0, window_bounds = array<i64: 32, 288>}, {pipeline_mode = #tpu.pipeline_mode<synchronous>, transform_indices = @transform_1, window_bounds = array<i64: 288, 128>}, {pipeline_mode = #tpu.pipeline_mode<synchronous>, transform_indices = @transform_2, window_bounds = array<i64: 1, 128>}, {transform_indices = @transform_3, window_bounds = array<i64: 32, 128>}]} {
    %c0 = arith.constant 0 : index
    %c0_0 = arith.constant 0 : index
    %0 = vector.load %arg1[%c0, %c0_0] : memref<32x288xf32, #tpu.memory_space<vmem>>, vector<32x288xf32>
    %c0_1 = arith.constant 0 : index
    %c0_2 = arith.constant 0 : index
    %1 = vector.load %arg2[%c0_1, %c0_2] : memref<288x128xf32, #tpu.memory_space<vmem>>, vector<288x128xf32>
    %cst = arith.constant dense<0.000000e+00> : vector<32x128xf32>
    %2 = tpu.matmul %0, %1, %cst {dimension_numbers = #tpu.dot_dimension_numbers<[1], [0], [0], [1], [0, 0, 1, 1], [], []>} : vector<32x288xf32>, vector<288x128xf32>, vector<32x128xf32> -> vector<32x128xf32>
    %c0_3 = arith.constant 0 : index
    %c0_4 = arith.constant 0 : index
    %3 = vector.load %arg3[%c0_3, %c0_4] : memref<1x128xf32, #tpu.memory_space<vmem>>, vector<1x128xf32>
    %4 = vector.broadcast %3 : vector<1x128xf32> to vector<32x128xf32>
    %5 = arith.addf %2, %4 : vector<32x128xf32>
    %cst_5 = arith.constant 0.000000e+00 : f32
    %6 = vector.broadcast %cst_5 : f32 to vector<32x128xf32>
    %7 = arith.maximumf %5, %6 : vector<32x128xf32>
    %c0_6 = arith.constant 0 : index
    %c0_7 = arith.constant 0 : index
    %8 = vector.load %arg4[%c0_6, %c0_7] : memref<32x128xf32, #tpu.memory_space<vmem>>, vector<32x128xf32>
    tpu.vector_store %arg4[%c0_6, %c0_7], %7 {strides = array<i32>} : memref<32x128xf32, #tpu.memory_space<vmem>>, vector<32x128xf32>,
    return
  }
  func.func @transform_0(%arg0: i32) -> (i32, i32) {
    %c0_i32 = arith.constant 0 : i32
    %c0_i32_0 = arith.constant 0 : i32
    return %arg0, %c0_i32 : i32, i32
  }
  func.func @transform_1(%arg0: i32) -> (i32, i32) {
    %c0_i32 = arith.constant 0 : i32
    %c0_i32_0 = arith.constant 0 : i32
    %c0_i32_1 = arith.constant 0 : i32
    return %c0_i32, %c0_i32_0 : i32, i32
  }
  func.func @transform_2(%arg0: i32) -> (i32, i32) {
    %c0_i32 = arith.constant 0 : i32
    %c0_i32_0 = arith.constant 0 : i32
    %c0_i32_1 = arith.constant 0 : i32
    return %c0_i32, %c0_i32_0 : i32, i32
  }
  func.func @transform_3(%arg0: i32) -> (i32, i32) {
    %c0_i32 = arith.constant 0 : i32
    %c0_i32_0 = arith.constant 0 : i32
    return %arg0, %c0_i32 : i32, i32
  }
}

module attributes {stable_mosaic.version = 11 : i64} {
  func.func @_mm_affine_kernel(%arg0: i32, %arg1: memref<32x432xf32, #tpu.memory_space<vmem>>, %arg2: memref<432x128xf32, #tpu.memory_space<vmem>>, %arg3: memref<1x128xf32, #tpu.memory_space<vmem>>, %arg4: memref<32x128xf32, #tpu.memory_space<vmem>>) attributes {dimension_semantics = [#tpu.dimension_semantics<parallel>], iteration_bounds = array<i64: 1>, scalar_prefetch = 0 : i64, scratch_operands = 0 : i64, tpu.core_type = #tpu.core_type<tc>, window_params = [{transform_indices = @transform_0, window_bounds = array<i64: 32, 432>}, {pipeline_mode = #tpu.pipeline_mode<synchronous>, transform_indices = @transform_1, window_bounds = array<i64: 432, 128>}, {pipeline_mode = #tpu.pipeline_mode<synchronous>, transform_indices = @transform_2, window_bounds = array<i64: 1, 128>}, {transform_indices = @transform_3, window_bounds = array<i64: 32, 128>}]} {
    %c0 = arith.constant 0 : index
    %c0_0 = arith.constant 0 : index
    %0 = vector.load %arg1[%c0, %c0_0] : memref<32x432xf32, #tpu.memory_space<vmem>>, vector<32x432xf32>
    %c0_1 = arith.constant 0 : index
    %c0_2 = arith.constant 0 : index
    %1 = vector.load %arg2[%c0_1, %c0_2] : memref<432x128xf32, #tpu.memory_space<vmem>>, vector<432x128xf32>
    %cst = arith.constant dense<0.000000e+00> : vector<32x128xf32>
    %2 = tpu.matmul %0, %1, %cst {dimension_numbers = #tpu.dot_dimension_numbers<[1], [0], [0], [1], [0, 0, 1, 1], [], []>} : vector<32x432xf32>, vector<432x128xf32>, vector<32x128xf32> -> vector<32x128xf32>
    %c0_3 = arith.constant 0 : index
    %c0_4 = arith.constant 0 : index
    %3 = vector.load %arg3[%c0_3, %c0_4] : memref<1x128xf32, #tpu.memory_space<vmem>>, vector<1x128xf32>
    %4 = vector.broadcast %3 : vector<1x128xf32> to vector<32x128xf32>
    %5 = arith.addf %2, %4 : vector<32x128xf32>
    %c0_5 = arith.constant 0 : index
    %c0_6 = arith.constant 0 : index
    %6 = vector.load %arg4[%c0_5, %c0_6] : memref<32x128xf32, #tpu.memory_space<vmem>>, vector<32x128xf32>
    tpu.vector_store %arg4[%c0_5, %c0_6], %5 {strides = array<i32>} : memref<32x128xf32, #tpu.memory_space<vmem>>, vector<32x128xf32>,
    return
  }
  func.func @transform_0(%arg0: i32) -> (i32, i32) {
    %c0_i32 = arith.constant 0 : i32
    %c0_i32_0 = arith.constant 0 : i32
    return %arg0, %c0_i32 : i32, i32
  }
  func.func @transform_1(%arg0: i32) -> (i32, i32) {
    %c0_i32 = arith.constant 0 : i32
    %c0_i32_0 = arith.constant 0 : i32
    %c0_i32_1 = arith.constant 0 : i32
    return %c0_i32, %c0_i32_0 : i32, i32
  }
  func.func @transform_2(%arg0: i32) -> (i32, i32) {
    %c0_i32 = arith.constant 0 : i32
    %c0_i32_0 = arith.constant 0 : i32
    %c0_i32_1 = arith.constant 0 : i32
    return %c0_i32, %c0_i32_0 : i32, i32
  }
  func.func @transform_3(%arg0: i32) -> (i32, i32) {
    %c0_i32 = arith.constant 0 : i32
    %c0_i32_0 = arith.constant 0 : i32
    return %arg0, %c0_i32 : i32, i32
  }
}

</mosaic_0001>

<bundles_post_ra>
// kernel: patch_embedding_forward.1
= control target key start
LH: loop header
LB: loop body
LE: loop exit
PB: predicated region body
PF: predicated region fallthrough
CT: control target
= control target key end

     0   :  { %14 = vsyncpa [#allocation5], 0  ;;  %s5448_s0 = inlined_call_operand.vmem [shape: bf16[2,2,9,2,9,4], index: 0, kind: input, shape index: {}]   ;;  %s5449_s1 = inlined_call_operand.vmem [shape: bf16[36,32], index: 1, kind: input, shape index: {}]   ;;  %s5450_s2 = inlined_call_operand.vmem [shape: bf16[288,48], index: 2, kind: input, shape index: {}]   ;;  %s5451_s3 = inlined_call_operand.vmem [shape: bf16[432,48], index: 3, kind: input, shape index: {}]   ;;  %s5452_s4 = inlined_call_operand.vmem [shape: f32[1,32], index: 4, kind: input, shape index: {}]   ;;  %s5453_s5 = inlined_call_operand.vmem [shape: f32[1,32], index: 5, kind: input, shape index: {}]   ;;  %s5454_s6 = inlined_call_operand.vmem [shape: f32[1,48], index: 6, kind: input, shape index: {}]   ;;  %s5455_s7 = inlined_call_operand.vmem [shape: f32[1,48], index: 7, kind: input, shape index: {}]   ;;  %s5456_s8 = inlined_call_operand.vmem [shape: f32[1,48], index: 8, kind: input, shape index: {}]   ;;  %s5457_s9 = inlined_call_operand.hbm [shape: f32[2,4,4,48], index: 9, kind: output, shape index: {}]  }
   0x1   :  { %16 = vsyncpa [#allocation5 + $0x1], 0  ;;  %s4468_s30 = smov 0   ;;  %s4470_s10 = smov 0  }
   0x2   :  { %s4472_s11 = smov 0   ;;  %s4474_s12 = smov 0  }
   0x3 LB: > { %s4489_s13 = sadd.s32 4294967295, %s4396_s12   ;;  %s3760_s14 = sadd.s32 4294967294, %s4396_s12   ;;  %s4396_s12 = sphi %s4474_s12, %s5475_s12   ;;  %s4392_s11 = sphi %s4472_s11, %s5474_s11   ;;  %s4388_s10 = sphi %s4470_s10, %s5473_s10   ;;  %s4384_s30 = sphi %s4468_s30, %s5472_s30  }
   0x4   : > { %s4493_s15 = sadd.s32 1, %s4396_s12   ;;  %s223_s16 = sadd.s32 1, %s4392_s11 }
   0x5   : > { %s220_s17 = ssub.s32 %s4396_s12, %s4493_s15  ;;  %p233_p0 = scmp.ne.s32.totalorder %s4392_s11, %s4388_s10 }
   0x6   : > { %p221_p1 = scmp.eq.s32.totalorder %s220_s17, 0  ;;  %p234_p2 = scmp.eq.s32.totalorder %s4489_s13, 1 }
   0x7   : > { %p239_p3 = scmp.ne.s32.totalorder %s4388_s10, %s4384_s30  ;;  %p240_p4 = scmp.eq.s32.totalorder %s3760_s14, 1 }
   0x8   : > { %s4504_s18 = scalar_select %p221_p1, %s4392_s11, %s223_s16  }
   0x9   : > { %p4506_p5 = por %p234_p2, %p233_p0  ;;  %p4510_p6 = por %p240_p4, %p239_p3 }
   0xa   : > { %p3763_p7 = scmp.ge.s32.totalorder %s4396_s12, 1  ;;  %p290_p8 = scmp.lt.s32.totalorder %s4396_s12, 3 }
   0xc   : > { %p291_p9 = pnand %p3763_p7, %p290_p8 }
   0xd   : > { %p326_p10 = scmp.lt.s32.totalorder (!%p291_p9), %s4489_s13, 1  ;;  %s5458_s26 = smov (!%p291_p9), 4  }
   0xe   : > { %294 = sbr.rel (%p291_p9) target bundleno = 1277 (0x4fd), region = 56  ;;  %s4399_s27 = smov (!%p291_p9), 12  }
   0xf   : > { %s4400_s28 = smov (!%p291_p9), 8   ;;  %s4401_s29 = smov (!%p291_p9), 16  }
  0x10   : > { %s4402_s14 = smov (!%p291_p9), 20   ;;  %s4403_s16 = smov (!%p291_p9), 24  }
  0x11   : > { %s4404_s24 = smov (!%p291_p9), 28   ;;  %s4417_s17 = smov (!%p291_p9), [#allocation4]  }
  0x13   : > { %s327_s21 = scalar_select %p326_p10, %s4489_s13, 1  ;;  %vm1197_vm0 = vcmask 1041408   ;;  %vm1000_vm1 = vcmask 31744   ;;  %vm1025_vm2 = vcmask 64512   ;;  %vm1042_vm3 = vcmask 97280  }
  0x14   : > { %vm1059_vm4 = vcmask 130048   ;;  %vm1076_vm5 = vcmask 162816   ;;  %vm1093_vm6 = vcmask 195584   ;;  %vm1110_vm7 = vcmask 228352  }
  0x15   : > { %s4105_s22 = smul.u32 288, %s327_s21  ;;  %vm1127_vm8 = vcmask 261120   ;;  %vm1184_vm9 = vcmask 293888   ;;  %vm341_vm10 = vcmask 253952   ;;  %vm342_vm11 = vsmask.f32 256 }
  0x16   : > { %vm4804_vm12 = vmand %vm341_vm10, %vm342_vm11  ;;  %vm332_vm13 = vcmask 256000   ;;  %vm333_vm14 = vsmask.f32 2304  ;;  %vm2400_vm10 = vcmask 523264   ;;  %s4340_s21 = sshll.u32 %s4417_s17, 4  ;;  %s4341_s21 = int_to_ptr.vmem [resolvable:$false] %s4340_s21 }
  0x17   : > { %s4521_s25 = scalar_lea.vmem %s5448_s0, %s4105_s22  ;;  %s4405_s22 = smov 32   ;;  %vm334_vm15 = vmand %vm332_vm13, %vm333_vm14  ;;  %vm378_vm14 = vcmask 385024  }
  0x18   : > { %v4164_v0 = vld [vmem:[%s4521_s25 + $0x28] ss:$0 sps:$4 sm:$0xff]   ;;  %v4166_v2 = vld [vmem:[%s4521_s25 + $0x38] ss:$0 sps:$4 sm:$0xff]   ;;  %v3775_v4 = vld [vmem:[%s4521_s25 + $0xa0] sm:$0xf] }
  0x19   : > { %v4165_v1 = vld [vmem:[%s4521_s25 + $0x8] ss:$0 sps:$4 sm:$0xff]   ;;  %524 = vrot.lane.b32.xlu1 %v4164_v0, %s5458_s26  ;;  %v4167_v3 = vld [vmem:[%s4521_s25 + $0x18] ss:$0 sps:$4 sm:$0xff]   ;;  %v3774_v5 = vld [vmem:[%s4521_s25 + $0x90] sm:$0xf]  ;;  %v3839_v13 = vcombine.low %v3775_v4, %v3775_v4 }
  0x1a   : > { %520 = vrot.lane.b32.xlu0 %v4165_v1, %s5458_s26  ;;  %v4532_v6 = vld [vmem:[%s4521_s25 + $0x10] sm:$0xf]  ;;  %v437_v7 = vld [vmem:[%s4521_s25 + $0x14] sm:$0x1]  ;;  %v4536_v8 = vld [vmem:[%s4521_s25] sm:$0xf]  ;;  %v3838_v18 = vcombine.low %v3774_v5, %v3774_v5 }
  0x1b   : > { %v3831_v9 = vcombine.low %v4532_v6, %v437_v7  ;;  %v436_v10 = vld [vmem:[%s4521_s25 + $0x4] sm:$0x1]  ;;  %v4541_v11 = vld [vmem:[%s4521_s25 + $0x30] sm:$0xf]  ;;  %v439_v12 = vld [vmem:[%s4521_s25 + $0x34] sm:$0x1] }
  0x1c   : > { %v3830_v14 = vcombine.low %v4536_v8, %v436_v10  ;;  %v3833_v15 = vcombine.low %v4541_v11, %v439_v12  ;;  %v4548_v16 = vld [vmem:[%s4521_s25 + $0x20] sm:$0xf]  ;;  %v438_v17 = vld [vmem:[%s4521_s25 + $0x24] sm:$0x1]  ;;  %v3790_v38 = vld [vmem:[%s4521_s25 + $0x94] sm:$0x1] }
  0x1d   : > { %526 = vrot.lane.b32.xlu1 %v4166_v2, %s5458_s26  ;;  %v584_v19 = vshrl.u32 %v3831_v9, 16  ;;  %v586_v20 = vshll.u32 %v3831_v9, 16  ;;  %v3832_v21 = vcombine.low %v4548_v16, %v438_v17  ;;  %v3791_v35 = vld [vmem:[%s4521_s25 + $0xa4] sm:$0x1]  ;;  %v3777_v37 = vld [vmem:[%s4521_s25 + $0xc0] sm:$0xf]  ;;  %v3854_v42 = vcombine.low %v3774_v5, %v3790_v38 }
  0x1e   : > { %522 = vrot.lane.b32.xlu0 %v4167_v3, %s5458_s26  ;;  %v577_v22 = vshrl.u32 %v3830_v14, 16  ;;  %v579_v23 = vshll.u32 %v3830_v14, 16  ;;  %v600_v24 = vshll.u32 %v3833_v15, 16  ;;  %v598_v28 = vshrl.u32 %v3833_v15, 16  ;;  %v3776_v39 = vld [vmem:[%s4521_s25 + $0xb0] sm:$0xf] }
  0x1f   : > { %v588_v25 = vrot.slane %v586_v20, 1  ;;  %v593_v26 = vshll.u32 %v3832_v21, 16  ;;  %v591_v31 = vshrl.u32 %v3832_v21, 16  ;;  %v3855_v40 = vcombine.low %v3775_v4, %v3791_v35  ;;  %v3793_v43 = vld [vmem:[%s4521_s25 + $0xc4] sm:$0x1] }
  0x20   : > { %v581_v27 = vrot.slane %v579_v23, 1  ;;  %v602_v29 = vrot.slane %v600_v24, 1  ;;  %v3841_v41 = vcombine.low %v3777_v37, %v3777_v37  ;;  %v3840_v44 = vcombine.low %v3776_v39, %v3776_v39  ;;  %v3792_v45 = vld [vmem:[%s4521_s25 + $0xb4] sm:$0x1]  ;;  %v4180_v47 = vld [vmem:[%s4521_s25 + $0xa8] ss:$0 sps:$4 sm:$0xff]  }
  0x21   : > { %674 = vrot.lane.b32.xlu1 %v3839_v13, %s4399_s27  ;;  %v589_v30 = vor.u32 %v588_v25, %v584_v19  ;;  %v595_v32 = vrot.slane %v593_v26, 1  ;;  %v3857_v46 = vcombine.low %v3777_v37, %v3793_v43  ;;  %v762_v48 = vshll.u32 %v3855_v40, 16  ;;  %v4181_v50 = vld [vmem:[%s4521_s25 + $0x98] ss:$0 sps:$4 sm:$0xff]   ;;  %v4182_v52 = vld [vmem:[%s4521_s25 + $0xc8] ss:$0 sps:$4 sm:$0xff]  }
  0x22   : > { %672 = vrot.lane.b32.xlu0 %v3838_v18, %s4399_s27  ;;  %v582_v33 = vor.u32 %v581_v27, %v577_v22  ;;  %v603_v34 = vor.u32 %v602_v29, %v598_v28  ;;  %v3856_v49 = vcombine.low %v3776_v39, %v3792_v45  ;;  %v755_v51 = vshll.u32 %v3854_v42, 16  ;;  %v4183_v56 = vld [vmem:[%s4521_s25 + $0xb8] ss:$0 sps:$4 sm:$0xff]   ;;  %v3799_v2 = vld [vmem:[%s4521_s25 + $0x20] sm:$0xf] }
  0x23   : > { %v596_v36 = vor.u32 %v595_v32, %v591_v31  ;;  %v760_v53 = vshrl.u32 %v3855_v40, 16  ;;  %v764_v54 = vrot.slane %v762_v48, 1  ;;  %v776_v55 = vshll.u32 %v3857_v46, 16  ;;  %v3815_v3 = vld [vmem:[%s4521_s25 + $0x24] sm:$0x1] }
  0x24   : > { %v753_v57 = vshrl.u32 %v3854_v42, 16  ;;  %v757_v58 = vrot.slane %v755_v51, 1  ;;  %v769_v59 = vshll.u32 %v3856_v49, 16  ;;  %v774_v61 = vshrl.u32 %v3857_v46, 16  ;;  %v3798_v4 = vld [vmem:[%s4521_s25 + $0x10] sm:$0xf] }
  0x25   : > { %634 = vrot.lane.b32.xlu1 %v589_v30, %s4400_s28  ;;  %v765_v60 = vor.u32 %v764_v54, %v760_v53  ;;  %v778_v62 = vrot.slane %v776_v55, 1  ;;  %v767_v0 = vshrl.u32 %v3856_v49, 16  ;;  %v3814_v5 = vld [vmem:[%s4521_s25 + $0x14] sm:$0x1]  ;;  %v3801_v9 = vld [vmem:[%s4521_s25 + $0x40] sm:$0xf]  ;;  %v4584_v14 = vcombine.low %v3799_v2, %v3815_v3 }
  0x26   : > { %632 = vrot.lane.b32.xlu0 %v582_v33, %s4400_s28  ;;  %v758_v63 = vor.u32 %v757_v58, %v753_v57  ;;  %v771_v1 = vrot.slane %v769_v59, 1  ;;  %v3817_v10 = vld [vmem:[%s4521_s25 + $0x44] sm:$0x1]  ;;  %v3816_v12 = vld [vmem:[%s4521_s25 + $0x34] sm:$0x1]  ;;  %v4590_v18 = vcombine.low %v3798_v4, %v3814_v5  ;;  %v3863_v26 = vcombine.low %v3799_v2, %v3799_v2 }
  0x27   : > { %v779_v7 = vor.u32 %v778_v62, %v774_v61  ;;  %v4587_v15 = vld [vmem:[%s4521_s25 + $0x50] sm:$0xf]  ;;  %v441_v17 = vld [vmem:[%s4521_s25 + $0x54] sm:$0x1]  ;;  %v4594_v20 = vld [vmem:[%s4521_s25 + $0x40] sm:$0xf]  ;;  %v4597_v22 = vcombine.low %v3801_v9, %v3817_v10  ;;  %v3862_v28 = vcombine.low %v3798_v4, %v3798_v4  ;;  %v3865_v37 = vcombine.low %v3801_v9, %v3801_v9 }
  0x28   : > { %v772_v13 = vor.u32 %v771_v1, %v767_v0  ;;  %v3800_v19 = vld [vmem:[%s4521_s25 + $0x30] sm:$0xf]  ;;  %v440_v21 = vld [vmem:[%s4521_s25 + $0x44] sm:$0x1]  ;;  %v443_v25 = vld [vmem:[%s4521_s25 + $0x74] sm:$0x1]  ;;  %v4607_v27 = vcombine.low %v4587_v15, %v441_v17 }
  0x29   : > { %638 = vrot.lane.b32.xlu1 %v603_v34, %s4400_s28  ;;  %v4599_v23 = vcombine.low %v3800_v19, %v3816_v12  ;;  %v4602_v24 = vld [vmem:[%s4521_s25 + $0x70] sm:$0xf]  ;;  %v938_v29 = vshll.u32 %v4584_v14, 16  ;;  %v4612_v30 = vcombine.low %v4594_v20, %v440_v21  ;;  %v4615_v31 = vld [vmem:[%s4521_s25 + $0x60] sm:$0xf]  ;;  %v931_v33 = vshll.u32 %v4590_v18, 16 }
  0x2a   : > { %636 = vrot.lane.b32.xlu0 %v596_v36, %s4400_s28  ;;  %v442_v32 = vld [vmem:[%s4521_s25 + $0x64] sm:$0x1]  ;;  %v4620_v34 = vcombine.low %v4602_v24, %v443_v25  ;;  %v952_v35 = vshll.u32 %v4597_v22, 16  ;;  %v3864_v38 = vcombine.low %v3800_v19, %v3800_v19  ;;  %v614_v39 = vshll.u32 %v4607_v27, 16  ;;  %v4192_v45 = vld [vmem:[%s4521_s25 + $0x28] ss:$0 sps:$4 sm:$0xff]  }
  0x2b   : > { %v945_v36 = vshll.u32 %v4599_v23, 16  ;;  %v4627_v40 = vcombine.low %v4615_v31, %v442_v32  ;;  %v940_v42 = vrot.slane %v938_v29, 1  ;;  %v929_v43 = vshrl.u32 %v4590_v18, 16  ;;  %v4228_v58 = vld [vmem:[%s5449_s1 + $0x10] ss:$0 sps:$4 sm:$0x33]  }
  0x2c   : > { %v933_v46 = vrot.slane %v931_v33, 1  ;;  %v943_v48 = vshrl.u32 %v4599_v23, 16  ;;  %v628_v49 = vshll.u32 %v4620_v34, 16  ;;  %v954_v51 = vrot.slane %v952_v35, 1  ;;  %v4229_v61 = vld [vmem:[%s5449_s1 + $0x8] sm:$0xff]   ;;  %4104 = vmatprep.subr.msk.bf16.mxu0 %vm1197_vm0, %v4228_v58  ;;  %v4230_v3 = vld [vmem:[%s5449_s1] sm:$0xff]  }
  0x2d   : > { %678 = vrot.lane.b32.xlu1 %v3841_v41, %s4399_s27  ;;  %v936_v41 = vshrl.u32 %v4584_v14, 16  ;;  %v612_v53 = vshrl.u32 %v4607_v27, 16  ;;  %v605_v54 = vshrl.u32 %v4612_v30, 16  ;;  %v616_v55 = vrot.slane %v614_v39, 1  ;;  %v4194_v62 = vld [vmem:[%s4521_s25 + $0x48] ss:$0 sps:$4 sm:$0xff]  }
  0x2e   : > { %676 = vrot.lane.b32.xlu0 %v3840_v44, %s4399_s27  ;;  %v607_v44 = vshll.u32 %v4612_v30, 16  ;;  %v621_v57 = vshll.u32 %v4627_v40, 16  ;;  %v1199_v0 = vsel %vm1197_vm0, %v4228_v58, 0  ;;  %v4195_v1 = vld [vmem:[%s4521_s25 + $0x38] ss:$0 sps:$4 sm:$0xff]   ;;  %v934_v5 = vor.u32 %v933_v46, %v929_v43 }
  0x2f   : > { %4083 = vmatpush3.bf16.msra.mxu0 %v1199_v0  ;;  %v941_v4 = vor.u32 %v940_v42, %v936_v41  ;;  %v4197_v9 = vld [vmem:[%s4521_s25 + $0x48] ss:$0 sps:$4 sm:$0xff]   ;;  %v617_v17 = vor.u32 %v616_v55, %v612_v53  ;;  %v3778_v23 = vld [vmem:[%s4521_s25 + $0xd0] sm:$0xf]  ;;  %v3794_v29 = vld [vmem:[%s4521_s25 + $0xd4] sm:$0x1] }
  0x30   : > { %v609_v59 = vrot.slane %v607_v44, 1  ;;  %v623_v2 = vrot.slane %v621_v57, 1  ;;  %4084 = vmatprep.subr.bf16.mxu0 %v4229_v61  ;;  %v4199_v14 = vld [vmem:[%s4521_s25 + $0x68] ss:$0 sps:$4 sm:$0xff]   ;;  %v3842_v27 = vcombine.low %v3778_v23, %v3778_v23  ;;  %v3780_v30 = vld [vmem:[%s4521_s25 + $0xf0] sm:$0xf] }
  0x31   : > { %714 = vrot.lane.b32.xlu1 %v4180_v47, %s4401_s29  ;;  %v950_v47 = vshrl.u32 %v4597_v22, 16  ;;  %v3779_v22 = vld [vmem:[%s4521_s25 + $0xe0] sm:$0xf]  ;;  %v3797_v35 = vld [vmem:[%s4521_s25 + $0x104] sm:$0x1]  ;;  %vm4409_vm0 = vmmov 0  }
  0x32   : > { %712 = vrot.lane.b32.xlu0 %v4181_v50, %s4401_s29  ;;  %v4193_v50 = vld [vmem:[%s4521_s25 + $0x18] ss:$0 sps:$4 sm:$0xff]   ;;  %v610_v18 = vor.u32 %v609_v59, %v605_v54  ;;  %v3843_v25 = vcombine.low %v3779_v22, %v3779_v22  ;;  %v4212_v39 = vld [vmem:[%s4521_s25 + $0xe8] ss:$0 sps:$4 sm:$0xff]  }
  0x33   : > { %4085 = vmatpush3.bf16.msra.mxu0 %v4229_v61  ;;  %v955_v10 = vor.u32 %v954_v51, %v950_v47  ;;  %v4213_v42 = vld [vmem:[%s4521_s25 + $0xd8] ss:$0 sps:$4 sm:$0xff]   ;;  %v4214_v44 = vld [vmem:[%s4521_s25 + $0x108] ss:$0 sps:$4 sm:$0xff]   ;;  %v3802_v61 = vld [vmem:[%s4521_s25 + $0x50] sm:$0xf] }
  0x34   : > { %4086 = vmatprep.subr.bf16.mxu0 %v4230_v3  ;;  %v3866_v0 = vcombine.low %v3802_v61, %v3802_v61 }
  0x35   : > { %718 = vrot.lane.b32.xlu1 %v4182_v52, %s4401_s29  ;;  %v947_v52 = vrot.slane %v945_v36, 1  ;;  %v3844_v36 = vcombine.low %v3780_v30, %v3780_v30 }
  0x36   : > { %716 = vrot.lane.b32.xlu0 %v4183_v56, %s4401_s29  ;;  %v626_v56 = vshrl.u32 %v4620_v34, 16  ;;  %v3858_v34 = vcombine.low %v3778_v23, %v3794_v29 }
  0x37   : > { %4087 = vmatpush3.bf16.msra.mxu0 %v4230_v3  ;;  %v948_v12 = vor.u32 %v947_v52, %v943_v48  ;;  %v4215_v48 = vld [vmem:[%s4521_s25 + $0xf8] ss:$0 sps:$4 sm:$0xff]   ;;  %v3804_v3 = vld [vmem:[%s4521_s25 + $0x70] sm:$0xf] }
  0x38   : > { %v783_v43 = vshll.u32 %v3858_v34, 16 }
  0x39   : > { %810 = vrot.lane.b32.xlu1 %v765_v60, %s4402_s14  ;;  %v619_v60 = vshrl.u32 %v4627_v40, 16 }
  0x3a   : > { %808 = vrot.lane.b32.xlu0 %v758_v63, %s4402_s14  ;;  %v630_v63 = vrot.slane %v628_v49, 1  ;;  %v781_v49 = vshrl.u32 %v3858_v34, 16 }
  0x3b   : > { %v624_v21 = vor.u32 %v623_v2, %v619_v60  ;;  %v3803_v60 = vld [vmem:[%s4521_s25 + $0x60] sm:$0xf]  ;;  %v3818_v2 = vld [vmem:[%s4521_s25 + $0x54] sm:$0x1] }
  0x3c   : > { %v631_v19 = vor.u32 %v630_v63, %v626_v56  ;;  %v3819_v63 = vld [vmem:[%s4521_s25 + $0x64] sm:$0x1] }
  0x3d   : > { %814 = vrot.lane.b32.xlu1 %v779_v7, %s4402_s14  ;;  %v4196_v7 = vld [vmem:[%s4521_s25 + $0x58] ss:$0 sps:$4 sm:$0xff]  }
  0x3e   : > { %812 = vrot.lane.b32.xlu0 %v772_v13, %s4402_s14  ;;  %v4198_v13 = vld [vmem:[%s4521_s25 + $0x78] ss:$0 sps:$4 sm:$0xff]  }
  0x41   : > { %850 = vrot.lane.b32.xlu1 %v3863_v26, %s4403_s16  ;;  %v3795_v26 = vld [vmem:[%s4521_s25 + $0xe4] sm:$0x1] }
  0x42   : > { %848 = vrot.lane.b32.xlu0 %v3862_v28, %s4403_s16  ;;  %v3781_v28 = vld [vmem:[%s4521_s25 + $0x100] sm:$0xf]  ;;  %v3859_v32 = vcombine.low %v3779_v22, %v3795_v26  ;;  %v4226_v22 = vld [vmem:[%s4521_s25 + $0x88] ss:$0 sps:$4 sm:$0xff]  }
  0x43   : > { %v3845_v33 = vcombine.low %v3781_v28, %v3781_v28 }
  0x44   : > { %v790_v40 = vshll.u32 %v3859_v32, 16 }
  0x45   : > { %854 = vrot.lane.b32.xlu1 %v3865_v37, %s4403_s16  ;;  %v3796_v37 = vld [vmem:[%s4521_s25 + $0xf4] sm:$0x1] }
  0x46   : > { %852 = vrot.lane.b32.xlu0 %v3864_v38, %s4403_s16  ;;  %v3861_v38 = vcombine.low %v3781_v28, %v3797_v35  ;;  %v3860_v41 = vcombine.low %v3780_v30, %v3796_v37  ;;  %v792_v46 = vrot.slane %v790_v40, 1 }
  0x48   : > { %v804_v47 = vshll.u32 %v3861_v38, 16  ;;  %v797_v51 = vshll.u32 %v3860_v41, 16  ;;  %v802_v53 = vshrl.u32 %v3861_v38, 16  ;;  %v795_v56 = vshrl.u32 %v3860_v41, 16 }
  0x49   : > { %890 = vrot.lane.b32.xlu1 %v4192_v45, %s4404_s24  ;;  %v788_v45 = vshrl.u32 %v3859_v32, 16 }
  0x4a   : > { %888 = vrot.lane.b32.xlu0 %v4193_v50, %s4404_s24  ;;  %v785_v50 = vrot.slane %v783_v43, 1  ;;  %v806_v54 = vrot.slane %v804_v47, 1  ;;  %v799_v57 = vrot.slane %v797_v51, 1 }
  0x4b   : > { %v793_v52 = vor.u32 %v792_v46, %v788_v45 }
  0x4c   : > { %v786_v55 = vor.u32 %v785_v50, %v781_v49  ;;  %v807_v58 = vor.u32 %v806_v54, %v802_v53  ;;  %v800_v59 = vor.u32 %v799_v57, %v795_v56 }
  0x4d   : > { %894 = vrot.lane.b32.xlu1 %v4194_v62, %s4404_s24  ;;  %v3867_v62 = vcombine.low %v3803_v60, %v3803_v60 }
  0x4e   : > { %892 = vrot.lane.b32.xlu0 %v4195_v1, %s4404_s24  ;;  %v3805_v1 = vld [vmem:[%s4521_s25 + $0x80] sm:$0xf] }
  0x51   : > { %986 = vrot.lane.b32.xlu1 %v941_v4, %s4405_s22  ;;  %v3883_v4 = vcombine.low %v3803_v60, %v3819_v63 }
  0x52   : > { %984 = vrot.lane.b32.xlu0 %v934_v5, %s4405_s22  ;;  %v3869_v5 = vcombine.low %v3805_v1, %v3805_v1 }
  0x53   : > { %v964_v23 = vshrl.u32 %v3883_v4, 16 }
  0x55   : > { %530 = vrot.lane.b32.xlu1 %v4196_v7, %s5458_s26  ;;  %v3882_v7 = vcombine.low %v3802_v61, %v3818_v2 }
  0x56   : > { %528 = vrot.lane.b32.xlu0 %v4197_v9, %s5458_s26  ;;  %v3821_v9 = vld [vmem:[%s4521_s25 + $0x84] sm:$0x1] }
  0x57   : > { %v957_v28 = vshrl.u32 %v3882_v7, 16 }
  0x59   : > { %990 = vrot.lane.b32.xlu1 %v955_v10, %s4405_s22  ;;  %v3868_v10 = vcombine.low %v3804_v3, %v3804_v3 }
  0x5a   : > { %988 = vrot.lane.b32.xlu0 %v948_v12, %s4405_s22  ;;  %v3820_v12 = vld [vmem:[%s4521_s25 + $0x74] sm:$0x1] }
  0x5d   : > { %534 = vrot.lane.b32.xlu1 %v4198_v13, %s5458_s26  ;;  %v3885_v13 = vcombine.low %v3805_v1, %v3821_v9 }
  0x5e   : > { %532 = vrot.lane.b32.xlu0 %v4199_v14, %s5458_s26  ;;  %v4224_v14 = vld [vmem:[%s4521_s25 + $0x68] ss:$0 sps:$4 sm:$0xff]   ;;  %s4414_s26 = smov 48  }
  0x5f   : > { %v980_v26 = vshll.u32 %v3885_v13, 16  ;;  %v978_v35 = vshrl.u32 %v3885_v13, 16 }
  0x61   : > { %642 = vrot.lane.b32.xlu1 %v617_v17, %s4400_s28  ;;  %v966_v17 = vshll.u32 %v3883_v4, 16 }
  0x62   : > { %640 = vrot.lane.b32.xlu0 %v610_v18, %s4400_s28  ;;  %v3884_v18 = vcombine.low %v3804_v3, %v3820_v12 }
  0x64   : > { %v973_v30 = vshll.u32 %v3884_v18, 16  ;;  %v971_v38 = vshrl.u32 %v3884_v18, 16 }
  0x65   : > { %646 = vrot.lane.b32.xlu1 %v631_v19, %s4400_s28  ;;  %v4225_v19 = vld [vmem:[%s4521_s25 + $0x58] ss:$0 sps:$4 sm:$0xff]  }
  0x66   : > { %644 = vrot.lane.b32.xlu0 %v624_v21, %s4400_s28  ;;  %v959_v21 = vshll.u32 %v3882_v7, 16  ;;  %s4415_s28 = smov 112  }
  0x68   : > { %v961_v29 = vrot.slane %v959_v21, 1 }
  0x69   : > { %682 = vrot.lane.b32.xlu1 %v3843_v25, %s4399_s27  ;;  %v968_v25 = vrot.slane %v966_v17, 1 }
  0x6a   : > { %680 = vrot.lane.b32.xlu0 %v3842_v27, %s4399_s27  ;;  %v4227_v27 = vld [vmem:[%s4521_s25 + $0x78] ss:$0 sps:$4 sm:$0xff]   ;;  %v962_v37 = vor.u32 %v961_v29, %v957_v28  ;;  %s4406_s25 = smov 64  }
  0x6b   : > { %v969_v34 = vor.u32 %v968_v25, %v964_v23 }
  0x6d   : > { %686 = vrot.lane.b32.xlu1 %v3845_v33, %s4399_s27 }
  0x6e   : > { %684 = vrot.lane.b32.xlu0 %v3844_v36, %s4399_s27  ;;  %v982_v36 = vrot.slane %v980_v26, 1  ;;  %s4411_s27 = smov 96  }
  0x71   : > { %722 = vrot.lane.b32.xlu1 %v4212_v39, %s4401_s29  ;;  %v975_v39 = vrot.slane %v973_v30, 1 }
  0x72   : > { %720 = vrot.lane.b32.xlu0 %v4213_v42, %s4401_s29  ;;  %v983_v42 = vor.u32 %v982_v36, %v978_v35 }
  0x73   : > { %v976_v43 = vor.u32 %v975_v39, %v971_v38 }
  0x75   : > { %726 = vrot.lane.b32.xlu1 %v4214_v44, %s4401_s29 }
  0x76   : > { %724 = vrot.lane.b32.xlu0 %v4215_v48, %s4401_s29 }
  0x79   : > { %818 = vrot.lane.b32.xlu1 %v793_v52, %s4402_s14 }
  0x7a   : > { %816 = vrot.lane.b32.xlu0 %v786_v55, %s4402_s14 }
  0x7d   : > { %822 = vrot.lane.b32.xlu1 %v807_v58, %s4402_s14 }
  0x7e   : > { %820 = vrot.lane.b32.xlu0 %v800_v59, %s4402_s14 }
  0x81   : > { %858 = vrot.lane.b32.xlu1 %v3867_v62, %s4403_s16 }
  0x82   : > { %856 = vrot.lane.b32.xlu0 %v3866_v0, %s4403_s16 }
  0x85   : > { %862 = vrot.lane.b32.xlu1 %v3869_v5, %s4403_s16 }
  0x86   : > { %860 = vrot.lane.b32.xlu0 %v3868_v10, %s4403_s16  ;;  %s4027_s16 = sshll.u32 %s4489_s13, 8 }
  0x89   : > { %898 = vrot.lane.b32.xlu1 %v4224_v14, %s4404_s24 }
  0x8a   : > { %896 = vrot.lane.b32.xlu0 %v4225_v19, %s4404_s24 }
  0x8b   : > { %v4718_v32 = vpop.permute.xlu1 %524 }
  0x8c   : > { %v521_v33 = vpop.permute.xlu0 %520  ;;  %v1009_v28 = vsel %vm1000_vm1, %v4548_v16, %v4718_v32 }
  0x8d   : > { %902 = vrot.lane.b32.xlu1 %v4226_v22, %s4404_s24  ;;  %v1003_v2 = vsel %vm1000_vm1, %v4536_v8, %v521_v33 }
  0x8e   : > { %900 = vrot.lane.b32.xlu0 %v4227_v27, %s4404_s24 }
  0x8f   : > { %v527_v40 = vpop.permute.xlu1 %526 }
  0x90   : > { %v523_v41 = vpop.permute.xlu0 %522  ;;  %v1012_v26 = vsel %vm1000_vm1, %v4541_v11, %v527_v40 }
  0x91   : > { %994 = vrot.lane.b32.xlu1 %v969_v34, %s4405_s22  ;;  %v1006_v0 = vsel %vm1000_vm1, %v4532_v6, %v523_v41 }
  0x92   : > { %992 = vrot.lane.b32.xlu0 %v962_v37, %s4405_s22 }
  0x93   : > { %v675_v44 = vpop.permute.xlu1 %674 }
  0x94   : > { %v673_v45 = vpop.permute.xlu0 %672 }
  0x95   : > { %998 = vrot.lane.b32.xlu1 %v983_v42, %s4405_s22 }
  0x96   : > { %996 = vrot.lane.b32.xlu0 %v976_v43, %s4405_s22 }
  0x97   : > { %v635_v46 = vpop.permute.xlu1 %634 }
  0x98   : > { %v633_v47 = vpop.permute.xlu0 %632  ;;  %v1029_v3 = vsel %vm1025_vm2, %v1006_v0, %v635_v46 }
  0x99   : > { %v1027_v5 = vsel %vm1025_vm2, %v1003_v2, %v633_v47  ;;  %v1046_v7 = vsel %vm1042_vm3, %v1029_v3, %v675_v44 }
  0x9a   : > { %v1044_v6 = vsel %vm1042_vm3, %v1027_v5, %v673_v45 }
  0x9b   : > { %v639_v48 = vpop.permute.xlu1 %638 }
  0x9c   : > { %v637_v49 = vpop.permute.xlu0 %636  ;;  %v1033_v29 = vsel %vm1025_vm2, %v1012_v26, %v639_v48 }
  0x9d   : > { %v1031_v33 = vsel %vm1025_vm2, %v1009_v28, %v637_v49 }
  0x9f   : > { %v679_v50 = vpop.permute.xlu1 %678 }
  0xa0   : > { %v677_v51 = vpop.permute.xlu0 %676  ;;  %v1050_v34 = vsel %vm1042_vm3, %v1033_v29, %v679_v50 }
  0xa1   : > { %v1048_v36 = vsel %vm1042_vm3, %v1031_v33, %v677_v51 }
  0xa3   : > { %v715_v52 = vpop.permute.xlu1 %714 }
  0xa4   : > { %v713_v53 = vpop.permute.xlu0 %712  ;;  %v1063_v10 = vsel %vm1059_vm4, %v1046_v7, %v715_v52 }
  0xa5   : > { %v1061_v8 = vsel %vm1059_vm4, %v1044_v6, %v713_v53 }
  0xa7   : > { %v719_v54 = vpop.permute.xlu1 %718 }
  0xa8   : > { %v717_v55 = vpop.permute.xlu0 %716  ;;  %v1067_v37 = vsel %vm1059_vm4, %v1050_v34, %v719_v54 }
  0xa9   : > { %v1065_v38 = vsel %vm1059_vm4, %v1048_v36, %v717_v55 }
  0xab   : > { %v811_v56 = vpop.permute.xlu1 %810 }
  0xac   : > { %v809_v57 = vpop.permute.xlu0 %808  ;;  %v1080_v13 = vsel %vm1076_vm5, %v1063_v10, %v811_v56 }
  0xad   : > { %v1078_v14 = vsel %vm1076_vm5, %v1061_v8, %v809_v57 }
  0xaf   : > { %v815_v58 = vpop.permute.xlu1 %814 }
  0xb0   : > { %v813_v59 = vpop.permute.xlu0 %812  ;;  %v1084_v39 = vsel %vm1076_vm5, %v1067_v37, %v815_v58 }
  0xb1   : > { %v1082_v16 = vsel %vm1076_vm5, %v1065_v38, %v813_v59 }
  0xb3   : > { %v851_v60 = vpop.permute.xlu1 %850 }
  0xb4   : > { %v849_v61 = vpop.permute.xlu0 %848  ;;  %v1097_v17 = vsel %vm1093_vm6, %v1080_v13, %v851_v60 }
  0xb5   : > { %v1095_v18 = vsel %vm1093_vm6, %v1078_v14, %v849_v61 }
  0xb7   : > { %v855_v62 = vpop.permute.xlu1 %854 }
  0xb8   : > { %v853_v63 = vpop.permute.xlu0 %852  ;;  %v1101_v32 = vsel %vm1093_vm6, %v1084_v39, %v855_v62 }
  0xb9   : > { %v1099_v40 = vsel %vm1093_vm6, %v1082_v16, %v853_v63 }
  0xbb   : > { %v891_v1 = vpop.permute.xlu1 %890 }
  0xbc   : > { %v889_v4 = vpop.permute.xlu0 %888  ;;  %v1114_v19 = vsel %vm1110_vm7, %v1097_v17, %v891_v1 }
  0xbd   : > { %v1112_v22 = vsel %vm1110_vm7, %v1095_v18, %v889_v4 }
  0xbf   : > { %v895_v9 = vpop.permute.xlu1 %894 }
  0xc0   : > { %v893_v12 = vpop.permute.xlu0 %892  ;;  %v1118_v41 = vsel %vm1110_vm7, %v1101_v32, %v895_v9 }
  0xc1   : > { %v1116_v43 = vsel %vm1110_vm7, %v1099_v40, %v893_v12 }
  0xc3   : > { %v987_v21 = vpop.permute.xlu1 %986 }
  0xc4   : > { %v1131_v23 = vsel %vm1127_vm8, %v1114_v19, %v987_v21  ;;  %v985_v25 = vpop.permute.xlu0 %984 }
  0xc5   : > { %v1129_v27 = vsel %vm1127_vm8, %v1112_v22, %v985_v25 }
  0xc6   : > { %v3886_v30 = vcombine.low %v1129_v27, %v1131_v23 }
  0xc7   : > { %v531_v35 = vpop.permute.xlu1 %530 }
  0xc8   : > { %4088 = vmatprep.mubr.msk.bf16.mxu0 %vm1184_vm9, %v3886_v30  ;;  %v529_v11 = vpop.permute.xlu0 %528  ;;  %v1018_v10 = vsel %vm1000_vm1, %v4587_v15, %v531_v35 }
  0xc9   : > { %v1015_v6 = vsel %vm1000_vm1, %v4594_v20, %v529_v11 }
  0xcb   : > { %v991_v42 = vpop.permute.xlu1 %990 }
  0xcc   : > { %v1135_v44 = vsel %vm1127_vm8, %v1118_v41, %v991_v42  ;;  %v989_v45 = vpop.permute.xlu0 %988 }
  0xcd   : > { %v1133_v46 = vsel %vm1127_vm8, %v1116_v43, %v989_v45 }
  0xce   : > { %v3887_v47 = vcombine.low %v1133_v46, %v1135_v44 }
  0xcf   : > { %v535_v48 = vpop.permute.xlu1 %534 }
  0xd0   : > { %4089 = vmatmul.mubr.msk.bf16.vlgmr.msra.gmra.mxu0 %vm1184_vm9, %v3887_v47  ;;  %v533_v49 = vpop.permute.xlu0 %532  ;;  %v1024_v21 = vsel %vm1000_vm1, %v4602_v24, %v535_v48  ;;  %v350_v48 = vld [vmem:[#allocation2 + $0x10] sm:$0x1] }
  0xd1   : > { %v1021_v20 = vsel %vm1000_vm1, %v4615_v31, %v533_v49  ;;  %vm1749_vm1 = vcmask 1041409  }
  0xd3   : > { %v643_v50 = vpop.permute.xlu1 %642 }
  0xd4   : > { %v641_v51 = vpop.permute.xlu0 %640  ;;  %v1037_v12 = vsel %vm1025_vm2, %v1018_v10, %v643_v50  ;;  %v362_v50 = vld [vmem:[#allocation2 + $0x30] sm:$0x1]  ;;  %v368_v10 = vld [vmem:[#allocation2 + $0x40] sm:$0x1] }
  0xd5   : > { %v1035_v8 = vsel %vm1025_vm2, %v1015_v6, %v641_v51  ;;  %v371_v51 = vld [vmem:[#allocation2 + $0x48] sm:$0x1] }
  0xd7   : > { %v647_v52 = vpop.permute.xlu1 %646 }
  0xd8   : > { %v645_v53 = vpop.permute.xlu0 %644  ;;  %v1041_v23 = vsel %vm1025_vm2, %v1024_v21, %v647_v52  ;;  %v351_v52 = vsel %vm4804_vm12, 0, %v350_v48  ;;  %v4253_v21 = vld [vmem:[%s5450_s2 + $0x80] sm:$0xff]  }
  0xd9   : > { %v1039_v27 = vsel %vm1025_vm2, %v1021_v20, %v645_v53  ;;  %v363_v53 = vsel %vm4804_vm12, 0, %v362_v50  ;;  %352 = vst [vmem:[#allocation2 + $0x10] sm:$0x1] %v351_v52  ;;  %vm1752_vm2 = vcmask 1042434  }
  0xda   : > { %364 = vst [vmem:[#allocation2 + $0x30] sm:$0x1] %v363_v53 }
  0xdb   : > { %v683_v54 = vpop.permute.xlu1 %682 }
  0xdc   : > { %v681_v55 = vpop.permute.xlu0 %680  ;;  %v1054_v13 = vsel %vm1042_vm3, %v1037_v12, %v683_v54  ;;  %v372_v54 = vsel %vm4804_vm12, 0, %v371_v51  ;;  %v369_v12 = vsel %vm4804_vm12, 0, %v368_v10 }
  0xdd   : > { %v1052_v17 = vsel %vm1042_vm3, %v1035_v8, %v681_v55  ;;  %373 = vst [vmem:[#allocation2 + $0x48] sm:$0x1] %v372_v54  ;;  %v347_v55 = vld [vmem:[#allocation2 + $0x8] sm:$0x1]  ;;  %370 = vst [vmem:[#allocation2 + $0x40] sm:$0x1] %v369_v12 }
  0xde   : > { %v353_v8 = vld [vmem:[#allocation2 + $0x18] sm:$0x1] }
  0xdf   : > { %v687_v56 = vpop.permute.xlu1 %686 }
  0xe0   : > { %v685_v57 = vpop.permute.xlu0 %684  ;;  %v1058_v28 = vsel %vm1042_vm3, %v1041_v23, %v687_v56  ;;  %v348_v56 = vsel %vm4804_vm12, 0, %v347_v55  ;;  %v4408_v23 = vmov 1966171168  }
  0xe1   : > { %v1056_v33 = vsel %vm1042_vm3, %v1039_v27, %v685_v57  ;;  %v359_v57 = vld [vmem:[#allocation2 + $0x28] sm:$0x1]  ;;  %349 = vst [vmem:[#allocation2 + $0x8] sm:$0x1] %v348_v56  ;;  %v4846_v27 = vld [vmem:[%s5453_s5] ss:$0 sm:$0xff] }
  0xe2   : > { %vm1755_vm3 = vcmask 1043459  }
  0xe3   : > { %v723_v58 = vpop.permute.xlu1 %722 }
  0xe4   : > { %v721_v59 = vpop.permute.xlu0 %720  ;;  %v1071_v18 = vsel %vm1059_vm4, %v1054_v13, %v723_v58  ;;  %v335_v58 = vld [vmem:[#allocation2] sm:$0x7]  ;;  %v365_v13 = vld [vmem:[#allocation2 + $0x38] sm:$0x1] }
  0xe5   : > { %v1069_v15 = vsel %vm1059_vm4, %v1052_v17, %v721_v59  ;;  %v360_v59 = vsel %vm4804_vm12, 0, %v359_v57  ;;  %v366_v17 = vsel %vm4804_vm12, 0, %v365_v13 }
  0xe6   : > { %361 = vst [vmem:[#allocation2 + $0x28] sm:$0x1] %v360_v59  ;;  %367 = vst [vmem:[#allocation2 + $0x38] sm:$0x1] %v366_v17 }
  0xe7   : > { %v727_v60 = vpop.permute.xlu1 %726 }
  0xe8   : > { %v725_v61 = vpop.permute.xlu0 %724  ;;  %v1075_v34 = vsel %vm1059_vm4, %v1058_v28, %v727_v60  ;;  %v336_v60 = vsel %vm334_vm15, 0, %v335_v58 }
  0xe9   : > { %v1073_v37 = vsel %vm1059_vm4, %v1056_v33, %v725_v61  ;;  %337 = vst [vmem:[#allocation2] sm:$0x7] %v336_v60 }
  0xeb   : > { %v819_v62 = vpop.permute.xlu1 %818 }
  0xec   : > { %v817_v63 = vpop.permute.xlu0 %816  ;;  %v1088_v22 = vsel %vm1076_vm5, %v1071_v18, %v819_v62  ;;  %v338_v62 = vld [vmem:[#allocation2 + $0x4] sm:$0x7]  ;;  %v4250_v18 = vld [vmem:[%s5450_s2 + $0x88] sm:$0xff]  }
  0xed   : > { %v1086_v25 = vsel %vm1076_vm5, %v1069_v15, %v817_v63  ;;  %v4840_v15 = vld [vmem:[%s5452_s4] ss:$0 sm:$0xff] }
  0xef   : > { %v823_v0 = vpop.permute.xlu1 %822 }
  0xf0   : > { %v821_v1 = vpop.permute.xlu0 %820  ;;  %v1092_v11 = vsel %vm1076_vm5, %v1075_v34, %v823_v0  ;;  %v344_v61 = vld [vmem:[#allocation2] sm:$0x1]  ;;  %v339_v0 = vsel %vm334_vm15, 0, %v338_v62  ;;  %vm398_vm15 = vcmask 387074  }
  0xf1   : > { %v1090_v39 = vsel %vm1076_vm5, %v1073_v37, %v821_v1  ;;  %v345_v63 = vsel %vm4804_vm12, 0, %v344_v61  ;;  %340 = vst [vmem:[#allocation2 + $0x4] sm:$0x7] %v339_v0  ;;  %vm1791_vm5 = vcmask 1044484  }
  0xf2   : > { %346 = vst [vmem:[#allocation2] sm:$0x1] %v345_v63 }
  0xf3   : > { %v859_v2 = vpop.permute.xlu1 %858 }
  0xf4   : > { %v857_v3 = vpop.permute.xlu0 %856  ;;  %v1105_v26 = vsel %vm1093_vm6, %v1088_v22, %v859_v2 }
  0xf5   : > { %v1103_v29 = vsel %vm1093_vm6, %v1086_v25, %v857_v3  ;;  %v1314_v25 = vunpack.c.l.s4 %v4408_v23 }
  0xf7   : > { %v863_v4 = vpop.permute.xlu1 %862  ;;  %v1315_v34 = vunpack.c.0.s8 %v1314_v25 }
  0xf8   : > { %v861_v5 = vpop.permute.xlu0 %860  ;;  %v1109_v16 = vsel %vm1093_vm6, %v1092_v11, %v863_v4  ;;  %v4231_v2 = vld [vmem:[#allocation2 + $0x4] ss:$0 sps:$4 sm:$0x33]  }
  0xf9   : > { %v1107_v40 = vsel %vm1093_vm6, %v1090_v39, %v861_v5  ;;  %v4232_v1 = vld [vmem:[#allocation2] ss:$0 sps:$4 sm:$0x77]   ;;  %2184 = vrot.lane.b32.xlu0 %v4231_v2, %s4405_s22  ;;  %vm1811_vm6 = vsmask.f32 2306 }
  0xfa   : > { %v2207_v3 = vshll.u32 %v4232_v1, 16  ;;  %v2205_v4 = vshrl.u32 %v4232_v1, 16 }
  0xfb   : > { %v899_v7 = vpop.permute.xlu1 %898 }
  0xfc   : > { %v897_v9 = vpop.permute.xlu0 %896  ;;  %v1122_v24 = vsel %vm1110_vm7, %v1105_v26, %v899_v7  ;;  %v2209_v5 = vrot.slane %v2207_v3, 1  ;;  %v1316_v26 = vlaneseq }
  0xfd   : > { %v1120_v31 = vsel %vm1110_vm7, %v1103_v29, %v897_v9  ;;  %v356_v9 = vld [vmem:[#allocation2 + $0x20] sm:$0x1] }
  0xfe   : > { %v2210_v7 = vor.u32 %v2209_v5, %v2205_v4  ;;  %v357_v6 = vsel %vm4804_vm12, 0, %v356_v9 }
  0xff   : > { %v903_v14 = vpop.permute.xlu1 %902  ;;  %358 = vst [vmem:[#allocation2 + $0x20] sm:$0x1] %v357_v6 }
 0x100   : > { %v901_v19 = vpop.permute.xlu0 %900  ;;  %v1126_v41 = vsel %vm1110_vm7, %v1109_v16, %v903_v14  ;;  %2232 = vrot.lane.b32.xlu0 %v2210_v7, %s4406_s25  ;;  %v354_v14 = vsel %vm4804_vm12, 0, %v353_v8  ;;  %vm2409_vm12 = vcmask 785408  }
 0x101   : > { %v1124_v43 = vsel %vm1110_vm7, %v1107_v40, %v901_v19  ;;  %355 = vst [vmem:[#allocation2 + $0x18] sm:$0x1] %v354_v14  ;;  %v4407_v19 = vmov 0.0   ;;  %vm1784_vm7 = vcmask 254976  }
 0x102   : > { %4096 = vmatprep.subr.bf16.mxu0 %v4407_v19 }
 0x103   : > { %v995_v30 = vpop.permute.xlu1 %994  ;;  %4097 = vmatpush3.bf16.msra.mxu0 %v4250_v18 }
 0x104   : > { %v1139_v35 = vsel %vm1127_vm8, %v1122_v24, %v995_v30  ;;  %v993_v36 = vpop.permute.xlu0 %992  ;;  %4098 = vmatprep.subr.bf16.mxu0 %v4407_v19 }
 0x105   : > { %v1137_v38 = vsel %vm1127_vm8, %v1120_v31, %v993_v36  ;;  %v4851_v31 = vshrl.u32 %v1316_v26, 7 }
 0x106   : > { %v3888_v32 = vcombine.low %v1137_v38, %v1139_v35  ;;  %v4410_v35 = vmov 1935823168  }
 0x107   : > { %v999_v42 = vpop.permute.xlu1 %998  ;;  %4099 = vmatpush3.bf16.msra.mxu0 %v4253_v21  ;;  %v1509_v36 = vunpack.c.l.s4 %v4410_v35  ;;  %v4857_v40 = vsub.s32 %v1315_v34, %v4851_v31 }
 0x108   : > { %v1143_v44 = vsel %vm1127_vm8, %v1126_v41, %v999_v42  ;;  %4092 = vmatprep.mubr.msk.bf16.mxu0 %vm1184_vm9, %v3888_v32  ;;  %v997_v45 = vpop.permute.xlu0 %996 }
 0x109   : > { %v1141_v46 = vsel %vm1127_vm8, %v1124_v43, %v997_v45  ;;  %v1510_v42 = vunpack.c.0.s8 %v1509_v36 }
 0x10a   : > { %v3889_v47 = vcombine.low %v1141_v46, %v1143_v44 }
 0x10b   : > { %v4863_v51 = vsub.s32 %v1510_v42, %v4851_v31 }
 0x10c   : > { %4093 = vmatmul.mubr.msk.bf16.gmra.mxu0 %vm1184_vm9, %v3889_v47  ;;  %vm4901_vm9 = vmand %vm332_vm13, %vm1811_vm6  ;;  %vm374_vm13 = vcmask 387072  }
 0x10d   : > { %4100 = vmatprep.mubr.msk.bf16.mxu0 %vm4409_vm0, %v4407_v19  ;;  %vm5156_vm0 = vmand %vm378_vm14, %vm342_vm11 }
 0x190   : > { %v4090_v22 = vpop.f32.mrf.mxu0 }
 0x191   : > { %v1275_v20 = vmul.f32 %v4090_v22, %v4840_v15 }
 0x192   : > { %v1235_v28 = vpop.f32.mrf.mxu0 }
 0x193   : > { %v1273_v29 = vmul.f32 %v4840_v15, %v1235_v28  ;;  %v1290_v30 = vadd.f32 %v4846_v27, %v1275_v20 }
 0x194   : > { %v4091_v24 = vpop.f32.mrf.mxu0 }
 0x195   : > { %v1276_v33 = vmul.f32 %v4091_v24, %v4840_v15  ;;  %v1288_v11 = vadd.f32 %v4846_v27, %v1273_v29  ;;  %v1298_v16 = vmax.f32 %v1290_v30, 0.0 }
 0x196   : > { %v1238_v37 = vpop.f32.mrf.mxu0 }
 0x197   : > { %v1291_v38 = vadd.f32 %v4846_v27, %v1276_v33  ;;  %v1274_v39 = vmul.f32 %v4840_v15, %v1238_v37  ;;  %v1296_v43 = vmax.f32 %v1288_v11, 0.0 }
 0x199   : > { %v1299_v32 = vmax.f32 %v1291_v38, 0.0  ;;  %v1289_v41 = vadd.f32 %v4846_v27, %v1274_v39 }
 0x19b   : > { %v1305_v44 = vpack.c.bf16 %v1299_v32, %v1298_v16  ;;  %v3900_v45 = vpack.c.bf16 %v1299_v32, %v1299_v32  ;;  %v1297_v46 = vmax.f32 %v1289_v41, 0.0 }
 0x19d   : > { %v1368_v47 = vrot.slane %v1305_v44, %v4857_v40  ;;  %v1375_v48 = vrot.slane %v3900_v45, %v4857_v40  ;;  %v1304_v49 = vpack.c.bf16 %v1297_v46, %v1296_v43  ;;  %v3899_v50 = vpack.c.bf16 %v1297_v46, %v1297_v46 }
 0x19f   : > { %v1376_v52 = vcombine.high %v1368_v47, %v1368_v47  ;;  %v1377_v53 = vcombine.high %v1375_v48, %v1375_v48  ;;  %v1384_v54 = vrot.slane %v1368_v47, %v4857_v40  ;;  %v1391_v55 = vrot.slane %v1375_v48, %v4857_v40  ;;  %v4267_v48 = vld [vmem:[%s5450_s2 + $0x60] sm:$0xff]  }
 0x1a0   : > { %v1319_v56 = vrot.slane %v1304_v49, %v4857_v40  ;;  %v1326_v57 = vrot.slane %v3899_v50, %v4857_v40  ;;  %v1816_v49 = vld [vmem:[#allocation2 + $0x30] sm:$0x7] }
 0x1a1   : > { %v1398_v58 = vrot.slane %v1376_v52, %v4857_v40  ;;  %v1405_v59 = vrot.slane %v1377_v53, %v4857_v40  ;;  %v1406_v60 = vcombine.high %v1384_v54, %v1384_v54  ;;  %v1407_v61 = vcombine.high %v1391_v55, %v1391_v55 }
 0x1a2   : > { %v1570_v62 = vrot.slane %v1384_v54, %v4863_v51  ;;  %v1887_v63 = vrot.slane %v1391_v55, %v4863_v51  ;;  %v1327_v0 = vcombine.high %v1319_v56, %v1319_v56  ;;  %v1328_v1 = vcombine.high %v1326_v57, %v1326_v57 }
 0x1a3   : > { %v1408_v2 = vcombine.high %v1398_v58, %v1398_v58  ;;  %v1409_v3 = vcombine.high %v1405_v59, %v1405_v59  ;;  %v1584_v4 = vrot.slane %v1398_v58, %v4863_v51  ;;  %v1598_v5 = vrot.slane %v1406_v60, %v4863_v51 }
 0x1a4   : > { %v1577_v7 = vrot.slane %v1570_v62, %v4863_v51  ;;  %v1894_v9 = vrot.slane %v1887_v63, %v4863_v51  ;;  %v1901_v10 = vrot.slane %v1405_v59, %v4863_v51  ;;  %v1915_v6 = vrot.slane %v1407_v61, %v4863_v51 }
 0x1a5   : > { %v1591_v12 = vrot.slane %v1584_v4, %v4863_v51  ;;  %v1605_v8 = vrot.slane %v1598_v5, %v4863_v51  ;;  %v1612_v13 = vrot.slane %v1408_v2, %v4863_v51  ;;  %v1929_v14 = vrot.slane %v1409_v3, %v4863_v51 }
 0x1a6   : > { %v1736_v17 = vunpack.c.l.b16 %v1577_v7  ;;  %v1908_v18 = vrot.slane %v1901_v10, %v4863_v51  ;;  %v1922_v19 = vrot.slane %v1915_v6, %v4863_v51  ;;  %v2053_v21 = vunpack.c.l.b16 %v1894_v9 }
 0x1a7   : > { %v1619_v22 = vrot.slane %v1612_v13, %v4863_v51  ;;  %v1737_v20 = vunpack.c.l.b16 %v1591_v12  ;;  %v1738_v23 = vunpack.c.l.b16 %v1605_v8  ;;  %v1936_v25 = vrot.slane %v1929_v14, %v4863_v51 }
 0x1a8   : > { %v2054_v26 = vunpack.c.l.b16 %v1908_v18  ;;  %v2055_v28 = vunpack.c.l.b16 %v1922_v19  ;;  %v1335_v29 = vrot.slane %v1319_v56, %v4857_v40  ;;  %v1342_v24 = vrot.slane %v1326_v57, %v4857_v40  ;;  %v2126_v57 = vld [vmem:[#allocation2 + $0x10] sm:$0x7] }
 0x1a9   : > { %v1739_v30 = vunpack.c.l.b16 %v1619_v22  ;;  %v1757_v33 = vrot.slane %v1737_v20, 7  ;;  %v1759_v34 = vrot.slane %v1738_v23, 6  ;;  %v2056_v35 = vunpack.c.l.b16 %v1936_v25 }
 0x1aa   : > { %v2071_v36 = vrot.slane %v2054_v26, 7  ;;  %v2073_v37 = vrot.slane %v2055_v28, 6  ;;  %v1349_v11 = vrot.slane %v1327_v0, %v4857_v40  ;;  %v1356_v38 = vrot.slane %v1328_v1, %v4857_v40 }
 0x1ab   : > { %v1758_v39 = vsel %vm1749_vm1, %v1757_v33, %v1736_v17  ;;  %v1761_v16 = vrot.slane %v1739_v30, 5  ;;  %v1793_v32 = vsel %vm1752_vm2, %v1757_v33, %v1736_v17  ;;  %v2075_v41 = vrot.slane %v2056_v35, 5 }
 0x1ac   : > { %v1760_v42 = vsel %vm1752_vm2, %v1759_v34, %v1758_v39  ;;  %v1794_v43 = vsel %vm1755_vm3, %v1759_v34, %v1793_v32  ;;  %v2072_v44 = vsel %vm1749_vm1, %v2071_v36, %v2053_v21  ;;  %v2105_v45 = vsel %vm1752_vm2, %v2071_v36, %v2053_v21 }
 0x1ad   : > { %v1762_v46 = vsel %vm1755_vm3, %v1761_v16, %v1760_v42  ;;  %v1795_v47 = vsel %vm1791_vm5, %v1761_v16, %v1794_v43  ;;  %v2074_v50 = vsel %vm1752_vm2, %v2073_v37, %v2072_v44  ;;  %v2106_v52 = vsel %vm1755_vm3, %v2073_v37, %v2105_v45 }
 0x1ae   : > { %v1776_v53 = vpack.c.b16 %v1762_v46, %v1762_v46  ;;  %v1803_v54 = vpack.c.b16 %v1795_v47, %v1795_v47  ;;  %v2076_v55 = vsel %vm1755_vm3, %v2075_v41, %v2074_v50  ;;  %v2107_v56 = vsel %vm1791_vm5, %v2075_v41, %v2106_v52  ;;  %v1813_v46 = vld [vmem:[#allocation2 + $0x28] sm:$0x7] }
 0x1af   : > { %v2090_v58 = vpack.c.b16 %v2076_v55, %v2076_v55  ;;  %v2115_v59 = vpack.c.b16 %v2107_v56, %v2107_v56  ;;  %v1357_v60 = vcombine.high %v1335_v29, %v1335_v29  ;;  %v1358_v61 = vcombine.high %v1342_v24, %v1342_v24  ;;  %v2123_v55 = vld [vmem:[#allocation2 + $0x8] sm:$0x7] }
 0x1b0   : > { %1786 = vst.msk [vmem:[#allocation2 + $0x34] sm:$0x3] %vm1784_vm7, %v1776_v53  ;;  %v1817_v62 = vsel %vm4901_vm9, %v1803_v54, %v1816_v49  ;;  %v1359_v63 = vcombine.high %v1349_v11, %v1349_v11  ;;  %v1360_v0 = vcombine.high %v1356_v38, %v1356_v38  ;;  %v1514_v1 = vrot.slane %v1335_v29, %v4863_v51 }
 0x1b1   : > { %1818 = vst [vmem:[#allocation2 + $0x30] sm:$0x7] %v1817_v62  ;;  %2099 = vst.msk [vmem:[#allocation2 + $0x14] sm:$0x3] %vm1784_vm7, %v2090_v58  ;;  %v2127_v2 = vsel %vm4901_vm9, %v2115_v59, %v2126_v57  ;;  %v1528_v3 = vrot.slane %v1349_v11, %v4863_v51  ;;  %v1542_v4 = vrot.slane %v1357_v60, %v4863_v51 }
 0x1b2   : > { %v1831_v5 = vrot.slane %v1342_v24, %v4863_v51  ;;  %2128 = vst [vmem:[#allocation2 + $0x10] sm:$0x7] %v2127_v2  ;;  %v1556_v7 = vrot.slane %v1359_v63, %v4863_v51  ;;  %v1845_v9 = vrot.slane %v1356_v38, %v4863_v51  ;;  %v1859_v10 = vrot.slane %v1358_v61, %v4863_v51 }
 0x1b3   : > { %v1521_v6 = vrot.slane %v1514_v1, %v4863_v51  ;;  %v1535_v12 = vrot.slane %v1528_v3, %v4863_v51  ;;  %v1549_v8 = vrot.slane %v1542_v4, %v4863_v51  ;;  %v1873_v13 = vrot.slane %v1360_v0, %v4863_v51 }
 0x1b4   : > { %v1563_v14 = vrot.slane %v1556_v7, %v4863_v51  ;;  %v1838_v17 = vrot.slane %v1831_v5, %v4863_v51  ;;  %v1852_v18 = vrot.slane %v1845_v9, %v4863_v51  ;;  %v1866_v19 = vrot.slane %v1859_v10, %v4863_v51 }
 0x1b5   : > { %v1733_v21 = vunpack.c.l.b16 %v1535_v12  ;;  %v1734_v22 = vunpack.c.l.b16 %v1549_v8  ;;  %v1880_v20 = vrot.slane %v1873_v13, %v4863_v51  ;;  %v1732_v28 = vunpack.c.l.b16 %v1521_v6 }
 0x1b6   : > { %v1735_v23 = vunpack.c.l.b16 %v1563_v14  ;;  %v2050_v25 = vunpack.c.l.b16 %v1852_v18  ;;  %v2051_v26 = vunpack.c.l.b16 %v1866_v19  ;;  %v2049_v34 = vunpack.c.l.b16 %v1838_v17 }
 0x1b7   : > { %v1748_v29 = vrot.slane %v1733_v21, 7  ;;  %v1751_v24 = vrot.slane %v1734_v22, 6  ;;  %v2052_v30 = vunpack.c.l.b16 %v1880_v20 }
 0x1b8   : > { %v1754_v33 = vrot.slane %v1735_v23, 5  ;;  %v2065_v35 = vrot.slane %v2050_v25, 7  ;;  %v2067_v36 = vrot.slane %v2051_v26, 6  ;;  %v4233_v39 = vld [vmem:[#allocation2 + $0x14] ss:$0 sps:$4 sm:$0x33]  }
 0x1b9   : > { %v1750_v37 = vsel %vm1749_vm1, %v1748_v29, %v1732_v28  ;;  %v1789_v11 = vsel %vm1752_vm2, %v1748_v29, %v1732_v28  ;;  %v2069_v38 = vrot.slane %v2052_v30, 5  ;;  %v4234_v43 = vld [vmem:[#allocation2 + $0x14] ss:$0 sps:$4 sm:$0x33]   ;;  %2342 = vrot.lane.b32.xlu1 %v4233_v39, %s4411_s27 }
 0x1ba   : > { %v1753_v16 = vsel %vm1752_vm2, %v1751_v24, %v1750_v37  ;;  %v1790_v32 = vsel %vm1755_vm3, %v1751_v24, %v1789_v11  ;;  %v2066_v41 = vsel %vm1749_vm1, %v2065_v35, %v2049_v34  ;;  %v2102_v42 = vsel %vm1752_vm2, %v2065_v35, %v2049_v34  ;;  %2188 = vrot.lane.b32.xlu0 %v4234_v43, %s4405_s22  ;;  %v4235_v58 = vld [vmem:[#allocation2 + $0x10] ss:$0 sps:$4 sm:$0x33]  }
 0x1bb   : > { %v1756_v44 = vsel %vm1755_vm3, %v1754_v33, %v1753_v16  ;;  %v1792_v45 = vsel %vm1791_vm5, %v1754_v33, %v1790_v32  ;;  %v2068_v47 = vsel %vm1752_vm2, %v2067_v36, %v2066_v41  ;;  %v2103_v49 = vsel %vm1755_vm3, %v2067_v36, %v2102_v42  ;;  %v4241_v61 = vld [vmem:[#allocation2 + $0x30] ss:$0 sps:$4 sm:$0x77]  }
 0x1bc   : > { %v1775_v50 = vpack.c.b16 %v1756_v44, %v1756_v44  ;;  %v1802_v52 = vpack.c.b16 %v1792_v45, %v1792_v45  ;;  %v2070_v53 = vsel %vm1755_vm3, %v2069_v38, %v2068_v47  ;;  %v2104_v54 = vsel %vm1791_vm5, %v2069_v38, %v2103_v49  ;;  %v4237_v62 = vld [vmem:[#allocation2 + $0x30] ss:$0 sps:$4 sm:$0x33]  }
 0x1bd   : > { %v2089_v56 = vpack.c.b16 %v2070_v53, %v2070_v53  ;;  %v2114_v57 = vpack.c.b16 %v2104_v54, %v2104_v54  ;;  %2322 = vrot.lane.b32.xlu1 %v4235_v58, %s4406_s25  ;;  %v2282_v63 = vshll.u32 %v4241_v61, 16  ;;  %v4242_v0 = vld [vmem:[#allocation2 + $0x10] ss:$0 sps:$4 sm:$0x77]   ;;  %v2280_v7 = vshrl.u32 %v4241_v61, 16 }
 0x1be   : > { %1785 = vst.msk [vmem:[#allocation2 + $0x2c] sm:$0x3] %vm1784_vm7, %v1775_v50  ;;  %v1814_v59 = vsel %vm4901_vm9, %v1802_v52, %v1813_v46  ;;  %v2221_v5 = vshll.u32 %v4242_v0, 16  ;;  %v2219_v23 = vshrl.u32 %v4242_v0, 16 }
 0x1bf   : > { %1815 = vst [vmem:[#allocation2 + $0x28] sm:$0x7] %v1814_v59  ;;  %2098 = vst.msk [vmem:[#allocation2 + $0xc] sm:$0x3] %vm1784_vm7, %v2089_v56  ;;  %v2124_v60 = vsel %vm4901_vm9, %v2114_v57, %v2123_v55  ;;  %v2284_v3 = vrot.slane %v2282_v63, 1 }
 0x1c0   : > { %2125 = vst [vmem:[#allocation2 + $0x8] sm:$0x7] %v2124_v60  ;;  %v2223_v13 = vrot.slane %v2221_v5, 1 }
 0x1c1   : > { %2254 = vrot.lane.b32.xlu1 %v4237_v62, %s4411_s27  ;;  %v2285_v6 = vor.u32 %v2284_v3, %v2280_v7 }
 0x1c2   : > { %v2224_v24 = vor.u32 %v2223_v13, %v2219_v23 }
 0x1c6   : > { %v4236_v1 = vld [vmem:[#allocation2 + $0xc] ss:$0 sps:$4 sm:$0x33]   ;;  %v4244_v10 = vld [vmem:[#allocation2 + $0x28] ss:$0 sps:$4 sm:$0x77]  }
 0x1c7   : > { %2340 = vrot.lane.b32.xlu0 %v4236_v1, %s4411_s27  ;;  %v4239_v2 = vld [vmem:[#allocation2 + $0xc] ss:$0 sps:$4 sm:$0x33]   ;;  %v4238_v4 = vld [vmem:[#allocation2 + $0x8] ss:$0 sps:$4 sm:$0x33]  }
 0x1c8   : > { %2186 = vrot.lane.b32.xlu1 %v4239_v2, %s4405_s22  ;;  %v4243_v9 = vld [vmem:[#allocation2 + $0x8] ss:$0 sps:$4 sm:$0x77]   ;;  %v2275_v21 = vshll.u32 %v4244_v10, 16  ;;  %v2273_v37 = vshrl.u32 %v4244_v10, 16 }
 0x1c9   : > { %v2214_v8 = vshll.u32 %v4243_v9, 16  ;;  %v4240_v17 = vld [vmem:[#allocation2 + $0x28] ss:$0 sps:$4 sm:$0x33]   ;;  %v2212_v18 = vshrl.u32 %v4243_v9, 16 }
 0x1ca   : > { %v2277_v30 = vrot.slane %v2275_v21, 1 }
 0x1cb   : > { %2320 = vrot.lane.b32.xlu0 %v4238_v4, %s4406_s25  ;;  %v2216_v19 = vrot.slane %v2214_v8, 1 }
 0x1cc   : > { %v4094_v12 = vpop.f32.mrf.mxu0  ;;  %2302 = vrot.lane.b32.xlu1 %v2285_v6, %s4405_s22  ;;  %v2278_v16 = vor.u32 %v2277_v30, %v2273_v37 }
 0x1cd   : > { %v1279_v14 = vmul.f32 %v4094_v12, %v4840_v15  ;;  %v2217_v25 = vor.u32 %v2216_v19, %v2212_v18 }
 0x1ce   : > { %v1251_v22 = vpop.f32.mrf.mxu0 }
 0x1cf   : > { %v1277_v20 = vmul.f32 %v4840_v15, %v1251_v22  ;;  %2252 = vrot.lane.b32.xlu0 %v4240_v17, %s4411_s27  ;;  %v1294_v28 = vadd.f32 %v4846_v27, %v1279_v14 }
 0x1d0   : > { %v4095_v26 = vpop.f32.mrf.mxu0  ;;  %2234 = vrot.lane.b32.xlu1 %v2217_v25, %s4406_s25 }
 0x1d1   : > { %v1280_v29 = vmul.f32 %v4095_v26, %v4840_v15  ;;  %v1292_v34 = vadd.f32 %v4846_v27, %v1277_v20  ;;  %v1302_v11 = vmax.f32 %v1294_v28, 0.0 }
 0x1d2   : > { %v1254_v33 = vpop.f32.mrf.mxu0 }
 0x1d3   : > { %v1295_v35 = vadd.f32 %v4846_v27, %v1280_v29  ;;  %v1278_v36 = vmul.f32 %v4840_v15, %v1254_v33  ;;  %2236 = vrot.lane.b32.xlu0 %v2224_v24, %s4406_s25  ;;  %v1300_v32 = vmax.f32 %v1292_v34, 0.0 }
 0x1d5   : > { %v1303_v38 = vmax.f32 %v1295_v35, 0.0  ;;  %v1293_v39 = vadd.f32 %v4846_v27, %v1278_v36 }
 0x1d7   : > { %v1307_v41 = vpack.c.bf16 %v1303_v38, %v1302_v11  ;;  %v3902_v42 = vpack.c.bf16 %v1303_v38, %v1303_v38  ;;  %v1301_v43 = vmax.f32 %v1293_v39, 0.0  ;;  %2300 = vrot.lane.b32.xlu0 %v2278_v16, %s4405_s22 }
 0x1d9   : > { %v1466_v44 = vrot.slane %v1307_v41, %v4857_v40  ;;  %v1473_v45 = vrot.slane %v3902_v42, %v4857_v40  ;;  %v1306_v46 = vpack.c.bf16 %v1301_v43, %v1300_v32  ;;  %v3901_v15 = vpack.c.bf16 %v1301_v43, %v1301_v43 }
 0x1db   : > { %v1474_v47 = vcombine.high %v1466_v44, %v1466_v44  ;;  %v1475_v49 = vcombine.high %v1473_v45, %v1473_v45  ;;  %v1482_v50 = vrot.slane %v1466_v44, %v4857_v40  ;;  %v1489_v52 = vrot.slane %v1473_v45, %v4857_v40  ;;  %v1822_v44 = vld [vmem:[#allocation2 + $0x40] sm:$0x7] }
 0x1dc   : > { %v1417_v27 = vrot.slane %v1306_v46, %v4857_v40  ;;  %v1424_v53 = vrot.slane %v3901_v15, %v4857_v40  ;;  %v4261_v46 = vld [vmem:[%s5450_s2 + $0x78] sm:$0xff]  }
 0x1dd   : > { %v1496_v54 = vrot.slane %v1474_v47, %v4857_v40  ;;  %v1503_v55 = vrot.slane %v1475_v49, %v4857_v40  ;;  %v1504_v56 = vcombine.high %v1482_v50, %v1482_v50  ;;  %v1505_v57 = vcombine.high %v1489_v52, %v1489_v52  ;;  %v4262_v15 = vld [vmem:[%s5450_s2 + $0x38] sm:$0xff]   ;;  %4035 = vmatprep.subr.bf16.mxu1 %v4261_v46 }
 0x1de   : > { %v1682_v58 = vrot.slane %v1482_v50, %v4863_v51  ;;  %v1999_v59 = vrot.slane %v1489_v52, %v4863_v51  ;;  %v1425_v60 = vcombine.high %v1417_v27, %v1417_v27  ;;  %v1426_v61 = vcombine.high %v1424_v53, %v1424_v53  ;;  %4036 = vmatpush3.bf16.msra.mxu1 %v4262_v15  ;;  %v2129_v46 = vld [vmem:[#allocation2 + $0x18] sm:$0x7]  ;;  %v4264_v15 = vld [vmem:[%s5450_s2 + $0x30] sm:$0xff]  }
 0x1df   : > { %v1506_v62 = vcombine.high %v1496_v54, %v1496_v54  ;;  %v1507_v63 = vcombine.high %v1503_v55, %v1503_v55  ;;  %v1696_v0 = vrot.slane %v1496_v54, %v4863_v51  ;;  %v1710_v1 = vrot.slane %v1504_v56, %v4863_v51 }
 0x1e0   : > { %v1689_v2 = vrot.slane %v1682_v58, %v4863_v51  ;;  %v2006_v3 = vrot.slane %v1999_v59, %v4863_v51  ;;  %v2013_v4 = vrot.slane %v1503_v55, %v4863_v51  ;;  %v2027_v5 = vrot.slane %v1505_v57, %v4863_v51 }
 0x1e1   : > { %v1703_v7 = vrot.slane %v1696_v0, %v4863_v51  ;;  %v1717_v9 = vrot.slane %v1710_v1, %v4863_v51  ;;  %v1724_v10 = vrot.slane %v1506_v62, %v4863_v51  ;;  %v2041_v6 = vrot.slane %v1507_v63, %v4863_v51 }
 0x1e2   : > { %v1744_v12 = vunpack.c.l.b16 %v1689_v2  ;;  %v2020_v8 = vrot.slane %v2013_v4, %v4863_v51  ;;  %v2034_v13 = vrot.slane %v2027_v5, %v4863_v51  ;;  %v2061_v14 = vunpack.c.l.b16 %v2006_v3 }
 0x1e3   : > { %v1731_v17 = vrot.slane %v1724_v10, %v4863_v51  ;;  %v1745_v18 = vunpack.c.l.b16 %v1703_v7  ;;  %v1746_v19 = vunpack.c.l.b16 %v1717_v9  ;;  %v2048_v21 = vrot.slane %v2041_v6, %v4863_v51 }
 0x1e4   : > { %v2062_v22 = vunpack.c.l.b16 %v2020_v8  ;;  %v2063_v20 = vunpack.c.l.b16 %v2034_v13  ;;  %v1433_v23 = vrot.slane %v1417_v27, %v4857_v40  ;;  %v1440_v25 = vrot.slane %v1424_v53, %v4857_v40  ;;  %v2132_v27 = vld [vmem:[#allocation2 + $0x20] sm:$0x7] }
 0x1e5   : > { %v1747_v26 = vunpack.c.l.b16 %v1731_v17  ;;  %v1769_v28 = vrot.slane %v1745_v18, 7  ;;  %v1771_v29 = vrot.slane %v1746_v19, 6  ;;  %v2064_v24 = vunpack.c.l.b16 %v2048_v21 }
 0x1e6   : > { %v2083_v30 = vrot.slane %v2062_v22, 7  ;;  %v2085_v33 = vrot.slane %v2063_v20, 6  ;;  %v1447_v34 = vrot.slane %v1425_v60, %v4857_v40  ;;  %v1454_v35 = vrot.slane %v1426_v61, %v4857_v40 }
 0x1e7   : > { %v1770_v36 = vsel %vm1749_vm1, %v1769_v28, %v1744_v12  ;;  %v1773_v37 = vrot.slane %v1747_v26, 5  ;;  %v1799_v11 = vsel %vm1752_vm2, %v1769_v28, %v1744_v12  ;;  %v2087_v38 = vrot.slane %v2064_v24, 5 }
 0x1e8   : > { %v1772_v39 = vsel %vm1752_vm2, %v1771_v29, %v1770_v36  ;;  %v1800_v16 = vsel %vm1755_vm3, %v1771_v29, %v1799_v11  ;;  %v2084_v32 = vsel %vm1749_vm1, %v2083_v30, %v2061_v14  ;;  %v2111_v41 = vsel %vm1752_vm2, %v2083_v30, %v2061_v14 }
 0x1e9   : > { %v1774_v42 = vsel %vm1755_vm3, %v1773_v37, %v1772_v39  ;;  %v1801_v43 = vsel %vm1791_vm5, %v1773_v37, %v1800_v16  ;;  %v2086_v40 = vsel %vm1752_vm2, %v2085_v33, %v2084_v32  ;;  %v2112_v45 = vsel %vm1755_vm3, %v2085_v33, %v2111_v41  ;;  %v1819_v16 = vld [vmem:[#allocation2 + $0x38] sm:$0x7] }
 0x1ea   : > { %v1778_v47 = vpack.c.b16 %v1774_v42, %v1774_v42  ;;  %v1805_v49 = vpack.c.b16 %v1801_v43, %v1801_v43  ;;  %v2088_v50 = vsel %vm1755_vm3, %v2087_v38, %v2086_v40  ;;  %v2113_v52 = vsel %vm1791_vm5, %v2087_v38, %v2112_v45  ;;  %v4263_v42 = vld [vmem:[%s5450_s2 + $0x70] sm:$0xff]  }
 0x1eb   : > { %v2092_v53 = vpack.c.b16 %v2088_v50, %v2088_v50  ;;  %v2117_v54 = vpack.c.b16 %v2113_v52, %v2113_v52  ;;  %v1455_v55 = vcombine.high %v1433_v23, %v1433_v23  ;;  %v1456_v56 = vcombine.high %v1440_v25, %v1440_v25  ;;  %4037 = vmatprep.subr.bf16.mxu1 %v4263_v42 }
 0x1ec   : > { %1788 = vst.msk [vmem:[#allocation2 + $0x44] sm:$0x3] %vm1784_vm7, %v1778_v47  ;;  %v1823_v57 = vsel %vm4901_vm9, %v1805_v49, %v1822_v44  ;;  %v1457_v58 = vcombine.high %v1447_v34, %v1447_v34  ;;  %v1458_v59 = vcombine.high %v1454_v35, %v1454_v35  ;;  %v1626_v60 = vrot.slane %v1433_v23, %v4863_v51 }
 0x1ed   : > { %1824 = vst [vmem:[#allocation2 + $0x40] sm:$0x7] %v1823_v57  ;;  %2101 = vst.msk [vmem:[#allocation2 + $0x24] sm:$0x3] %vm1784_vm7, %v2092_v53  ;;  %v2133_v61 = vsel %vm4901_vm9, %v2117_v54, %v2132_v27  ;;  %v1640_v62 = vrot.slane %v1447_v34, %v4863_v51  ;;  %v1654_v63 = vrot.slane %v1455_v55, %v4863_v51  ;;  %4038 = vmatpush3.bf16.msra.mxu1 %v4264_v15  ;;  %v4266_v57 = vld [vmem:[%s5450_s2 + $0x28] sm:$0xff]   ;;  %v4275_v15 = vld [vmem:[%s5450_s2 + $0x40] sm:$0xff]  }
 0x1ee   : > { %v1943_v0 = vrot.slane %v1440_v25, %v4863_v51  ;;  %2134 = vst [vmem:[#allocation2 + $0x20] sm:$0x7] %v2133_v61  ;;  %v1668_v1 = vrot.slane %v1457_v58, %v4863_v51  ;;  %v1957_v2 = vrot.slane %v1454_v35, %v4863_v51  ;;  %v1971_v3 = vrot.slane %v1456_v56, %v4863_v51  ;;  %v4255_v27 = vld [vmem:[#allocation2 + $0x8] ss:$0 sps:$4 sm:$0x77]  }
 0x1ef   : > { %v1633_v4 = vrot.slane %v1626_v60, %v4863_v51  ;;  %v1647_v5 = vrot.slane %v1640_v62, %v4863_v51  ;;  %v1661_v7 = vrot.slane %v1654_v63, %v4863_v51  ;;  %v1985_v9 = vrot.slane %v1458_v59, %v4863_v51  ;;  %v4256_v53 = vld [vmem:[#allocation2 + $0x10] ss:$0 sps:$4 sm:$0x77]   ;;  %v4265_v56 = vld [vmem:[%s5450_s2 + $0x68] sm:$0xff]   ;;  %v4268_v62 = vld [vmem:[%s5450_s2 + $0x20] sm:$0xff]  }
 0x1f0   : > { %v1675_v10 = vrot.slane %v1668_v1, %v4863_v51  ;;  %v1950_v6 = vrot.slane %v1943_v0, %v4863_v51  ;;  %v1964_v12 = vrot.slane %v1957_v2, %v4863_v51  ;;  %v1978_v8 = vrot.slane %v1971_v3, %v4863_v51  ;;  %4039 = vmatprep.subr.bf16.mxu1 %v4265_v56 }
 0x1f1   : > { %v1741_v13 = vunpack.c.l.b16 %v1647_v5  ;;  %v1742_v14 = vunpack.c.l.b16 %v1661_v7  ;;  %v1992_v17 = vrot.slane %v1985_v9, %v4863_v51  ;;  %v1740_v22 = vunpack.c.l.b16 %v1633_v4  ;;  %4040 = vmatpush3.bf16.msra.mxu1 %v4266_v57 }
 0x1f2   : > { %v1743_v18 = vunpack.c.l.b16 %v1675_v10  ;;  %v2058_v19 = vunpack.c.l.b16 %v1964_v12  ;;  %v2059_v21 = vunpack.c.l.b16 %v1978_v8  ;;  %v2057_v28 = vunpack.c.l.b16 %v1950_v6  ;;  %4041 = vmatprep.subr.bf16.mxu1 %v4267_v48 }
 0x1f3   : > { %v1763_v20 = vrot.slane %v1741_v13, 7  ;;  %v1765_v23 = vrot.slane %v1742_v14, 6  ;;  %v2060_v25 = vunpack.c.l.b16 %v1992_v17  ;;  %v2363_v58 = vshll.u32 %v4255_v27, 16 }
 0x1f4   : > { %v1767_v26 = vrot.slane %v1743_v18, 5  ;;  %v2077_v29 = vrot.slane %v2058_v19, 7  ;;  %v2079_v24 = vrot.slane %v2059_v21, 6  ;;  %v4247_v50 = vld [vmem:[#allocation2 + $0x40] ss:$0 sps:$4 sm:$0x33]  }
 0x1f5   : > { %v1764_v30 = vsel %vm1749_vm1, %v1763_v20, %v1740_v22  ;;  %v1796_v33 = vsel %vm1752_vm2, %v1763_v20, %v1740_v22  ;;  %v2081_v34 = vrot.slane %v2060_v25, 5  ;;  %v4245_v35 = vld [vmem:[#allocation2 + $0x20] ss:$0 sps:$4 sm:$0x33]   ;;  %v2370_v59 = vshll.u32 %v4256_v53, 16  ;;  %4042 = vmatpush3.bf16.msra.mxu1 %v4268_v62 }
 0x1f6   : > { %v1766_v36 = vsel %vm1752_vm2, %v1765_v23, %v1764_v30  ;;  %v1797_v51 = vsel %vm1755_vm3, %v1765_v23, %v1796_v33  ;;  %v2078_v37 = vsel %vm1749_vm1, %v2077_v29, %v2057_v28  ;;  %v2108_v11 = vsel %vm1752_vm2, %v2077_v29, %v2057_v28  ;;  %2326 = vrot.lane.b32.xlu1 %v4245_v35, %s4406_s25  ;;  %v4252_v55 = vld [vmem:[#allocation2 + $0x40] ss:$0 sps:$4 sm:$0x77]   ;;  %v4269_v28 = vld [vmem:[%s5450_s2 + $0x58] sm:$0xff]  }
 0x1f7   : > { %v1768_v38 = vsel %vm1755_vm3, %v1767_v26, %v1766_v36  ;;  %v1798_v39 = vsel %vm1791_vm5, %v1767_v26, %v1797_v51  ;;  %v2080_v32 = vsel %vm1752_vm2, %v2079_v24, %v2078_v37  ;;  %v2109_v41 = vsel %vm1755_vm3, %v2079_v24, %v2108_v11  ;;  %v4258_v60 = vld [vmem:[#allocation2 + $0x20] ss:$0 sps:$4 sm:$0x77]   ;;  %v4270_v29 = vld [vmem:[%s5450_s2 + $0x18] sm:$0xff]   ;;  %4043 = vmatprep.subr.bf16.mxu1 %v4269_v28  ;;  %vm5209_vm2 = vmand %vm374_vm13, %vm1811_vm6 }
 0x1f8   : > { %v1777_v43 = vpack.c.b16 %v1768_v38, %v1768_v38  ;;  %v1804_v44 = vpack.c.b16 %v1798_v39, %v1798_v39  ;;  %v2082_v40 = vsel %vm1755_vm3, %v2081_v34, %v2080_v32  ;;  %v2110_v45 = vsel %vm1791_vm5, %v2081_v34, %v2109_v41  ;;  %v4272_v39 = vld [vmem:[%s5450_s2 + $0x10] sm:$0xff]  }
 0x1f9   : > { %v2091_v47 = vpack.c.b16 %v2082_v40, %v2082_v40  ;;  %v2116_v49 = vpack.c.b16 %v2110_v45, %v2110_v45  ;;  %v2296_v61 = vshll.u32 %v4252_v55, 16  ;;  %v4412_v63 = vmov 1983009808   ;;  %4044 = vmatpush3.bf16.msra.mxu1 %v4270_v29 }
 0x1fa   : > { %1787 = vst.msk [vmem:[#allocation2 + $0x3c] sm:$0x3] %vm1784_vm7, %v1777_v43  ;;  %v1820_v52 = vsel %vm4901_vm9, %v1804_v44, %v1819_v16  ;;  %2258 = vrot.lane.b32.xlu1 %v4247_v50, %s4411_s27  ;;  %v2456_v0 = vunpack.c.l.s4 %v4412_v63  ;;  %v2365_v1 = vrot.slane %v2363_v58, 1  ;;  %v2368_v2 = vshrl.u32 %v4256_v53, 16  ;;  %v4273_v16 = vld [vmem:[%s5450_s2 + $0x48] sm:$0xff]  }
 0x1fb   : > { %1821 = vst [vmem:[#allocation2 + $0x38] sm:$0x7] %v1820_v52  ;;  %2100 = vst.msk [vmem:[#allocation2 + $0x1c] sm:$0x3] %vm1784_vm7, %v2091_v47  ;;  %v2130_v54 = vsel %vm4901_vm9, %v2116_v49, %v2129_v46  ;;  %v2372_v3 = vrot.slane %v2370_v59, 1  ;;  %v2384_v5 = vshll.u32 %v4258_v60, 16 }
 0x1fc   : > { %2131 = vst [vmem:[#allocation2 + $0x18] sm:$0x7] %v2130_v54  ;;  %v2298_v9 = vrot.slane %v2296_v61, 1  ;;  %v2457_v10 = vunpack.c.0.s8 %v2456_v0  ;;  %v2361_v12 = vshrl.u32 %v4255_v27, 16  ;;  %v2294_v13 = vshrl.u32 %v4252_v55, 16  ;;  %v4274_v46 = vld [vmem:[%s5450_s2 + $0x8] sm:$0xff]   ;;  %v2185_v54 = vpop.permute.xlu0 %2184 }
 0x1fd   : > { %v2386_v18 = vrot.slane %v2384_v5, 1  ;;  %v2382_v26 = vshrl.u32 %v4258_v60, 16  ;;  %v2373_v24 = vor.u32 %v2372_v3, %v2368_v2  ;;  %v4260_v49 = vld [vmem:[#allocation2 + $0x24] ss:$0 sps:$4 sm:$0x33]   ;;  %vm3183_vm3 = vcmask 392192  }
 0x1fe   : > { %v2366_v17 = vor.u32 %v2365_v1, %v2361_v12  ;;  %v2299_v19 = vor.u32 %v2298_v9, %v2294_v13  ;;  %v5078_v20 = vsub.s32 %v2457_v10, %v4851_v31  ;;  %v4271_v31 = vld [vmem:[%s5450_s2 + $0x50] sm:$0xff]   ;;  %v4276_v27 = vld [vmem:[%s5450_s2] sm:$0xff]   ;;  %v2152_v9 = vld [vmem:[#allocation2 + $0x2c] sm:$0x3]  ;;  %vm399_vm1 = vsmask.f32 7946 }
 0x1ff   : > { %v2387_v35 = vor.u32 %v2386_v18, %v2382_v26  ;;  %4045 = vmatprep.subr.bf16.mxu1 %v4271_v31  ;;  %v2136_v12 = vld [vmem:[#allocation2 + $0x8] sm:$0x3]  ;;  %vm5170_vm11 = vmand %vm398_vm15, %vm399_vm1  ;;  %vm3220_vm5 = vcmask 916480   ;;  %vm3237_vm6 = vcmask 654336  }
 0x200   : > { %v2468_v36 = vrot.slane %v2366_v17, %v5078_v20  ;;  %v2484_v41 = vrot.slane %v2373_v24, %v5078_v20  ;;  %4046 = vmatpush3.bf16.msra.mxu1 %v4272_v39  ;;  %v2233_v56 = vpop.permute.xlu0 %2232 }
 0x201   : > { %v2516_v40 = vrot.slane %v2387_v35, %v5078_v20  ;;  %4047 = vmatprep.subr.bf16.mxu1 %v4273_v16  ;;  %v2154_v29 = vld [vmem:[#allocation2 + $0x3c] sm:$0x3] }
 0x202   : > { %v4249_v7 = vld [vmem:[#allocation2 + $0x1c] ss:$0 sps:$4 sm:$0x33]   ;;  %v4251_v6 = vld [vmem:[#allocation2 + $0x38] ss:$0 sps:$4 sm:$0x77]   ;;  %v3932_v45 = vcombine.low %v2468_v36, %v2484_v41 }
 0x203   : > { %v4246_v4 = vld [vmem:[#allocation2 + $0x18] ss:$0 sps:$4 sm:$0x33]   ;;  %2190 = vrot.lane.b32.xlu1 %v4249_v7, %s4405_s22  ;;  %v2289_v14 = vshll.u32 %v4251_v6, 16  ;;  %v2287_v23 = vshrl.u32 %v4251_v6, 16 }
 0x204   : > { %2324 = vrot.lane.b32.xlu0 %v4246_v4, %s4406_s25  ;;  %v4248_v8 = vld [vmem:[#allocation2 + $0x38] ss:$0 sps:$4 sm:$0x33]   ;;  %v4254_v43 = vld [vmem:[#allocation2 + $0x1c] ss:$0 sps:$4 sm:$0x33]   ;;  %v2571_v50 = vrot.slane %v3932_v45, %v5078_v20  ;;  %4048 = vmatpush3.bf16.msra.mxu1 %v4274_v46 }
 0x205   : > { %v4257_v21 = vld [vmem:[#allocation2 + $0x18] ss:$0 sps:$4 sm:$0x77]   ;;  %v2291_v25 = vrot.slane %v2289_v14, 1  ;;  %4049 = vmatprep.subr.bf16.mxu1 %v4275_v15  ;;  %v2135_v7 = vld [vmem:[#allocation2] sm:$0x3] }
 0x206   : > { %v4259_v22 = vld [vmem:[#allocation2 + $0x18] ss:$0 sps:$4 sm:$0x77]   ;;  %v2377_v30 = vshll.u32 %v4257_v21, 16  ;;  %v2375_v51 = vshrl.u32 %v4257_v21, 16  ;;  %v2390_v13 = vsel %vm1127_vm8, %v2135_v7, %v2185_v54 }
 0x207   : > { %2306 = vrot.lane.b32.xlu1 %v2299_v19, %s4405_s22  ;;  %v2228_v33 = vshll.u32 %v4259_v22, 16  ;;  %v2292_v34 = vor.u32 %v2291_v25, %v2287_v23  ;;  %v2226_v11 = vshrl.u32 %v4259_v22, 16  ;;  %v2402_v23 = vsel %vm2400_vm10, %v2390_v13, %v2233_v56  ;;  %v407_v13 = vld [vmem:[#allocation3 + $0x8] sm:$0x4] }
 0x208   : > { %2256 = vrot.lane.b32.xlu0 %v4248_v8, %s4411_s27  ;;  %v2379_v37 = vrot.slane %v2377_v30, 1  ;;  %4050 = vmatpush3.bf16.msra.mxu1 %v4276_v27  ;;  %v2153_v8 = vld [vmem:[#allocation2 + $0x34] sm:$0x3] }
 0x209   : > { %v2230_v38 = vrot.slane %v2228_v33, 1 }
 0x20a   : > { %v2380_v32 = vor.u32 %v2379_v37, %v2375_v51  ;;  %v2138_v51 = vld [vmem:[#allocation2 + $0x18] sm:$0x3]  ;;  %v2155_v37 = vld [vmem:[#allocation2 + $0x44] sm:$0x3] }
 0x20b   : > { %v2231_v42 = vor.u32 %v2230_v38, %v2226_v11 }
 0x20c   : > { %2304 = vrot.lane.b32.xlu0 %v2292_v34, %s4405_s22  ;;  %v2500_v44 = vrot.slane %v2380_v32, %v5078_v20  ;;  %v2137_v34 = vld [vmem:[#allocation2 + $0x10] sm:$0x3] }
 0x20d   : > { %2238 = vrot.lane.b32.xlu1 %v2231_v42, %s4406_s25 }
 0x20e   : > { %v3934_v47 = vcombine.low %v2500_v44, %v2516_v40 }
 0x210   : > { %2344 = vrot.lane.b32.xlu0 %v4254_v43, %s4411_s27  ;;  %v2585_v52 = vrot.slane %v3934_v47, %v5078_v20 }
 0x211   : > { %2346 = vrot.lane.b32.xlu1 %v4260_v49, %s4411_s27 }
 0x212   : > { %v2588_v53 = vcombine.low %v2571_v50, %v2585_v52 }
 0x214   : > { %4101 = vmatmul.mubr.msk.bf16.vlgmr.msra.gmra.mxu0 %vm1127_vm8, %v2588_v53 }
 0x22b   : > { %v2343_v55 = vpop.permute.xlu1 %2342 }
 0x22c   : > { %v2189_v58 = vpop.permute.xlu0 %2188 }
 0x22d   : > { %v2396_v38 = vsel %vm1127_vm8, %v2137_v34, %v2189_v58 }
 0x22f   : > { %v2323_v57 = vpop.permute.xlu1 %2322 }
 0x233   : > { %v2255_v59 = vpop.permute.xlu1 %2254 }
 0x239   : > { %v2341_v60 = vpop.permute.xlu0 %2340 }
 0x23a   : > { %v2187_v61 = vpop.permute.xlu1 %2186 }
 0x23b   : > { %v2393_v14 = vsel %vm1127_vm8, %v2136_v12, %v2187_v61 }
 0x23d   : > { %v2321_v48 = vpop.permute.xlu0 %2320 }
 0x23e   : > { %v2303_v62 = vpop.permute.xlu1 %2302 }
 0x23f   : > { %v2423_v17 = vsel %vm1127_vm8, %v2153_v8, %v2303_v62  ;;  %v404_v8 = vld [vmem:[#allocation3 + $0x4] sm:$0x4] }
 0x240   : > { %v2433_v25 = vsel %vm2400_vm10, %v2423_v17, %v2323_v57  ;;  %v408_v17 = vsel %vm5170_vm11, 0, %v407_v13 }
 0x241   : > { %v2253_v63 = vpop.permute.xlu0 %2252  ;;  %v2441_v31 = vsel %vm2409_vm12, %v2433_v25, %v2343_v55  ;;  %409 = vst [vmem:[#allocation3 + $0x8] sm:$0x4] %v408_v17 }
 0x242   : > { %v2235_v0 = vpop.permute.xlu1 %2234  ;;  %v2411_v33 = vsel %vm2409_vm12, %v2402_v23, %v2253_v63 }
 0x243   : > { %v2404_v19 = vsel %vm2400_vm10, %v2393_v14, %v2235_v0  ;;  %v383_v0 = vld [vmem:[#allocation3 + $0x4] sm:$0x1]  ;;  %v405_v14 = vsel %vm5170_vm11, 0, %v404_v8 }
 0x244   : > { %v2413_v26 = vsel %vm2409_vm12, %v2404_v19, %v2255_v59  ;;  %v413_v19 = vld [vmem:[#allocation3 + $0x10] sm:$0x4]  ;;  %406 = vst [vmem:[#allocation3 + $0x4] sm:$0x4] %v405_v14 }
 0x245   : > { %v2237_v2 = vpop.permute.xlu0 %2236  ;;  %v2470_v35 = vcombine.low %v2413_v26, %v2441_v31 }
 0x246   : > { %v2406_v42 = vsel %vm2400_vm10, %v2396_v38, %v2237_v2 }
 0x247   : > { %v2477_v49 = vrot.slane %v2470_v35, %v5078_v20 }
 0x249   : > { %v2301_v4 = vpop.permute.xlu0 %2300 }
 0x24a   : > { %v2420_v6 = vsel %vm1127_vm8, %v2152_v9, %v2301_v4  ;;  %v389_v4 = vld [vmem:[#allocation3 + $0xc] sm:$0x1] }
 0x24b   : > { %v2431_v21 = vsel %vm2400_vm10, %v2420_v6, %v2321_v48  ;;  %v390_v9 = vsel %vm5156_vm0, 0, %v389_v4 }
 0x24c   : > { %v2439_v28 = vsel %vm2409_vm12, %v2431_v21, %v2341_v60  ;;  %391 = vst [vmem:[#allocation3 + $0xc] sm:$0x1] %v390_v9 }
 0x24d   : > { %v2454_v36 = vcombine.low %v2411_v33, %v2439_v28 }
 0x24f   : > { %v2461_v47 = vrot.slane %v2454_v36, %v5078_v20 }
 0x251   : > { %v3931_v55 = vcombine.low %v2461_v47, %v2477_v49 }
 0x253   : > { %v2564_v57 = vrot.slane %v3931_v55, %v5078_v20 }
 0x268   : > { %v2327_v1 = vpop.permute.xlu1 %2326 }
 0x26c   : > { %v2259_v3 = vpop.permute.xlu1 %2258 }
 0x275   : > { %v2191_v10 = vpop.permute.xlu1 %2190 }
 0x276   : > { %v2325_v5 = vpop.permute.xlu0 %2324  ;;  %v2399_v39 = vsel %vm1127_vm8, %v2138_v51, %v2191_v10  ;;  %v392_v10 = vld [vmem:[#allocation3 + $0x10] sm:$0x1] }
 0x277   : > { %v393_v6 = vsel %vm5156_vm0, 0, %v392_v10 }
 0x278   : > { %394 = vst [vmem:[#allocation3 + $0x10] sm:$0x1] %v393_v6 }
 0x279   : > { %v2307_v22 = vpop.permute.xlu1 %2306 }
 0x27a   : > { %v2257_v18 = vpop.permute.xlu0 %2256  ;;  %v2429_v16 = vsel %vm1127_vm8, %v2155_v37, %v2307_v22  ;;  %v414_v22 = vsel %vm5170_vm11, 0, %v413_v19 }
 0x27b   : > { %v2415_v40 = vsel %vm2409_vm12, %v2406_v42, %v2257_v18  ;;  %v2437_v46 = vsel %vm2400_vm10, %v2429_v16, %v2327_v1  ;;  %v4413_v1 = vmov 0   ;;  %v410_v18 = vld [vmem:[#allocation3 + $0xc] sm:$0x4]  ;;  %415 = vst [vmem:[#allocation3 + $0x10] sm:$0x4] %v414_v22 }
 0x27c   : > { %375 = vst.msk [vmem:[#allocation3] sm:$0x7] %vm374_vm13, %v4413_v1  ;;  %377 = vst.msk [vmem:[#allocation3 + $0x14] sm:$0x7] %vm374_vm13, %v4413_v1  ;;  %3632 = vmatprep.subr.bf16.mxu1 %v4413_v1  ;;  %v411_v21 = vsel %vm5170_vm11, 0, %v410_v18 }
 0x27d   : > { %412 = vst [vmem:[#allocation3 + $0xc] sm:$0x4] %v411_v21 }
 0x27e   : > { %v2305_v24 = vpop.permute.xlu0 %2304 }
 0x27f   : > { %v2426_v30 = vsel %vm1127_vm8, %v2154_v29, %v2305_v24  ;;  %v2239_v11 = vpop.permute.xlu1 %2238 }
 0x280   : > { %v2435_v32 = vsel %vm2400_vm10, %v2426_v30, %v2325_v5  ;;  %v2408_v44 = vsel %vm2400_vm10, %v2399_v39, %v2239_v11  ;;  %v384_v5 = vsel %vm5156_vm0, 0, %v383_v0 }
 0x281   : > { %v2417_v50 = vsel %vm2409_vm12, %v2408_v44, %v2259_v3  ;;  %v386_v3 = vld [vmem:[#allocation3 + $0x8] sm:$0x1]  ;;  %385 = vst [vmem:[#allocation3 + $0x4] sm:$0x1] %v384_v5 }
 0x282   : > { %v2345_v41 = vpop.permute.xlu0 %2344  ;;  %v387_v7 = vsel %vm5156_vm0, 0, %v386_v3  ;;  %v2895_v21 = vld [vmem:[#allocation3 + $0x10] sm:$0x7] }
 0x283   : > { %v2443_v43 = vsel %vm2409_vm12, %v2435_v32, %v2345_v41  ;;  %v2347_v15 = vpop.permute.xlu1 %2346  ;;  %388 = vst [vmem:[#allocation3 + $0x8] sm:$0x1] %v387_v7  ;;  %v416_v23 = vld [vmem:[#allocation3 + $0x14] sm:$0x4]  ;;  %v401_v26 = vld [vmem:[#allocation3] sm:$0x4] }
 0x284   : > { %v2486_v45 = vcombine.low %v2415_v40, %v2443_v43  ;;  %v2445_v52 = vsel %vm2409_vm12, %v2437_v46, %v2347_v15  ;;  %v417_v25 = vsel %vm5170_vm11, 0, %v416_v23  ;;  %v380_v28 = vld [vmem:[#allocation3] sm:$0x1]  ;;  %v402_v29 = vsel %vm5170_vm11, 0, %v401_v26  ;;  %v395_v30 = vld [vmem:[#allocation3 + $0x14] sm:$0x1] }
 0x285   : > { %v2502_v27 = vcombine.low %v2417_v50, %v2445_v52  ;;  %418 = vst [vmem:[#allocation3 + $0x14] sm:$0x4] %v417_v25  ;;  %v381_v24 = vsel %vm5156_vm0, 0, %v380_v28  ;;  %403 = vst [vmem:[#allocation3] sm:$0x4] %v402_v29  ;;  %v396_v33 = vsel %vm5156_vm0, 0, %v395_v30 }
 0x286   : > { %v2493_v53 = vrot.slane %v2486_v45, %v5078_v20  ;;  %382 = vst [vmem:[#allocation3] sm:$0x1] %v381_v24  ;;  %397 = vst [vmem:[#allocation3 + $0x14] sm:$0x1] %v396_v33  ;;  %v3954_v41 = vld [vmem:[%s5454_s6] ss:$0 sm:$0xff] }
 0x287   : > { %v2509_v54 = vrot.slane %v2502_v27, %v5078_v20  ;;  %v4277_v31 = vld [vmem:[#allocation3] ss:$0 sps:$4 sm:$0x66]   ;;  %v3955_v46 = vld [vmem:[%s5455_s7] ss:$0 sm:$0xff] }
 0x288   : > { %v2995_v35 = vrot.slane %v4277_v31, 1  ;;  %v2886_v6 = vld [vmem:[#allocation3 + $0x4] sm:$0x7]  ;;  %v2892_v17 = vld [vmem:[#allocation3 + $0xc] sm:$0x7] }
 0x289   : > { %v3933_v56 = vcombine.low %v2493_v53, %v2509_v54 }
 0x28a   : > { %2999 = vrot.lane.b32.xlu0 %v2995_v35, %s4411_s27  ;;  %v2889_v19 = vld [vmem:[#allocation3 + $0x8] sm:$0x7] }
 0x28b   : > { %v2578_v58 = vrot.slane %v3933_v56, %v5078_v20 }
 0x28d   : > { %v2587_v59 = vcombine.high %v2564_v57, %v2578_v58  ;;  %v2586_v60 = vcombine.low %v2564_v57, %v2578_v58  ;;  %v4278_v34 = vld [vmem:[#allocation3] ss:$0 sps:$4 sm:$0x77]   ;;  %v4279_v11 = vld [vmem:[#allocation3 + $0x14] ss:$0 sps:$4 sm:$0x33]  }
 0x28e   : > { %v2948_v36 = vshrl.u32 %v4278_v34, 16  ;;  %v2950_v51 = vshll.u32 %v4278_v34, 16  ;;  %3117 = vrot.lane.b32.xlu1 %v4279_v11, %s4405_s22 }
 0x28f   : > { %2734 = vmatprep.mubr.bf16.mxu1 %v2587_v59 }
 0x290   : > { %2735 = vmatmul.mubr.bf16.vlgmr.msra.gmra.mxu1 %v2586_v60  ;;  %v2952_v37 = vrot.slane %v2950_v51, 1 }
 0x292   : > { %v2953_v38 = vor.u32 %v2952_v37, %v2948_v36 }
 0x294   : > { %2975 = vrot.lane.b32.xlu0 %v2953_v38, %s4414_s26  ;;  %v4305_v38 = vld [vmem:[%s5451_s3 + $0xb8] sm:$0xff]  }
 0x295   : > { %3633 = vmatpush1.bf16.msra.mxu1 %v4305_v38 }
 0x296   : > { %3634 = vmatprep.subr.bf16.mxu1 %v4413_v1 }
 0x2d4   : > { %v5147_v61 = vpop.f32.mrf.mxu0 }
 0x2d6   : > { %v4102_v48 = vpop.f32.mrf.mxu0 }
 0x2d8   : > { %v5149_v62 = vpop.f32.mrf.mxu0 }
 0x2da   : > { %v4103_v63 = vpop.f32.mrf.mxu0 }
 0x350   : > { %v4051_v39 = vpop.f32.mrf.mxu1 }
 0x352   : > { %v4052_v16 = vpop.f32.mrf.mxu1 }
 0x353   : > { %v4053_v32 = vadd.f32 %v4052_v16, %v4051_v39  ;;  %v4306_v39 = vld [vmem:[%s5451_s3 + $0x78] sm:$0xff]   ;;  %v4307_v16 = vld [vmem:[%s5451_s3 + $0xb0] sm:$0xff]  }
 0x354   : > { %v4054_v42 = vpop.f32.mrf.mxu1  ;;  %4060 = vmatprep.subr.bf16.mxu0 %v4306_v39  ;;  %3635 = vmatpush1.bf16.msra.mxu1 %v4307_v16  ;;  %v4319_v39 = vld [vmem:[%s5451_s3 + $0x90] sm:$0xff]   ;;  %v4320_v16 = vld [vmem:[%s5451_s3 + $0x18] sm:$0xff]  }
 0x355   : > { %v2778_v43 = vadd.f32 %v4053_v32, %v5147_v61  ;;  %3636 = vmatprep.subr.bf16.mxu1 %v4413_v1 }
 0x356   : > { %v4055_v44 = vpop.f32.mrf.mxu1 }
 0x357   : > { %v2791_v40 = vmul.f32 %v3954_v41, %v2778_v43  ;;  %v4056_v45 = vadd.f32 %v4055_v44, %v4054_v42 }
 0x359   : > { %v2781_v15 = vadd.f32 %v4056_v45, %v5149_v62  ;;  %v2800_v47 = vadd.f32 %v3955_v46, %v2791_v40 }
 0x35b   : > { %v2792_v49 = vmul.f32 %v3954_v41, %v2781_v15  ;;  %v2802_v52 = vmax.f32 %v2800_v47, 0.0  ;;  %v4308_v41 = vld [vmem:[%s5451_s3 + $0x38] sm:$0xff]   ;;  %v4309_v15 = vld [vmem:[%s5451_s3 + $0x70] sm:$0xff]  }
 0x35c   : > { %4061 = vmatpush3.bf16.msra.mxu0 %v4308_v41 }
 0x35d   : > { %v2801_v50 = vadd.f32 %v3955_v46, %v2792_v49  ;;  %4062 = vmatprep.subr.bf16.mxu0 %v4309_v15 }
 0x35f   : > { %v2803_v27 = vmax.f32 %v2801_v50, 0.0 }
 0x361   : > { %v2804_v53 = vpack.c.bf16 %v2803_v27, %v2802_v52  ;;  %v3956_v54 = vpack.c.bf16 %v2803_v27, %v2803_v27 }
 0x363   : > { %v2813_v55 = vrot.slane %v2804_v53, %v5078_v20  ;;  %v2820_v56 = vrot.slane %v3956_v54, %v5078_v20 }
 0x365   : > { %v2821_v57 = vcombine.high %v2813_v55, %v2813_v55  ;;  %v2822_v58 = vcombine.high %v2820_v56, %v2820_v56  ;;  %v2829_v59 = vrot.slane %v2813_v55, %v5078_v20  ;;  %v2843_v60 = vrot.slane %v2820_v56, %v5078_v20 }
 0x367   : > { %v2836_v61 = vrot.slane %v2821_v57, %v5078_v20  ;;  %v2850_v48 = vrot.slane %v2822_v58, %v5078_v20  ;;  %v2852_v62 = vshrl.u32 %v2829_v59, 16  ;;  %v2866_v63 = vshrl.u32 %v2843_v60, 16 }
 0x368   : > { %v2855_v2 = vshll.u32 %v2829_v59, 16  ;;  %v2869_v9 = vshll.u32 %v2843_v60, 16 }
 0x369   : > { %v2854_v0 = vrot.slane %v2852_v62, 7  ;;  %v2859_v3 = vshrl.u32 %v2836_v61, 16  ;;  %v2873_v4 = vshrl.u32 %v2850_v48, 16  ;;  %v2862_v5 = vshll.u32 %v2836_v61, 16 }
 0x36a   : > { %v2868_v7 = vrot.slane %v2866_v63, 7  ;;  %v2876_v14 = vshll.u32 %v2850_v48, 16 }
 0x36b   : > { %v2857_v12 = vor.u32 %v2855_v2, %v2854_v0  ;;  %v2861_v8 = vrot.slane %v2859_v3, 7  ;;  %v2875_v13 = vrot.slane %v2873_v4, 7  ;;  %v4310_v2 = vld [vmem:[%s5451_s3 + $0xa8] sm:$0xff]   ;;  %v4311_v3 = vld [vmem:[%s5451_s3 + $0x30] sm:$0xff]  }
 0x36c   : > { %v2871_v18 = vor.u32 %v2869_v9, %v2868_v7  ;;  %v4312_v9 = vld [vmem:[%s5451_s3 + $0x68] sm:$0xff]   ;;  %3637 = vmatpush1.bf16.msra.mxu1 %v4310_v2  ;;  %4063 = vmatpush3.bf16.msra.mxu0 %v4311_v3  ;;  %v4335_v2 = vld [vmem:[%s5451_s3 + $0xc0] sm:$0xff]   ;;  %v3000_v3 = vpop.permute.xlu0 %2999 }
 0x36d   : > { %v2864_v22 = vor.u32 %v2862_v5, %v2861_v8  ;;  %v2878_v23 = vor.u32 %v2876_v14, %v2875_v13  ;;  %v2887_v25 = vsel %vm5209_vm2, %v2857_v12, %v2886_v6  ;;  %v4313_v8 = vld [vmem:[%s5451_s3 + $0xa0] sm:$0xff]   ;;  %v4314_v13 = vld [vmem:[%s5451_s3 + $0x28] sm:$0xff]   ;;  %3638 = vmatprep.subr.bf16.mxu1 %v4413_v1  ;;  %4064 = vmatprep.subr.bf16.mxu0 %v4312_v9 }
 0x36e   : > { %2888 = vst [vmem:[#allocation3 + $0x4] sm:$0x7] %v2887_v25  ;;  %v2893_v26 = vsel %vm5209_vm2, %v2871_v18, %v2892_v17  ;;  %v4315_v18 = vld [vmem:[%s5451_s3 + $0x60] sm:$0xff]  }
 0x36f   : > { %v2890_v28 = vsel %vm5209_vm2, %v2864_v22, %v2889_v19  ;;  %2894 = vst [vmem:[#allocation3 + $0xc] sm:$0x7] %v2893_v26  ;;  %v2896_v29 = vsel %vm5209_vm2, %v2878_v23, %v2895_v21 }
 0x370   : > { %2891 = vst [vmem:[#allocation3 + $0x8] sm:$0x7] %v2890_v28  ;;  %2897 = vst [vmem:[#allocation3 + $0x10] sm:$0x7] %v2896_v29  ;;  %3639 = vmatpush1.bf16.msra.mxu1 %v4313_v8  ;;  %4065 = vmatpush3.bf16.msra.mxu0 %v4314_v13 }
 0x371   : > { %3640 = vmatprep.subr.bf16.mxu1 %v4413_v1  ;;  %4066 = vmatprep.subr.bf16.mxu0 %v4315_v18 }
 0x375   : > { %v4281_v24 = vld [vmem:[#allocation3 + $0x4] ss:$0 sps:$4 sm:$0x33]  }
 0x376   : > { %v4280_v30 = vld [vmem:[#allocation3 + $0xc] ss:$0 sps:$4 sm:$0x33]   ;;  %3019 = vrot.lane.b32.xlu0 %v4281_v24, %s4401_s29  ;;  %v4283_v31 = vld [vmem:[#allocation3 + $0x4] ss:$0 sps:$4 sm:$0x66]  }
 0x377   : > { %v4282_v33 = vld [vmem:[#allocation3 + $0xc] ss:$0 sps:$4 sm:$0x33]   ;;  %3113 = vrot.lane.b32.xlu1 %v4280_v30, %s4405_s22  ;;  %v4284_v34 = vld [vmem:[#allocation3 + $0x4] ss:$0 sps:$4 sm:$0x66]  }
 0x378   : > { %v2996_v35 = vrot.slane %v4283_v31, 1  ;;  %v4285_v36 = vld [vmem:[#allocation3 + $0xc] ss:$0 sps:$4 sm:$0x66]   ;;  %v3087_v51 = vrot.slane %v4284_v34, 1  ;;  %v4317_v30 = vld [vmem:[%s5451_s3 + $0x20] sm:$0xff]  }
 0x379   : > { %v4286_v37 = vld [vmem:[#allocation3 + $0xc] ss:$0 sps:$4 sm:$0x66]   ;;  %v2998_v11 = vrot.slane %v4285_v36, 1  ;;  %4067 = vmatpush3.bf16.msra.mxu0 %v4317_v30 }
 0x37a   : > { %3023 = vrot.lane.b32.xlu0 %v4282_v33, %s4401_s29  ;;  %v3089_v32 = vrot.slane %v4286_v37, 1  ;;  %v4287_v42 = vld [vmem:[#allocation3 + $0x8] ss:$0 sps:$4 sm:$0x33]  }
 0x37b   : > { %3001 = vrot.lane.b32.xlu1 %v2996_v35, %s4411_s27  ;;  %v4288_v43 = vld [vmem:[#allocation3 + $0x8] ss:$0 sps:$4 sm:$0x33]   ;;  %v4289_v44 = vld [vmem:[#allocation3 + $0x10] ss:$0 sps:$4 sm:$0x33]  }
 0x37c   : > { %v4291_v40 = vld [vmem:[#allocation3 + $0x8] ss:$0 sps:$4 sm:$0x66]   ;;  %v4295_v45 = vld [vmem:[#allocation3 + $0x4] ss:$0 sps:$4 sm:$0x77]  }
 0x37d   : > { %v4294_v46 = vld [vmem:[#allocation3 + $0x4] ss:$0 sps:$4 sm:$0x77]   ;;  %v4290_v47 = vld [vmem:[#allocation3 + $0x10] ss:$0 sps:$4 sm:$0x33]  }
 0x37e   : > { %3091 = vrot.lane.b32.xlu0 %v3087_v51, %s4415_s28  ;;  %v4292_v49 = vld [vmem:[#allocation3 + $0x10] ss:$0 sps:$4 sm:$0x66]   ;;  %v4293_v50 = vld [vmem:[#allocation3 + $0x8] ss:$0 sps:$4 sm:$0x66]  }
 0x37f   : > { %3005 = vrot.lane.b32.xlu1 %v2998_v11, %s4411_s27  ;;  %v4297_v52 = vld [vmem:[#allocation3 + $0xc] ss:$0 sps:$4 sm:$0x77]   ;;  %v3042_v27 = vshll.u32 %v4295_v45, 16  ;;  %v3088_v53 = vrot.slane %v4291_v40, 1  ;;  %v2957_v54 = vshll.u32 %v4294_v46, 16 }
 0x380   : > { %v4296_v55 = vld [vmem:[#allocation3 + $0xc] ss:$0 sps:$4 sm:$0x77]   ;;  %v5249_v56 = vld [vmem:[#allocation3 + $0x8] ss:$0 sps:$4 sm:$0x77]  }
 0x381   : > { %v3056_v57 = vshll.u32 %v4297_v52, 16  ;;  %v4299_v58 = vld [vmem:[#allocation3 + $0x8] ss:$0 sps:$4 sm:$0x77]   ;;  %v2997_v59 = vrot.slane %v4293_v50, 1  ;;  %v3044_v60 = vrot.slane %v3042_v27, 1 }
 0x382   : > { %3095 = vrot.lane.b32.xlu0 %v3089_v32, %s4415_s28  ;;  %v3090_v61 = vrot.slane %v4292_v49, 1  ;;  %v2959_v48 = vrot.slane %v2957_v54, 1  ;;  %v2971_v62 = vshll.u32 %v4296_v55, 16  ;;  %v3040_v63 = vshrl.u32 %v4295_v45, 16  ;;  %v4316_v24 = vld [vmem:[%s5451_s3 + $0x98] sm:$0xff]   ;;  %v4324_v49 = vld [vmem:[%s5451_s3 + $0x10] sm:$0xff]  }
 0x383   : > { %3021 = vrot.lane.b32.xlu1 %v4287_v42, %s4401_s29  ;;  %v3049_v0 = vshll.u32 %v5249_v56, 16  ;;  %v2955_v4 = vshrl.u32 %v4294_v46, 16  ;;  %v3058_v5 = vrot.slane %v3056_v57, 1  ;;  %v5261_v7 = vld [vmem:[#allocation3 + $0x10] ss:$0 sps:$4 sm:$0x77]   ;;  %3641 = vmatpush1.bf16.msra.mxu1 %v4316_v24 }
 0x384   : > { %v3045_v10 = vor.u32 %v3044_v60, %v3040_v63  ;;  %v2964_v6 = vshll.u32 %v4299_v58, 16  ;;  %v4301_v12 = vld [vmem:[#allocation3 + $0x8] ss:$0 sps:$4 sm:$0x77]   ;;  %v2973_v17 = vrot.slane %v2971_v62, 1  ;;  %v2969_v19 = vshrl.u32 %v4296_v55, 16  ;;  %3642 = vmatprep.subr.bf16.mxu1 %v4413_v1 }
 0x385   : > { %v2960_v14 = vor.u32 %v2959_v48, %v2955_v4  ;;  %v3054_v21 = vshrl.u32 %v4297_v52, 16  ;;  %v3051_v22 = vrot.slane %v3049_v0, 1  ;;  %v3063_v23 = vshll.u32 %v5261_v7, 16  ;;  %v4303_v25 = vld [vmem:[#allocation3 + $0x10] ss:$0 sps:$4 sm:$0x77]   ;;  %v2976_v4 = vpop.permute.xlu0 %2975 }
 0x386   : > { %3111 = vrot.lane.b32.xlu0 %v4288_v43, %s4405_s22  ;;  %v2966_v28 = vrot.slane %v2964_v6, 1  ;;  %v3134_v29 = vshll.u32 %v4301_v12, 16  ;;  %v2974_v33 = vor.u32 %v2973_v17, %v2969_v19  ;;  %v4302_v31 = vld [vmem:[#allocation3 + $0xc] ss:$0 sps:$4 sm:$0x77]   ;;  %v2962_v35 = vshrl.u32 %v4299_v58, 16 }
 0x387   : > { %3025 = vrot.lane.b32.xlu1 %v4289_v44, %s4401_s29  ;;  %v3059_v26 = vor.u32 %v3058_v5, %v3054_v21  ;;  %v4318_v34 = vld [vmem:[%s5451_s3 + $0x58] sm:$0xff]   ;;  %v3047_v36 = vshrl.u32 %v5249_v56, 16  ;;  %v4304_v51 = vld [vmem:[#allocation3 + $0x14] ss:$0 sps:$4 sm:$0x77]   ;;  %v3148_v38 = vshll.u32 %v4303_v25, 16  ;;  %3643 = vmatpush1.bf16.msra.mxu1 %v4319_v39  ;;  %v5341_v5 = vpop.permute.xlu1 %3117 }
 0x388   : > { %v2967_v37 = vor.u32 %v2966_v28, %v2962_v35  ;;  %v3136_v11 = vrot.slane %v3134_v29, 1  ;;  %v3065_v41 = vrot.slane %v3063_v23, 1  ;;  %v3141_v42 = vshll.u32 %v4302_v31, 16  ;;  %4068 = vmatprep.subr.bf16.mxu0 %v4318_v34  ;;  %v4322_v43 = vld [vmem:[%s5451_s3 + $0x50] sm:$0xff]   ;;  %3644 = vmatprep.subr.bf16.mxu1 %v4413_v1  ;;  %v4327_v27 = vld [vmem:[%s5451_s3 + $0x48] sm:$0xff]   ;;  %s4416_s29 = smov 80  }
 0x389   : > { %v3052_v32 = vor.u32 %v3051_v22, %v3047_v36  ;;  %v3132_v44 = vshrl.u32 %v4301_v12, 16  ;;  %v3061_v40 = vshrl.u32 %v5261_v7, 16  ;;  %v3155_v45 = vshll.u32 %v4304_v51, 16  ;;  %4069 = vmatpush3.bf16.msra.mxu0 %v4320_v16  ;;  %v4328_v58 = vld [vmem:[%s5451_s3 + $0x80] sm:$0xff]   ;;  %v4332_v62 = vld [vmem:[%s5451_s3 + $0xd0] sm:$0xff]   ;;  %v4334_v0 = vld [vmem:[%s5451_s3 + $0xc8] sm:$0xff]  }
 0x38a   : > { %3115 = vrot.lane.b32.xlu0 %v4290_v47, %s4405_s22  ;;  %v3150_v15 = vrot.slane %v3148_v38, 1  ;;  %v4323_v47 = vld [vmem:[%s5451_s3 + $0x88] sm:$0xff]   ;;  %v3143_v52 = vrot.slane %v3141_v42, 1  ;;  %4070 = vmatprep.subr.bf16.mxu0 %v4322_v43  ;;  %v3139_v54 = vshrl.u32 %v4302_v31, 16  ;;  %v3153_v55 = vshrl.u32 %v4304_v51, 16  ;;  %v4333_v63 = vld [vmem:[%s5451_s3] sm:$0xff]   ;;  %s5405_s22 = scalar_lea.hbm %s5457_s9, %s4027_s16 }
 0x38b   : > { %3093 = vrot.lane.b32.xlu1 %v3088_v53, %s4415_s28  ;;  %v3137_v46 = vor.u32 %v3136_v11, %v3132_v44  ;;  %v3066_v50 = vor.u32 %v3065_v41, %v3061_v40  ;;  %v3146_v53 = vshrl.u32 %v4303_v25, 16  ;;  %v3157_v56 = vrot.slane %v3155_v45, 1  ;;  %3645 = vmatpush1.bf16.msra.mxu1 %v4323_v47  ;;  %v2898_v28 = vld [vmem:[#allocation3] sm:$0x3]  ;;  %v2900_v36 = vld [vmem:[#allocation3 + $0x8] sm:$0x3] }
 0x38c   : > { %v3144_v60 = vor.u32 %v3143_v52, %v3139_v54  ;;  %3646 = vmatprep.subr.bf16.mxu1 %v4413_v1  ;;  %v3186_v31 = vsel %vm3183_vm3, %v2898_v28, %v2976_v4  ;;  %v2901_v44 = vld [vmem:[#allocation3 + $0xc] sm:$0x3] }
 0x38d   : > { %v3151_v57 = vor.u32 %v3150_v15, %v3146_v53  ;;  %4071 = vmatpush3.bf16.msra.mxu0 %v4324_v49  ;;  %v3158_v48 = vor.u32 %v3157_v56, %v3153_v55  ;;  %v3197_v42 = vsel %vm2409_vm12, %v3186_v31, %v3000_v3  ;;  %v4321_v49 = vld [vmem:[#allocation3 + $0x8] ss:$0 sps:$4 sm:$0x66]   ;;  %v4325_v54 = vld [vmem:[#allocation3 + $0xc] ss:$0 sps:$4 sm:$0x66]  }
 0x38e   : > { %3003 = vrot.lane.b32.xlu0 %v2997_v59, %s4411_s27  ;;  %v4329_v59 = vld [vmem:[%s5451_s3 + $0x8] sm:$0xff]   ;;  %4072 = vmatprep.subr.bf16.mxu0 %v4327_v27 }
 0x38f   : > { %3097 = vrot.lane.b32.xlu1 %v3090_v61, %s4415_s28  ;;  %v4331_v61 = vld [vmem:[%s5451_s3 + $0x40] sm:$0xff]   ;;  %3647 = vmatpush1.bf16.msra.mxu1 %v4328_v58 }
 0x390   : > { %3658 = vmatprep.subr.bf16.mxu1 %v4413_v1 }
 0x391   : > { %4073 = vmatpush3.bf16.msra.mxu0 %v4329_v59 }
 0x392   : > { %3067 = vrot.lane.b32.xlu0 %v3045_v10, %s4406_s25  ;;  %4074 = vmatprep.subr.bf16.mxu0 %v4331_v61  ;;  %v4330_v61 = vld [vmem:[#allocation3 + $0x14] ss:$0 sps:$4 sm:$0x66]  }
 0x393   : > { %2977 = vrot.lane.b32.xlu1 %v2960_v14, %s4414_s26  ;;  %3659 = vmatpush2.bf16.msra.mxu1 %v4332_v62 }
 0x394   : > { %3660 = vmatprep.subr.bf16.mxu1 %v4413_v1 }
 0x395   : > { %4075 = vmatpush3.bf16.msra.mxu0 %v4333_v63  ;;  %v3179_v63 = vrot.slane %v4321_v49, 1 }
 0x396   : > { %3071 = vrot.lane.b32.xlu0 %v3059_v26, %s4406_s25 }
 0x397   : > { %2981 = vrot.lane.b32.xlu1 %v2974_v33, %s4414_s26  ;;  %3661 = vmatpush2.bf16.msra.mxu1 %v4334_v0  ;;  %v2899_v33 = vld [vmem:[#allocation3 + $0x4] sm:$0x3] }
 0x398   : > { %3662 = vmatprep.subr.bf16.mxu1 %v4413_v1 }
 0x39a   : > { %2979 = vrot.lane.b32.xlu0 %v2967_v37, %s4414_s26 }
 0x39b   : > { %3069 = vrot.lane.b32.xlu1 %v3052_v32, %s4406_s25  ;;  %3663 = vmatpush2.bf16.msra.mxu1 %v4335_v2 }
 0x39e   : > { %3159 = vrot.lane.b32.xlu0 %v3137_v46, %s4416_s29 }
 0x39f   : > { %3073 = vrot.lane.b32.xlu1 %v3066_v50, %s4406_s25 }
 0x3a2   : > { %3163 = vrot.lane.b32.xlu0 %v3151_v57, %s4416_s29 }
 0x3a3   : > { %3161 = vrot.lane.b32.xlu1 %v3144_v60, %s4416_s29  ;;  %v4326_v60 = vld [vmem:[#allocation3 + $0x10] ss:$0 sps:$4 sm:$0x66]  }
 0x3a7   : > { %3165 = vrot.lane.b32.xlu1 %v3158_v48, %s4416_s29  ;;  %s323_s29 = sand.u32 1, %s4388_s10  }
 0x3a8   : > { %s3764_s27 = sshll.u32 %s323_s29, 4  ;;  %s3685_s13 = scalar_lea.sflag [#allocation5], %s323_s29 }
 0x3a9   : > { %s325_s14 = scalar_lea.vmem [#allocation4], %s3764_s27  ;;  %s4342_s27 = scalar_lea.vmem %s4341_s21, 512 }
 0x3aa   : > { %s3698_s26 = sshll.u32 %s325_s14, 4  ;;  %s5399_s26 = int_to_ptr.vmem [resolvable:$true] %s3698_s26 }
 0x3ab   : > { %s4336_s24 = scalar_lea.vmem %s5399_s26, 256  ;;  %p4343_p0 = scmp.lt.s32.totalorder %s5399_s26, %s4341_s21 }
 0x3ac   : > { %p4337_p11 = scmp.ne.s32.totalorder %s5399_s26, %s4336_s24  ;;  %p4344_p1 = scmp.lt.s32.totalorder %s4342_s27, %s4336_s24 }
 0x3ae   : > { %p4338_p12 = pnand %p4337_p11, %p4506_p5  ;;  %p4345_p2 = por %p4344_p1, %p4343_p0 }
 0x3b0   : > { %p4339_p13 = pneg %p4338_p12 }
 0x3b2   : > { %p4346_p3 = pnand %p4345_p2, %p4339_p13 }
 0x3e8   : > { %v3020_v7 = vpop.permute.xlu0 %3019 }
 0x3e9   : > { %v5343_v9 = vpop.permute.xlu1 %3113  ;;  %v3205_v29 = vsel %vm1059_vm4, %v3000_v3, %v3020_v7 }
 0x3ec   : > { %v3024_v10 = vpop.permute.xlu0 %3023 }
 0x3ed   : > { %v3002_v6 = vpop.permute.xlu1 %3001 }
 0x3f0   : > { %v3092_v12 = vpop.permute.xlu0 %3091 }
 0x3f1   : > { %v3006_v8 = vpop.permute.xlu1 %3005 }
 0x3f4   : > { %v3096_v13 = vpop.permute.xlu0 %3095 }
 0x3f5   : > { %v3022_v14 = vpop.permute.xlu1 %3021 }
 0x3f6   : > { %v3207_v37 = vsel %vm1059_vm4, %v3002_v6, %v3022_v14 }
 0x3f8   : > { %v3112_v17 = vpop.permute.xlu0 %3111 }
 0x3f9   : > { %v3026_v18 = vpop.permute.xlu1 %3025  ;;  %v3230_v57 = vsel %vm1127_vm8, %v3092_v12, %v3112_v17 }
 0x3fa   : > { %v3211_v52 = vsel %vm1059_vm4, %v3006_v8, %v3026_v18 }
 0x3fc   : > { %v3116_v19 = vpop.permute.xlu0 %3115 }
 0x3fd   : > { %v3094_v21 = vpop.permute.xlu1 %3093  ;;  %v3234_v4 = vsel %vm1127_vm8, %v3096_v13, %v3116_v19 }
 0x3fe   : > { %v3232_v3 = vsel %vm1127_vm8, %v3094_v21, %v5343_v9 }
 0x400   : > { %v3004_v22 = vpop.permute.xlu0 %3003 }
 0x401   : > { %v5345_v1 = vpop.permute.xlu1 %3097  ;;  %v3209_v34 = vsel %vm1059_vm4, %v3004_v22, %v3024_v10  ;;  %v3180_v10 = vrot.slane %v4325_v54, 1  ;;  %vm3679_vm4 = vcmask 388096  }
 0x402   : > { %v3236_v9 = vsel %vm1127_vm8, %v5345_v1, %v5341_v5 }
 0x404   : > { %v3068_v23 = vpop.permute.xlu0 %3067 }
 0x405   : > { %v2978_v25 = vpop.permute.xlu1 %2977  ;;  %v3213_v30 = vsel %vm2400_vm10, %v3205_v29, %v3068_v23  ;;  %v3181_v23 = vrot.slane %v4326_v60, 1 }
 0x406   : > { %v3189_v35 = vsel %vm3183_vm3, %v2899_v33, %v2978_v25  ;;  %v3222_v11 = vsel %vm3220_vm5, %v3213_v30, %v3092_v12  ;;  %v3182_v25 = vrot.slane %v4330_v61, 1 }
 0x407   : > { %v3199_v43 = vsel %vm2409_vm12, %v3189_v35, %v3002_v6  ;;  %v3258_v45 = vcombine.low %v3197_v42, %v3222_v11 }
 0x408   : > { %v3072_v26 = vpop.permute.xlu0 %3071 }
 0x409   : > { %v2982_v24 = vpop.permute.xlu1 %2981  ;;  %v3217_v38 = vsel %vm2400_vm10, %v3209_v34, %v3072_v26  ;;  %v3266_v48 = vrot.slane %v3258_v45, %v5078_v20 }
 0x40a   : > { %v3195_v46 = vsel %vm3183_vm3, %v2901_v44, %v2982_v24  ;;  %v3226_v15 = vsel %vm3220_vm5, %v3217_v38, %v3096_v13 }
 0x40b   : > { %v3203_v58 = vsel %vm2409_vm12, %v3195_v46, %v3006_v8 }
 0x40c   : > { %v2980_v51 = vpop.permute.xlu0 %2979 }
 0x40d   : > { %v3070_v39 = vpop.permute.xlu1 %3069  ;;  %v3192_v16 = vsel %vm3183_vm3, %v2900_v36, %v2980_v51 }
 0x40e   : > { %v3215_v32 = vsel %vm2400_vm10, %v3207_v37, %v3070_v39  ;;  %v3201_v41 = vsel %vm2409_vm12, %v3192_v16, %v3004_v22 }
 0x40f   : > { %v3224_v40 = vsel %vm3220_vm5, %v3215_v32, %v3094_v21  ;;  %v3292_v27 = vcombine.low %v3201_v41, %v3226_v15  ;;  %v3989_v32 = vld [vmem:[%s5456_s8] ss:$0 sm:$0xff] }
 0x410   : > { %v3275_v47 = vcombine.low %v3199_v43, %v3224_v40  ;;  %v3160_v50 = vpop.permute.xlu0 %3159 }
 0x411   : > { %v3074_v53 = vpop.permute.xlu1 %3073  ;;  %v3239_v0 = vsel %vm3237_vm6, %v3230_v57, %v3160_v50  ;;  %v3300_v7 = vrot.slane %v3292_v27, %v5078_v20 }
 0x412   : > { %v3283_v55 = vrot.slane %v3275_v47, %v5078_v20  ;;  %v3219_v56 = vsel %vm2400_vm10, %v3211_v52, %v3074_v53  ;;  %v3259_v18 = vcombine.low %v3239_v0, %v3179_v63 }
 0x413   : > { %v3228_v59 = vsel %vm3220_vm5, %v3219_v56, %v5345_v1 }
 0x414   : > { %v3309_v62 = vcombine.low %v3203_v58, %v3228_v59  ;;  %v3164_v2 = vpop.permute.xlu0 %3163  ;;  %v3990_v17 = vcombine.low %v3266_v48, %v3283_v55  ;;  %v3273_v30 = vrot.slane %v3259_v18, %v5078_v20 }
 0x415   : > { %v3162_v6 = vpop.permute.xlu1 %3161  ;;  %v3243_v14 = vsel %vm3237_vm6, %v3234_v4, %v3164_v2 }
 0x416   : > { %v3317_v12 = vrot.slane %v3309_v62, %v5078_v20  ;;  %v3241_v8 = vsel %vm3237_vm6, %v3232_v3, %v3162_v6  ;;  %v3293_v19 = vcombine.low %v3243_v14, %v3181_v23  ;;  %v3397_v29 = vrot.slane %v3990_v17, %v5078_v20 }
 0x417   : > { %v3276_v22 = vcombine.low %v3241_v8, %v3180_v10 }
 0x418   : > { %v3992_v26 = vcombine.low %v3300_v7, %v3317_v12  ;;  %v3307_v36 = vrot.slane %v3293_v19, %v5078_v20 }
 0x419   : > { %v3290_v13 = vrot.slane %v3276_v22, %v5078_v20  ;;  %v3166_v21 = vpop.permute.xlu1 %3165 }
 0x41a   : > { %v3245_v28 = vsel %vm3237_vm6, %v3236_v9, %v3166_v21  ;;  %v3411_v24 = vrot.slane %v3992_v26, %v5078_v20 }
 0x41b   : > { %v3310_v33 = vcombine.low %v3245_v28, %v3182_v25  ;;  %v3991_v35 = vcombine.low %v3273_v30, %v3290_v13 }
 0x41c   : > { %v3420_v31 = vcombine.high %v3397_v29, %v3411_v24  ;;  %v3419_v34 = vcombine.low %v3397_v29, %v3411_v24 }
 0x41d   : > { %v3324_v5 = vrot.slane %v3310_v33, %v5078_v20  ;;  %v3404_v51 = vrot.slane %v3991_v35, %v5078_v20 }
 0x41e   : > { %3623 = vmatprep.mubr.bf16.mxu0 %v3420_v31 }
 0x41f   : > { %v3993_v1 = vcombine.low %v3307_v36, %v3324_v5  ;;  %3624 = vmatmul.mubr.bf16.vlgmr.msra.gmra.mxu0 %v3419_v34 }
 0x421   : > { %v3418_v37 = vrot.slane %v3993_v1, %v5078_v20 }
 0x423   : > { %v3422_v11 = vcombine.high %v3404_v51, %v3418_v37  ;;  %v3421_v38 = vcombine.low %v3404_v51, %v3418_v37 }
 0x425   : > { %4021 = vmatprep.mubr.msk.bf16.mxu1 %vm3183_vm3, %v3422_v11 }
 0x426   : > { %3665 = vmatmul.mubr.bf16.vlgmr.msra.gmra.mxu1 %v3421_v38 }
 0x4df   : > { %v4076_v39 = vpop.f32.mrf.mxu0 }
 0x4e1   : > { %v4077_v16 = vpop.f32.mrf.mxu0 }
 0x4e2   : > { %v4078_v41 = vadd.f32 %v4077_v16, %v4076_v39 }
 0x4e3   : > { %v4079_v42 = vpop.f32.mrf.mxu0 }
 0x4e4   : > { %v3626_v43 = vadd.f32 %v4078_v41, %v3989_v32 }
 0x4e5   : > { %v4080_v44 = vpop.f32.mrf.mxu0 }
 0x4e6   : > { %v4081_v40 = vadd.f32 %v4080_v44, %v4079_v42  ;;  %v3666_v20 = vpop.f32.mrf.mxu1 }
 0x4e7   : > { %v3667_v45 = vadd.f32 %v3666_v20, %v3626_v43 }
 0x4e8   : > { %v3668_v46 = vpop.f32.mrf.mxu1  ;;  %v3629_v15 = vadd.f32 %v4081_v40, %v3989_v32 }
 0x4e9   : > { %v3675_v47 = vcombine.high %v3667_v45, %v3667_v45  ;;  %3680 = vst.msk [vmem:[%s325_s14] sm:$0xf] %vm3679_vm4, %v3667_v45 }
 0x4ea   : > { %v3669_v49 = vpop.f32.mrf.mxu1 }
 0x4eb   : > { %3681 = vst.msk [vmem:[%s325_s14 + $0x4] sm:$0xf] %vm3679_vm4, %v3675_v47  ;;  %v3670_v50 = vadd.f32 %v3669_v49, %v3629_v15 }
 0x4ec   : > { %v3671_v52 = vpop.f32.mrf.mxu1 }
 0x4ed   : > { %v3676_v27 = vcombine.high %v3670_v50, %v3670_v50  ;;  %3682 = vst.msk [vmem:[%s325_s14 + $0x8] sm:$0xf] %vm3679_vm4, %v3670_v50 }
 0x4ef   : > { %3683 = vst.msk [vmem:[%s325_s14 + $0xc] sm:$0xf] %vm3679_vm4, %v3676_v27 }
 0x4f0   : > { %4349 = shalt.err (!%p4346_p3)
}
 0x4f1   : > { %s4350_s14 = scalar_lea.hbm %s5405_s22, 256  ;;  %s4354_s28 = scalar_lea.hbm %s5457_s9, 512 }
 0x4f2   : > { %p4351_p4 = scmp.ne.s32.totalorder %s5405_s22, %s4350_s14  ;;  %p4355_p9 = scmp.lt.s32.totalorder %s5405_s22, %s5457_s9 }
 0x4f3   : > { %p4356_p10 = scmp.lt.s32.totalorder %s4354_s28, %s4350_s14 }
 0x4f4   : > { %p4352_p7 = pnand %p4351_p4, %p4506_p5 }
 0x4f5   : > { %p4357_p11 = por %p4356_p10, %p4355_p9 }
 0x4f6   : > { %p4353_p8 = pneg %p4352_p7 }
 0x4f8   : > { %p4358_p12 = pnand %p4357_p11, %p4353_p8 }
 0x4fa   : > { %4361 = shalt.err (!%p4358_p12)
}
 0x4fb   : > { %s5471_s24 = smov 4  }
 0x4fc   : > { %4106 = dma.vmem_to_hbm [thread:$0]  (%p4506_p5), %s5399_s26, 256, %s5405_s22, %s3685_s13, %s4406_s25, %s4406_s25, %s5471_s24  }
 0x4fd PF: > { %p4112_p13 = scmp.ge.s32.totalorder %s4396_s12, 2  ;;  %s3713_s21 = sand.u32 1, %s4384_s30  }
 0x4fe   : > { %s3714_s27 = scalar_lea.sflag [#allocation5], %s3713_s21 }
 0x4ff   : > { %p4109_p0 = pnand %p4112_p13, %p4510_p6 }
 0x501   : > { %p4110_p1 = pneg %p4109_p0 }
 0x503   : > { %4379 = dma.done.wait (%p4110_p1), %s3714_s27, 256  }
 0x504   : > { %4381 = vsyncadd (%p4110_p1), %s3714_s27, 4294967040  ;;  %p19_p2 = scmp.ge.s32.totalorder %s4493_s15, 4   ;;  %s5472_s30 = smov %s4388_s10 }
 0x505   : > { %s5473_s10 = smov %s4392_s11  ;;  %s5474_s11 = smov %s4504_s18 }
 0x506   : > { %s5475_s12 = smov %s4493_s15  ;;  %21 = sbr.rel (!%p19_p2) target bundleno = 3 (0x3), region = 104 }
 0x50b   :  { %3719 = vsyncpa [#allocation5], 1 }
 0x50c   :  { %3721 = vsyncpa [#allocation5 + $0x1], 1 }

// kernel: _patch_embedding_forward_unfused.3
= control target key start
LH: loop header
LB: loop body
LE: loop exit
PB: predicated region body
PF: predicated region fallthrough
CT: control target
= control target key end

     0   :  { %vm90_vm0 = vcmask 1042432   ;;  %vm41_vm1 = vcmask 220160   ;;  %s500_s1 = inlined_call_operand.vmem [shape: f32[27,128], index: 1, kind: input, shape index: {}]   ;;  %s501_s0 = inlined_call_operand.vmem [shape: f32[128,27], index: 0, kind: input, shape index: {}]   ;;  %s502_s2 = inlined_call_operand.vmem [shape: f32[1,128], index: 2, kind: input, shape index: {}]   ;;  %s503_s3 = inlined_call_operand.vmem [shape: f32[128,128], index: 3, kind: output, shape index: {}]  }
   0x1   :  { %v33_v0 = vld [vmem:[%s500_s1 + $0x18] sm:$0x7]  ;;  %v32_v1 = vld [vmem:[%s500_s1 + $0x10] sm:$0xff]  ;;  %v31_v2 = vld [vmem:[%s500_s1 + $0x8] sm:$0xff] }
   0x2   :  { %313 = vmatprep.subr.msk.mxu0 %vm90_vm0, %v33_v0  ;;  %345 = vmatprep.subr.msk.mxu1 %vm90_vm0, %v33_v0  ;;  %v30_v3 = vld [vmem:[%s500_s1] sm:$0xff]  ;;  %v15_v6 = vld [vmem:[%s501_s0 + $0x8] sm:$0xff]  ;;  %v16_v8 = vld [vmem:[%s501_s0 + $0x10] sm:$0xff] }
   0x3   :  { %314 = vmatpush3.msk.msra.mxu0 %vm90_vm0, %v33_v0  ;;  %349 = vmatpush3.msk.msra.mxu1 %vm90_vm0, %v33_v0  ;;  %v14_v4 = vld [vmem:[%s501_s0] sm:$0xff]  ;;  %v23_v7 = vld [vmem:[%s501_s0 + $0x48] sm:$0xff]  ;;  %v24_v9 = vld [vmem:[%s501_s0 + $0x50] sm:$0xff] }
   0x4   :  { %315 = vmatprep.subr.mxu0 %v32_v1  ;;  %346 = vmatprep.subr.mxu1 %v32_v1  ;;  %v22_v5 = vld [vmem:[%s501_s0 + $0x40] sm:$0xff]  ;;  %v17_v10 = vld [vmem:[%s501_s0 + $0x18] sm:$0xff]  ;;  %v19_v14 = vld [vmem:[%s501_s0 + $0x28] sm:$0xff] }
   0x5   :  { %316 = vmatpush3.msra.mxu0 %v32_v1  ;;  %350 = vmatpush3.msra.mxu1 %v32_v1  ;;  %v25_v11 = vld [vmem:[%s501_s0 + $0x58] sm:$0xff]  ;;  %v18_v12 = vld [vmem:[%s501_s0 + $0x20] sm:$0xff]  ;;  %v27_v15 = vld [vmem:[%s501_s0 + $0x68] sm:$0xff] }
   0x6   :  { %317 = vmatprep.subr.mxu0 %v31_v2  ;;  %347 = vmatprep.subr.mxu1 %v31_v2  ;;  %v26_v13 = vld [vmem:[%s501_s0 + $0x60] sm:$0xff]  ;;  %v20_v16 = vld [vmem:[%s501_s0 + $0x30] sm:$0xff]  ;;  %v21_v18 = vld [vmem:[%s501_s0 + $0x38] sm:$0xff] }
   0x7   :  { %318 = vmatpush3.msra.mxu0 %v31_v2  ;;  %351 = vmatpush3.msra.mxu1 %v31_v2  ;;  %v28_v17 = vld [vmem:[%s501_s0 + $0x70] sm:$0xff]  ;;  %v29_v19 = vld [vmem:[%s501_s0 + $0x78] sm:$0xff]  ;;  %v275_v20 = vld [vmem:[%s502_s2] ss:$0 sm:$0xff] }
   0x8   :  { %319 = vmatprep.subr.mxu0 %v30_v3  ;;  %348 = vmatprep.subr.mxu1 %v30_v3 }
   0x9   :  { %320 = vmatpush3.msra.mxu0 %v30_v3  ;;  %352 = vmatpush3.msra.mxu1 %v30_v3 }
   0xa   :  { %321 = vmatprep.mubr.msk.f32.mxu0 %vm41_vm1, %v14_v4  ;;  %333 = vmatprep.mubr.msk.f32.mxu1 %vm41_vm1, %v22_v5 }
   0xb   :  { %322 = vmatmul.mubr.msk.f32.vlgmr.msra.gmra.mxu0 %vm41_vm1, %v15_v6  ;;  %334 = vmatmul.mubr.msk.f32.vlgmr.msra.gmra.mxu1 %vm41_vm1, %v23_v7 }
   0xc   :  { %324 = vmatprep.mubr.msk.f32.mxu0 %vm41_vm1, %v16_v8  ;;  %336 = vmatprep.mubr.msk.f32.mxu1 %vm41_vm1, %v24_v9 }
   0xf   :  { %325 = vmatmul.mubr.msk.f32.gmra.mxu0 %vm41_vm1, %v17_v10  ;;  %337 = vmatmul.mubr.msk.f32.gmra.mxu1 %vm41_vm1, %v25_v11 }
  0x10   :  { %327 = vmatprep.mubr.msk.f32.mxu0 %vm41_vm1, %v18_v12  ;;  %339 = vmatprep.mubr.msk.f32.mxu1 %vm41_vm1, %v26_v13 }
  0x13   :  { %328 = vmatmul.mubr.msk.f32.gmra.mxu0 %vm41_vm1, %v19_v14  ;;  %340 = vmatmul.mubr.msk.f32.gmra.mxu1 %vm41_vm1, %v27_v15 }
  0x14   :  { %330 = vmatprep.mubr.msk.f32.mxu0 %vm41_vm1, %v20_v16  ;;  %342 = vmatprep.mubr.msk.f32.mxu1 %vm41_vm1, %v28_v17 }
  0x17   :  { %331 = vmatmul.mubr.msk.f32.gmra.mxu0 %vm41_vm1, %v21_v18  ;;  %343 = vmatmul.mubr.msk.f32.gmra.mxu1 %vm41_vm1, %v29_v19 }
  0xcb   :  { %v323_v21 = vpop.f32.mrf.mxu0  ;;  %v335_v22 = vpop.f32.mrf.mxu1 }
  0xcc   :  { %v166_v23 = vadd.f32 %v323_v21, %v275_v20  ;;  %v206_v24 = vadd.f32 %v335_v22, %v275_v20 }
  0xcd   :  { %v160_v25 = vpop.f32.mrf.mxu0  ;;  %v200_v26 = vpop.f32.mrf.mxu1 }
  0xce   :  { %v240_v27 = vmax.f32 %v166_v23, 0.0  ;;  %v248_v28 = vmax.f32 %v206_v24, 0.0  ;;  %v161_v29 = vadd.f32 %v275_v20, %v160_v25  ;;  %v201_v30 = vadd.f32 %v275_v20, %v200_v26 }
  0xcf   :  { %v326_v31 = vpop.f32.mrf.mxu0  ;;  %v338_v32 = vpop.f32.mrf.mxu1 }
  0xd0   :  { %256 = vst [vmem:[%s503_s3 + $0x8] sm:$0xff] %v240_v27  ;;  %264 = vst [vmem:[%s503_s3 + $0x48] sm:$0xff] %v248_v28  ;;  %v239_v33 = vmax.f32 %v161_v29, 0.0  ;;  %v247_v34 = vmax.f32 %v201_v30, 0.0  ;;  %v176_v35 = vadd.f32 %v326_v31, %v275_v20  ;;  %v216_v36 = vadd.f32 %v338_v32, %v275_v20 }
  0xd1   :  { %v170_v37 = vpop.f32.mrf.mxu0  ;;  %v210_v38 = vpop.f32.mrf.mxu1 }
  0xd2   :  { %255 = vst [vmem:[%s503_s3] sm:$0xff] %v239_v33  ;;  %263 = vst [vmem:[%s503_s3 + $0x40] sm:$0xff] %v247_v34  ;;  %v242_v39 = vmax.f32 %v176_v35, 0.0  ;;  %v250_v40 = vmax.f32 %v216_v36, 0.0  ;;  %v171_v41 = vadd.f32 %v275_v20, %v170_v37  ;;  %v211_v42 = vadd.f32 %v275_v20, %v210_v38 }
  0xd3   :  { %v329_v43 = vpop.f32.mrf.mxu0  ;;  %v341_v44 = vpop.f32.mrf.mxu1 }
  0xd4   :  { %258 = vst [vmem:[%s503_s3 + $0x18] sm:$0xff] %v242_v39  ;;  %266 = vst [vmem:[%s503_s3 + $0x58] sm:$0xff] %v250_v40  ;;  %v241_v45 = vmax.f32 %v171_v41, 0.0  ;;  %v249_v46 = vmax.f32 %v211_v42, 0.0  ;;  %v186_v47 = vadd.f32 %v329_v43, %v275_v20  ;;  %v226_v48 = vadd.f32 %v341_v44, %v275_v20 }
  0xd5   :  { %v180_v49 = vpop.f32.mrf.mxu0  ;;  %v220_v50 = vpop.f32.mrf.mxu1 }
  0xd6   :  { %257 = vst [vmem:[%s503_s3 + $0x10] sm:$0xff] %v241_v45  ;;  %265 = vst [vmem:[%s503_s3 + $0x50] sm:$0xff] %v249_v46  ;;  %v244_v51 = vmax.f32 %v186_v47, 0.0  ;;  %v252_v52 = vmax.f32 %v226_v48, 0.0  ;;  %v181_v53 = vadd.f32 %v275_v20, %v180_v49  ;;  %v221_v54 = vadd.f32 %v275_v20, %v220_v50 }
  0xd7   :  { %v332_v55 = vpop.f32.mrf.mxu0  ;;  %v344_v56 = vpop.f32.mrf.mxu1 }
  0xd8   :  { %260 = vst [vmem:[%s503_s3 + $0x28] sm:$0xff] %v244_v51  ;;  %268 = vst [vmem:[%s503_s3 + $0x68] sm:$0xff] %v252_v52  ;;  %v243_v57 = vmax.f32 %v181_v53, 0.0  ;;  %v251_v58 = vmax.f32 %v221_v54, 0.0  ;;  %v196_v59 = vadd.f32 %v332_v55, %v275_v20  ;;  %v236_v60 = vadd.f32 %v344_v56, %v275_v20 }
  0xd9   :  { %v190_v61 = vpop.f32.mrf.mxu0  ;;  %v230_v62 = vpop.f32.mrf.mxu1 }
  0xda   :  { %259 = vst [vmem:[%s503_s3 + $0x20] sm:$0xff] %v243_v57  ;;  %267 = vst [vmem:[%s503_s3 + $0x60] sm:$0xff] %v251_v58  ;;  %v246_v63 = vmax.f32 %v196_v59, 0.0  ;;  %v254_v0 = vmax.f32 %v236_v60, 0.0  ;;  %v191_v1 = vadd.f32 %v275_v20, %v190_v61  ;;  %v231_v2 = vadd.f32 %v275_v20, %v230_v62 }
  0xdc   :  { %262 = vst [vmem:[%s503_s3 + $0x38] sm:$0xff] %v246_v63  ;;  %270 = vst [vmem:[%s503_s3 + $0x78] sm:$0xff] %v254_v0  ;;  %v245_v3 = vmax.f32 %v191_v1, 0.0  ;;  %v253_v4 = vmax.f32 %v231_v2, 0.0 }
  0xde   :  { %261 = vst [vmem:[%s503_s3 + $0x30] sm:$0xff] %v245_v3  ;;  %269 = vst [vmem:[%s503_s3 + $0x70] sm:$0xff] %v253_v4 }

// kernel: _patch_embedding_forward_unfused.4
= control target key start
LH: loop header
LB: loop body
LE: loop exit
PB: predicated region body
PF: predicated region fallthrough
CT: control target
= control target key end

     0   :  { %vm69_vm0 = vcmask 261120   ;;  %s518_s1 = inlined_call_operand.vmem [shape: f32[288,128], index: 1, kind: input, shape index: {}]   ;;  %s519_s0 = inlined_call_operand.vmem [shape: f32[32,288], index: 0, kind: input, shape index: {}]   ;;  %s520_s2 = inlined_call_operand.vmem [shape: f32[1,128], index: 2, kind: input, shape index: {}]   ;;  %s521_s3 = inlined_call_operand.vmem [shape: f32[32,128], index: 3, kind: output, shape index: {}]  }
   0x1   :  { %v57_v0 = vld [vmem:[%s518_s1 + $0xf8] sm:$0xff]  ;;  %v56_v2 = vld [vmem:[%s518_s1 + $0xf0] sm:$0xff]  ;;  %v55_v4 = vld [vmem:[%s518_s1 + $0xe8] sm:$0xff] }
   0x2   :  { %v41_v1 = vld [vmem:[%s518_s1 + $0x78] sm:$0xff]  ;;  %269 = vmatprep.subr.mxu0 %v57_v0  ;;  %v40_v3 = vld [vmem:[%s518_s1 + $0x70] sm:$0xff]  ;;  %v39_v5 = vld [vmem:[%s518_s1 + $0x68] sm:$0xff] }
   0x3   :  { %270 = vmatpush3.msra.mxu0 %v41_v1  ;;  %v54_v6 = vld [vmem:[%s518_s1 + $0xe0] sm:$0xff]  ;;  %v53_v8 = vld [vmem:[%s518_s1 + $0xd8] sm:$0xff]  ;;  %v52_v10 = vld [vmem:[%s518_s1 + $0xd0] sm:$0xff] }
   0x4   :  { %271 = vmatprep.subr.mxu0 %v56_v2  ;;  %v38_v7 = vld [vmem:[%s518_s1 + $0x60] sm:$0xff]  ;;  %v37_v9 = vld [vmem:[%s518_s1 + $0x58] sm:$0xff]  ;;  %v36_v11 = vld [vmem:[%s518_s1 + $0x50] sm:$0xff] }
   0x5   :  { %272 = vmatpush3.msra.mxu0 %v40_v3  ;;  %v61_v12 = vld [vmem:[%s518_s1 + $0x118] sm:$0xff]  ;;  %v51_v13 = vld [vmem:[%s518_s1 + $0xc8] sm:$0xff]  ;;  %v60_v14 = vld [vmem:[%s518_s1 + $0x110] sm:$0xff] }
   0x6   :  { %273 = vmatprep.subr.mxu0 %v55_v4  ;;  %321 = vmatprep.subr.mxu1 %v61_v12  ;;  %v35_v15 = vld [vmem:[%s518_s1 + $0x48] sm:$0xff]  ;;  %v50_v17 = vld [vmem:[%s518_s1 + $0xc0] sm:$0xff]  ;;  %v49_v20 = vld [vmem:[%s518_s1 + $0xb8] sm:$0xff] }
   0x7   :  { %274 = vmatpush3.msra.mxu0 %v39_v5  ;;  %322 = vmatpush3.msra.mxu1 %v61_v12  ;;  %v15_v16 = vld [vmem:[%s519_s0 + $0x8] sm:$0xff]  ;;  %v34_v19 = vld [vmem:[%s518_s1 + $0x40] sm:$0xff]  ;;  %v33_v22 = vld [vmem:[%s518_s1 + $0x38] sm:$0xff] }
   0x8   :  { %275 = vmatprep.subr.mxu0 %v54_v6  ;;  %323 = vmatprep.subr.mxu1 %v60_v14  ;;  %v59_v18 = vld [vmem:[%s518_s1 + $0x108] sm:$0xff]  ;;  %v58_v21 = vld [vmem:[%s518_s1 + $0x100] sm:$0xff]  ;;  %v48_v23 = vld [vmem:[%s518_s1 + $0xb0] sm:$0xff] }
   0x9   :  { %276 = vmatpush3.msra.mxu0 %v38_v7  ;;  %146 = vmatprep.mubr.f32.mxu0 %v15_v16  ;;  %v16_v24 = vld [vmem:[%s519_s0 + $0x10] sm:$0xff]  ;;  %v19_v26 = vld [vmem:[%s519_s0 + $0x28] sm:$0xff]  ;;  %v22_v28 = vld [vmem:[%s519_s0 + $0x40] sm:$0xff] }
   0xa   :  { %277 = vmatprep.subr.mxu0 %v53_v8  ;;  %324 = vmatpush3.msra.mxu1 %v60_v14  ;;  %v32_v25 = vld [vmem:[%s518_s1 + $0x30] sm:$0xff]  ;;  %v47_v27 = vld [vmem:[%s518_s1 + $0xa8] sm:$0xff]  ;;  %v46_v30 = vld [vmem:[%s518_s1 + $0xa0] sm:$0xff] }
   0xb   :  { %278 = vmatpush3.msra.mxu0 %v37_v9  ;;  %325 = vmatprep.subr.mxu1 %v59_v18  ;;  %v31_v29 = vld [vmem:[%s518_s1 + $0x28] sm:$0xff]  ;;  %v30_v31 = vld [vmem:[%s518_s1 + $0x20] sm:$0xff]  ;;  %v25_v32 = vld [vmem:[%s519_s0 + $0x58] sm:$0xff] }
   0xc   :  { %279 = vmatprep.subr.mxu0 %v52_v10  ;;  %326 = vmatpush3.msra.mxu1 %v59_v18  ;;  %v45_v33 = vld [vmem:[%s518_s1 + $0x98] sm:$0xff]  ;;  %v44_v35 = vld [vmem:[%s518_s1 + $0x90] sm:$0xff]  ;;  %v43_v37 = vld [vmem:[%s518_s1 + $0x88] sm:$0xff] }
   0xd   :  { %280 = vmatpush3.msra.mxu0 %v36_v11  ;;  %327 = vmatprep.subr.mxu1 %v58_v21  ;;  %v29_v34 = vld [vmem:[%s518_s1 + $0x18] sm:$0xff]  ;;  %v28_v36 = vld [vmem:[%s518_s1 + $0x10] sm:$0xff]  ;;  %v27_v38 = vld [vmem:[%s518_s1 + $0x8] sm:$0xff] }
   0xe   :  { %281 = vmatprep.subr.mxu0 %v51_v13  ;;  %328 = vmatpush3.msra.mxu1 %v58_v21  ;;  %v42_v39 = vld [vmem:[%s518_s1 + $0x80] sm:$0xff]  ;;  %v17_v43 = vld [vmem:[%s519_s0 + $0x18] sm:$0xff]  ;;  %v20_v45 = vld [vmem:[%s519_s0 + $0x30] sm:$0xff] }
   0xf   :  { %282 = vmatpush3.msra.mxu0 %v35_v15  ;;  %329 = vmatprep.mubr.msk.f32.mxu1 %vm69_vm0, %v16_v24  ;;  %v26_v40 = vld [vmem:[%s518_s1] sm:$0xff]  ;;  %v21_v44 = vld [vmem:[%s519_s0 + $0x38] sm:$0xff]  ;;  %v24_v46 = vld [vmem:[%s519_s0 + $0x50] sm:$0xff] }
  0x10   :  { %283 = vmatprep.subr.mxu0 %v50_v17  ;;  %330 = vmatmul.mubr.msk.f32.vlgmr.msra.gmra.mxu1 %vm69_vm0, %v19_v26  ;;  %v14_v41 = vld [vmem:[%s519_s0] sm:$0xff]  ;;  %v23_v47 = vld [vmem:[%s519_s0 + $0x48] sm:$0xff] }
  0x11   :  { %284 = vmatpush3.msra.mxu0 %v34_v19  ;;  %332 = vmatprep.mubr.msk.f32.mxu1 %vm69_vm0, %v22_v28  ;;  %v18_v42 = vld [vmem:[%s519_s0 + $0x20] sm:$0xff] }
  0x12   :  { %285 = vmatprep.subr.mxu0 %v49_v20  ;;  %v264_v51 = vld [vmem:[%s520_s2] ss:$0 sm:$0xff] }
  0x13   :  { %286 = vmatpush3.msra.mxu0 %v33_v22 }
  0x14   :  { %287 = vmatprep.subr.mxu0 %v48_v23  ;;  %333 = vmatmul.mubr.msk.f32.gmra.mxu1 %vm69_vm0, %v25_v32 }
  0x15   :  { %288 = vmatpush3.msra.mxu0 %v32_v25 }
  0x16   :  { %289 = vmatprep.subr.mxu0 %v47_v27 }
  0x17   :  { %290 = vmatpush3.msra.mxu0 %v31_v29 }
  0x18   :  { %291 = vmatprep.subr.mxu0 %v46_v30 }
  0x19   :  { %292 = vmatpush3.msra.mxu0 %v30_v31 }
  0x1a   :  { %293 = vmatprep.subr.mxu0 %v45_v33 }
  0x1b   :  { %294 = vmatpush3.msra.mxu0 %v29_v34 }
  0x1c   :  { %295 = vmatprep.subr.mxu0 %v44_v35 }
  0x1d   :  { %296 = vmatpush3.msra.mxu0 %v28_v36 }
  0x1e   :  { %297 = vmatprep.subr.mxu0 %v43_v37 }
  0x1f   :  { %298 = vmatpush3.msra.mxu0 %v27_v38 }
  0x20   :  { %299 = vmatprep.subr.mxu0 %v42_v39 }
  0x21   :  { %300 = vmatpush3.msra.mxu0 %v26_v40 }
  0x22   :  { %147 = vmatmul.mubr.f32.vlgmr.msra.gmra.mxu0 %v14_v41 }
  0x23   :  { %151 = vmatprep.mubr.f32.mxu0 %v18_v42 }
  0x26   :  { %152 = vmatmul.mubr.f32.gmra.mxu0 %v17_v43 }
  0x27   :  { %156 = vmatprep.mubr.f32.mxu0 %v21_v44 }
  0x2a   :  { %157 = vmatmul.mubr.f32.gmra.mxu0 %v20_v45 }
  0x2b   :  { %161 = vmatprep.mubr.f32.mxu0 %v24_v46 }
  0x2e   :  { %162 = vmatmul.mubr.f32.gmra.mxu0 %v23_v47 }
  0xd0   :  { %v331_v49 = vpop.f32.mrf.mxu1 }
  0xd2   :  { %v233_v54 = vpop.f32.mrf.mxu1 }
  0xd4   :  { %v334_v60 = vpop.f32.mrf.mxu1 }
  0xd6   :  { %v243_v3 = vpop.f32.mrf.mxu1 }
  0xe2   :  { %v301_v48 = vpop.f32.mrf.mxu0 }
  0xe4   :  { %v302_v50 = vpop.f32.mrf.mxu0 }
  0xe5   :  { %v303_v52 = vadd.f32 %v302_v50, %v301_v48 }
  0xe6   :  { %v304_v53 = vpop.f32.mrf.mxu0 }
  0xe7   :  { %v149_v55 = vadd.f32 %v303_v52, %v264_v51 }
  0xe8   :  { %v305_v56 = vpop.f32.mrf.mxu0 }
  0xe9   :  { %v306_v57 = vadd.f32 %v305_v56, %v304_v53  ;;  %v234_v58 = vadd.f32 %v233_v54, %v149_v55 }
  0xea   :  { %v307_v59 = vpop.f32.mrf.mxu0 }
  0xeb   :  { %v154_v61 = vadd.f32 %v306_v57, %v264_v51  ;;  %v252_v62 = vmax.f32 %v234_v58, 0.0 }
  0xec   :  { %v308_v63 = vpop.f32.mrf.mxu0 }
  0xed   :  { %v239_v0 = vadd.f32 %v331_v49, %v154_v61  ;;  %256 = vst [vmem:[%s521_s3] sm:$0xff] %v252_v62  ;;  %v309_v1 = vadd.f32 %v308_v63, %v307_v59 }
  0xee   :  { %v310_v2 = vpop.f32.mrf.mxu0 }
  0xef   :  { %v253_v4 = vmax.f32 %v239_v0, 0.0  ;;  %v159_v5 = vadd.f32 %v309_v1, %v264_v51 }
  0xf0   :  { %v311_v6 = vpop.f32.mrf.mxu0 }
  0xf1   :  { %257 = vst [vmem:[%s521_s3 + $0x8] sm:$0xff] %v253_v4  ;;  %v312_v7 = vadd.f32 %v311_v6, %v310_v2  ;;  %v244_v8 = vadd.f32 %v243_v3, %v159_v5 }
  0xf3   :  { %v164_v9 = vadd.f32 %v312_v7, %v264_v51  ;;  %v254_v10 = vmax.f32 %v244_v8, 0.0 }
  0xf5   :  { %v249_v11 = vadd.f32 %v334_v60, %v164_v9  ;;  %258 = vst [vmem:[%s521_s3 + $0x10] sm:$0xff] %v254_v10 }
  0xf7   :  { %v255_v12 = vmax.f32 %v249_v11, 0.0 }
  0xf9   :  { %259 = vst [vmem:[%s521_s3 + $0x18] sm:$0xff] %v255_v12 }

// kernel: _patch_embedding_forward_unfused.5
= control target key start
LH: loop header
LB: loop body
LE: loop exit
PB: predicated region body
PF: predicated region fallthrough
CT: control target
= control target key end

     0   :  { %v370_v2 = vmov 0.0   ;;  %s636_s0 = inlined_call_operand.vmem [shape: f32[32,432], index: 0, kind: input, shape index: {}]   ;;  %s637_s1 = inlined_call_operand.vmem [shape: f32[432,128], index: 1, kind: input, shape index: {}]   ;;  %s638_s2 = inlined_call_operand.vmem [shape: f32[1,128], index: 2, kind: input, shape index: {}]   ;;  %s639_s3 = inlined_call_operand.hbm [shape: f32[32,128], index: 3, kind: output, shape index: {}]  }
   0x1   :  { %v78_v0 = vld [vmem:[%s637_s1 + $0x178] sm:$0xff]  ;;  %190 = vmatprep.subr.mxu1 %v370_v2  ;;  %v77_v3 = vld [vmem:[%s637_s1 + $0x170] sm:$0xff]  ;;  %v60_v7 = vld [vmem:[%s637_s1 + $0xe8] sm:$0xff] }
   0x2   :  { %v62_v1 = vld [vmem:[%s637_s1 + $0xf8] sm:$0xff]  ;;  %v61_v5 = vld [vmem:[%s637_s1 + $0xf0] sm:$0xff]  ;;  %191 = vmatpush1.msra.mxu1 %v78_v0  ;;  %v76_v8 = vld [vmem:[%s637_s1 + $0x168] sm:$0xff] }
   0x3   :  { %300 = vmatprep.subr.mxu0 %v62_v1  ;;  %v46_v4 = vld [vmem:[%s637_s1 + $0x78] sm:$0xff]  ;;  %v45_v6 = vld [vmem:[%s637_s1 + $0x70] sm:$0xff]  ;;  %192 = vmatprep.subr.mxu1 %v370_v2  ;;  %v44_v9 = vld [vmem:[%s637_s1 + $0x68] sm:$0xff] }
   0x4   :  { %301 = vmatpush3.msra.mxu0 %v46_v4  ;;  %193 = vmatpush1.msra.mxu1 %v77_v3  ;;  %v59_v10 = vld [vmem:[%s637_s1 + $0xe0] sm:$0xff]  ;;  %v58_v13 = vld [vmem:[%s637_s1 + $0xd8] sm:$0xff]  ;;  %v57_v16 = vld [vmem:[%s637_s1 + $0xd0] sm:$0xff] }
   0x5   :  { %302 = vmatprep.subr.mxu0 %v61_v5  ;;  %194 = vmatprep.subr.mxu1 %v370_v2  ;;  %v75_v11 = vld [vmem:[%s637_s1 + $0x160] sm:$0xff]  ;;  %v74_v14 = vld [vmem:[%s637_s1 + $0x158] sm:$0xff]  ;;  %v73_v17 = vld [vmem:[%s637_s1 + $0x150] sm:$0xff] }
   0x6   :  { %303 = vmatpush3.msra.mxu0 %v45_v6  ;;  %v43_v12 = vld [vmem:[%s637_s1 + $0x60] sm:$0xff]  ;;  %195 = vmatpush1.msra.mxu1 %v76_v8  ;;  %v42_v15 = vld [vmem:[%s637_s1 + $0x58] sm:$0xff]  ;;  %v41_v18 = vld [vmem:[%s637_s1 + $0x50] sm:$0xff] }
   0x7   :  { %304 = vmatprep.subr.mxu0 %v60_v7  ;;  %196 = vmatprep.subr.mxu1 %v370_v2  ;;  %v56_v19 = vld [vmem:[%s637_s1 + $0xc8] sm:$0xff]  ;;  %v55_v22 = vld [vmem:[%s637_s1 + $0xc0] sm:$0xff]  ;;  %v54_v25 = vld [vmem:[%s637_s1 + $0xb8] sm:$0xff] }
   0x8   :  { %305 = vmatpush3.msra.mxu0 %v44_v9  ;;  %197 = vmatpush1.msra.mxu1 %v75_v11  ;;  %v72_v20 = vld [vmem:[%s637_s1 + $0x148] sm:$0xff]  ;;  %v71_v23 = vld [vmem:[%s637_s1 + $0x140] sm:$0xff]  ;;  %v70_v26 = vld [vmem:[%s637_s1 + $0x138] sm:$0xff] }
   0x9   :  { %306 = vmatprep.subr.mxu0 %v59_v10  ;;  %198 = vmatprep.subr.mxu1 %v370_v2  ;;  %v40_v21 = vld [vmem:[%s637_s1 + $0x48] sm:$0xff]  ;;  %v39_v24 = vld [vmem:[%s637_s1 + $0x40] sm:$0xff]  ;;  %v38_v27 = vld [vmem:[%s637_s1 + $0x38] sm:$0xff] }
   0xa   :  { %307 = vmatpush3.msra.mxu0 %v43_v12  ;;  %199 = vmatpush1.msra.mxu1 %v74_v14  ;;  %v53_v28 = vld [vmem:[%s637_s1 + $0xb0] sm:$0xff]  ;;  %v52_v31 = vld [vmem:[%s637_s1 + $0xa8] sm:$0xff]  ;;  %v51_v34 = vld [vmem:[%s637_s1 + $0xa0] sm:$0xff] }
   0xb   :  { %308 = vmatprep.subr.mxu0 %v58_v13  ;;  %200 = vmatprep.subr.mxu1 %v370_v2  ;;  %v69_v29 = vld [vmem:[%s637_s1 + $0x130] sm:$0xff]  ;;  %v68_v32 = vld [vmem:[%s637_s1 + $0x128] sm:$0xff]  ;;  %v67_v35 = vld [vmem:[%s637_s1 + $0x120] sm:$0xff] }
   0xc   :  { %309 = vmatpush3.msra.mxu0 %v42_v15  ;;  %201 = vmatpush1.msra.mxu1 %v73_v17  ;;  %v37_v30 = vld [vmem:[%s637_s1 + $0x30] sm:$0xff]  ;;  %v36_v33 = vld [vmem:[%s637_s1 + $0x28] sm:$0xff]  ;;  %v35_v36 = vld [vmem:[%s637_s1 + $0x20] sm:$0xff] }
   0xd   :  { %310 = vmatprep.subr.mxu0 %v57_v16  ;;  %202 = vmatprep.subr.mxu1 %v370_v2  ;;  %v50_v37 = vld [vmem:[%s637_s1 + $0x98] sm:$0xff] }
   0xe   :  { %311 = vmatpush3.msra.mxu0 %v41_v18  ;;  %203 = vmatpush1.msra.mxu1 %v72_v20  ;;  %v66_v38 = vld [vmem:[%s637_s1 + $0x118] sm:$0xff] }
   0xf   :  { %312 = vmatprep.subr.mxu0 %v56_v19  ;;  %204 = vmatprep.subr.mxu1 %v370_v2  ;;  %v34_v39 = vld [vmem:[%s637_s1 + $0x18] sm:$0xff] }
  0x10   :  { %313 = vmatpush3.msra.mxu0 %v40_v21  ;;  %205 = vmatpush1.msra.mxu1 %v71_v23 }
  0x11   :  { %314 = vmatprep.subr.mxu0 %v55_v22  ;;  %206 = vmatprep.subr.mxu1 %v370_v2 }
  0x12   :  { %315 = vmatpush3.msra.mxu0 %v39_v24  ;;  %207 = vmatpush1.msra.mxu1 %v70_v26 }
  0x13   :  { %316 = vmatprep.subr.mxu0 %v54_v25  ;;  %208 = vmatprep.subr.mxu1 %v370_v2 }
  0x14   :  { %317 = vmatpush3.msra.mxu0 %v38_v27  ;;  %209 = vmatpush1.msra.mxu1 %v69_v29 }
  0x15   :  { %318 = vmatprep.subr.mxu0 %v53_v28  ;;  %210 = vmatprep.subr.mxu1 %v370_v2 }
  0x16   :  { %319 = vmatpush3.msra.mxu0 %v37_v30  ;;  %211 = vmatpush1.msra.mxu1 %v68_v32 }
  0x17   :  { %320 = vmatprep.subr.mxu0 %v52_v31  ;;  %212 = vmatprep.subr.mxu1 %v370_v2 }
  0x18   :  { %321 = vmatpush3.msra.mxu0 %v36_v33 }
  0x19   :  { %322 = vmatprep.subr.mxu0 %v51_v34 }
  0x1a   :  { %8 = vsyncpa [#allocation3], 0  ;;  %213 = vmatpush1.msra.mxu1 %v67_v35  ;;  %323 = vmatpush3.msra.mxu0 %v35_v36  ;;  %v49_v40 = vld [vmem:[%s637_s1 + $0x90] sm:$0xff]  ;;  %v48_v43 = vld [vmem:[%s637_s1 + $0x88] sm:$0xff]  ;;  %vm92_vm0 = vcmask 392192  }
  0x1b   :  { %214 = vmatprep.subr.mxu1 %v370_v2  ;;  %v65_v41 = vld [vmem:[%s637_s1 + $0x110] sm:$0xff]  ;;  %324 = vmatprep.subr.mxu0 %v50_v37  ;;  %v64_v44 = vld [vmem:[%s637_s1 + $0x108] sm:$0xff]  ;;  %v47_v46 = vld [vmem:[%s637_s1 + $0x80] sm:$0xff] }
  0x1c   :  { %v33_v42 = vld [vmem:[%s637_s1 + $0x10] sm:$0xff]  ;;  %215 = vmatpush1.msra.mxu1 %v66_v38  ;;  %325 = vmatpush3.msra.mxu0 %v34_v39  ;;  %v32_v45 = vld [vmem:[%s637_s1 + $0x8] sm:$0xff]  ;;  %v63_v47 = vld [vmem:[%s637_s1 + $0x100] sm:$0xff] }
  0x1d   :  { %216 = vmatprep.subr.mxu1 %v370_v2  ;;  %326 = vmatprep.subr.mxu0 %v49_v40  ;;  %v31_v48 = vld [vmem:[%s637_s1] sm:$0xff]  ;;  %v16_v49 = vld [vmem:[%s636_s0 + $0x8] sm:$0xff]  ;;  %v18_v54 = vld [vmem:[%s636_s0 + $0x18] sm:$0xff] }
  0x1e   :  { %217 = vmatpush1.msra.mxu1 %v65_v41  ;;  %327 = vmatpush3.msra.mxu0 %v33_v42  ;;  %v84_v50 = vld [vmem:[%s637_s1 + $0x1a8] sm:$0xff]  ;;  %v15_v51 = vld [vmem:[%s636_s0] sm:$0xff]  ;;  %v82_v55 = vld [vmem:[%s637_s1 + $0x198] sm:$0xff] }
  0x1f   :  { %218 = vmatprep.subr.mxu1 %v370_v2  ;;  %328 = vmatprep.subr.mxu0 %v48_v43  ;;  %v20_v52 = vld [vmem:[%s636_s0 + $0x28] sm:$0xff]  ;;  %v83_v53 = vld [vmem:[%s637_s1 + $0x1a0] sm:$0xff]  ;;  %v81_v58 = vld [vmem:[%s637_s1 + $0x190] sm:$0xff] }
  0x20   :  { %219 = vmatpush1.msra.mxu1 %v64_v44  ;;  %329 = vmatpush3.msra.mxu0 %v32_v45  ;;  %v19_v56 = vld [vmem:[%s636_s0 + $0x20] sm:$0xff]  ;;  %v24_v57 = vld [vmem:[%s636_s0 + $0x48] sm:$0xff]  ;;  %v17_v63 = vld [vmem:[%s636_s0 + $0x10] sm:$0xff] }
  0x21   :  { %220 = vmatprep.subr.mxu1 %v370_v2  ;;  %330 = vmatprep.subr.mxu0 %v47_v46  ;;  %v80_v59 = vld [vmem:[%s637_s1 + $0x188] sm:$0xff]  ;;  %v23_v60 = vld [vmem:[%s636_s0 + $0x40] sm:$0xff]  ;;  %v22_v0 = vld [vmem:[%s636_s0 + $0x38] sm:$0xff] }
  0x22   :  { %221 = vmatpush1.msra.mxu1 %v63_v47  ;;  %331 = vmatpush3.msra.mxu0 %v31_v48  ;;  %v28_v61 = vld [vmem:[%s636_s0 + $0x68] sm:$0xff]  ;;  %v79_v62 = vld [vmem:[%s637_s1 + $0x180] sm:$0xff]  ;;  %v21_v3 = vld [vmem:[%s636_s0 + $0x30] sm:$0xff] }
  0x23   :  { %242 = vmatprep.subr.mxu1 %v370_v2  ;;  %169 = vmatprep.mubr.f32.mxu0 %v16_v49  ;;  %v27_v1 = vld [vmem:[%s636_s0 + $0x60] sm:$0xff]  ;;  %v25_v4 = vld [vmem:[%s636_s0 + $0x50] sm:$0xff]  ;;  %v30_v5 = vld [vmem:[%s636_s0 + $0x78] sm:$0xff] }
  0x24   :  { %243 = vmatpush2.msra.mxu1 %v84_v50  ;;  %170 = vmatmul.mubr.f32.vlgmr.msra.gmra.mxu0 %v15_v51  ;;  %v29_v6 = vld [vmem:[%s636_s0 + $0x70] sm:$0xff]  ;;  %v295_v12 = vld [vmem:[%s638_s2] ss:$0 sm:$0xff] }
  0x25   :  { %244 = vmatprep.subr.mxu1 %v370_v2  ;;  %174 = vmatprep.mubr.f32.mxu0 %v20_v52 }
  0x26   :  { %245 = vmatpush2.msra.mxu1 %v83_v53  ;;  %296 = vmatprep.mubr.msk.f32.mxu1 %vm92_vm0, %v18_v54 }
  0x27   :  { %246 = vmatprep.subr.mxu1 %v370_v2 }
  0x28   :  { %247 = vmatpush2.msra.mxu1 %v82_v55  ;;  %175 = vmatmul.mubr.f32.gmra.mxu0 %v19_v56 }
  0x29   :  { %248 = vmatprep.subr.mxu1 %v370_v2  ;;  %179 = vmatprep.mubr.f32.mxu0 %v24_v57 }
  0x2a   :  { %249 = vmatpush2.msra.mxu1 %v81_v58 }
  0x2b   :  { %250 = vmatprep.subr.mxu1 %v370_v2 }
  0x2c   :  { %251 = vmatpush2.msra.mxu1 %v80_v59  ;;  %180 = vmatmul.mubr.f32.gmra.mxu0 %v23_v60 }
  0x2d   :  { %252 = vmatprep.subr.mxu1 %v370_v2  ;;  %184 = vmatprep.mubr.f32.mxu0 %v28_v61  ;;  %v26_v2 = vld [vmem:[%s636_s0 + $0x58] sm:$0xff]  ;;  %s371_s0 = smov [#allocation2]  }
  0x2e   :  { %253 = vmatpush2.msra.mxu1 %v79_v62  ;;  %s284_s2 = sshll.u32 %s371_s0, 4  ;;  %s285_s2 = int_to_ptr.vmem [resolvable:$true] %s284_s2 }
  0x2f   :  { %255 = vmatmul.mubr.f32.vlgmr.msra.gmra.mxu1 %v17_v63  ;;  %s348_s18 = scalar_lea.vmem %s285_s2, 512  ;;  %p353_p1 = scmp.lt.s32.totalorder %s285_s2, %s285_s2 }
  0x30   :  { %297 = vmatprep.mubr.msk.f32.mxu1 %vm92_vm0, %v22_v0  ;;  %185 = vmatmul.mubr.f32.gmra.mxu0 %v27_v1  ;;  %p349_p0 = scmp.ne.s32.totalorder %s285_s2, %s348_s18  ;;  %p354_p2 = scmp.lt.s32.totalorder %s348_s18, %s348_s18 }
  0x32   :  { %p355_p3 = por %p354_p2, %p353_p1 }
  0x33   :  { %260 = vmatmul.mubr.f32.gmra.mxu1 %v21_v3 }
  0x34   :  { %298 = vmatprep.mubr.msk.f32.mxu1 %vm92_vm0, %v26_v2  ;;  %p356_p4 = pnand %p355_p3, %p349_p0 }
  0x37   :  { %265 = vmatmul.mubr.f32.gmra.mxu1 %v25_v4 }
  0x38   :  { %299 = vmatprep.mubr.msk.f32.mxu1 %vm92_vm0, %v30_v5 }
  0x3b   :  { %270 = vmatmul.mubr.f32.gmra.mxu1 %v29_v6 }
  0xe4   :  { %v332_v7 = vpop.f32.mrf.mxu0 }
  0xe6   :  { %v333_v8 = vpop.f32.mrf.mxu0 }
  0xe7   :  { %v334_v10 = vadd.f32 %v333_v8, %v332_v7 }
  0xe8   :  { %v335_v9 = vpop.f32.mrf.mxu0 }
  0xe9   :  { %v172_v15 = vadd.f32 %v334_v10, %v295_v12 }
  0xea   :  { %v336_v11 = vpop.f32.mrf.mxu0 }
  0xeb   :  { %v337_v14 = vadd.f32 %v336_v11, %v335_v9 }
  0xec   :  { %v338_v13 = vpop.f32.mrf.mxu0 }
  0xed   :  { %v177_v22 = vadd.f32 %v337_v14, %v295_v12 }
  0xee   :  { %v339_v16 = vpop.f32.mrf.mxu0 }
  0xef   :  { %v256_v17 = vpop.f32.mrf.mxu1  ;;  %v340_v21 = vadd.f32 %v339_v16, %v338_v13 }
  0xf0   :  { %v257_v18 = vadd.f32 %v256_v17, %v172_v15  ;;  %v341_v19 = vpop.f32.mrf.mxu0 }
  0xf1   :  { %v258_v20 = vpop.f32.mrf.mxu1  ;;  %v182_v28 = vadd.f32 %v340_v21, %v295_v12 }
  0xf2   :  { %275 = vst [vmem:[#allocation2] sm:$0xff] %v257_v18  ;;  %v342_v24 = vpop.f32.mrf.mxu0 }
  0xf3   :  { %v261_v23 = vpop.f32.mrf.mxu1  ;;  %v343_v27 = vadd.f32 %v342_v24, %v341_v19 }
  0xf4   :  { %v262_v25 = vadd.f32 %v261_v23, %v177_v22 }
  0xf5   :  { %v263_v26 = vpop.f32.mrf.mxu1  ;;  %v187_v32 = vadd.f32 %v343_v27, %v295_v12 }
  0xf6   :  { %276 = vst [vmem:[#allocation2 + $0x8] sm:$0xff] %v262_v25 }
  0xf7   :  { %v266_v29 = vpop.f32.mrf.mxu1 }
  0xf8   :  { %v267_v30 = vadd.f32 %v266_v29, %v182_v28 }
  0xf9   :  { %v268_v31 = vpop.f32.mrf.mxu1 }
  0xfa   :  { %277 = vst [vmem:[#allocation2 + $0x10] sm:$0xff] %v267_v30 }
  0xfb   :  { %v271_v33 = vpop.f32.mrf.mxu1 }
  0xfc   :  { %v272_v34 = vadd.f32 %v271_v33, %v187_v32 }
  0xfd   :  { %v273_v35 = vpop.f32.mrf.mxu1 }
  0xfe   :  { %278 = vst [vmem:[#allocation2 + $0x18] sm:$0xff] %v272_v34 }
  0xff   :  { %359 = shalt.err (!%p356_p4)
}
 0x100   :  { %s372_s19 = smov 128   ;;  %s373_s20 = smov 8  }
 0x101   :  { %290 = dma.vmem_to_hbm [thread:$0]  %s285_s2, 512, %s639_s3, [#allocation3], %s372_s19, %s372_s19, %s373_s20  }
 0x102   :  { %368 = dma.done.wait [#allocation3], 512  }
 0x103   :  { %369 = vsyncadd [#allocation3], 4294966784 }
 0x104   :  { %294 = vsyncpa [#allocation3], 1 }

</bundles_post_ra>
